<compile_context>
chip_gen: v7x
topology: tpu7x:2x2x1
jax: 0.10.0
libtpu: 0.0.40
codegen_flags: <defaults>
</compile_context>

<pallas_src>
import functools

import jax
import jax.numpy as jnp
from jax import lax
from jax.experimental import pallas as pl
from jax.experimental.pallas import tpu as pltpu

# ----------------------------- configuration --------------------------------
START_TAG = "<START>"
STOP_TAG = "<STOP>"
TAG_TO_IX = {"B": 0, "I": 1, "O": 2, START_TAG: 3, STOP_TAG: 4}
TAGSET_SIZE = len(TAG_TO_IX)

VOCAB_SIZE = 20
HIDDEN_DIM = 32          # d_model
FFN_DIM = 2048           # nn.Transformer default dim_feedforward
NUM_ENC_LAYERS = 6       # nn.Transformer defaults
NUM_DEC_LAYERS = 6
SEQ_LEN = 8
LN_EPS = 1e-5

SMEM_SPEC = pl.BlockSpec(memory_space=pltpu.MemorySpace.SMEM)


# --------------------------- in-kernel helpers --------------------------------
def _layer_norm(x, g, b, eps):
    mu = jnp.mean(x, axis=-1, keepdims=True)
    d = x - mu
    var = jnp.mean(d * d, axis=-1, keepdims=True)
    return d * lax.rsqrt(var + eps) * g + b


def _add_ln(x, y, g, b, eps):
    return _layer_norm(x + y, g, b, eps)


def _softmax_attn(q, k, v, wo, bo, scale):
    # single head, batch 1: scores (S, S)
    s = lax.dot_general(q, k, (((1,), (1,)), ((), ())),
                        preferred_element_type=jnp.float32) * scale
    s = s - jnp.max(s, axis=-1, keepdims=True)
    p = jnp.exp(s)
    p = p * pl.reciprocal(jnp.sum(p, axis=-1, keepdims=True), approx=True)
    ctx = jnp.dot(p, v, preferred_element_type=jnp.float32)
    return jnp.dot(ctx, wo, preferred_element_type=jnp.float32) + bo


def _ffn(x, w1, b1, w2, b2):
    # bf16 matmul inputs, f32 accumulate; bias / relu in f32.
    h = jnp.dot(x.astype(jnp.bfloat16), w1, preferred_element_type=jnp.float32) + b1
    h = jnp.maximum(h, 0.0)  # relu (nn.Transformer default activation)
    return jnp.dot(h.astype(jnp.bfloat16), w2, preferred_element_type=jnp.float32) + b2


# ------------------------------- kernels -------------------------------------
def _enc_stack_kernel(x_ref, wqkv_ref, bqkv_ref, wo_ref, bo_ref,
                      ln1g_ref, ln1b_ref, w1_ref, b1_ref, w2_ref, b2_ref,
                      ln2g_ref, ln2b_ref, fng_ref, fnb_ref,
                      o_ref, acc_ref, *, scale, eps):
    layer = pl.program_id(0)

    @pl.when(layer == 0)
    def _():
        acc_ref[...] = x_ref[...]

    x = acc_ref[...]

    # --- self attention ---
    q = jnp.dot(x, wqkv_ref[0, 0], preferred_element_type=jnp.float32) + bqkv_ref[0, 0]
    k = jnp.dot(x, wqkv_ref[0, 1], preferred_element_type=jnp.float32) + bqkv_ref[0, 1]
    v = jnp.dot(x, wqkv_ref[0, 2], preferred_element_type=jnp.float32) + bqkv_ref[0, 2]
    sa = _softmax_attn(q, k, v, wo_ref[0], bo_ref[0], scale)
    x = _add_ln(x, sa, ln1g_ref[0], ln1b_ref[0], eps)

    # --- feed-forward ---
    ff = _ffn(x, w1_ref[0], b1_ref[0], w2_ref[0], b2_ref[0])
    x = _add_ln(x, ff, ln2g_ref[0], ln2b_ref[0], eps)

    acc_ref[...] = x

    @pl.when(layer == pl.num_programs(0) - 1)
    def _():
        # final encoder LayerNorm fused into the epilogue
        o_ref[...] = _layer_norm(x, fng_ref[...], fnb_ref[...], eps)


def _dec_stack_kernel(tgt_ref, mem_ref,
                      sa_wqkv_ref, sa_bqkv_ref, sa_wo_ref, sa_bo_ref,
                      ln1g_ref, ln1b_ref,
                      ca_wq_ref, ca_bq_ref, ca_wkv_ref, ca_bkv_ref,
                      ca_wo_ref, ca_bo_ref, ln2g_ref, ln2b_ref,
                      w1_ref, b1_ref, w2_ref, b2_ref, ln3g_ref, ln3b_ref,
                      fng_ref, fnb_ref, wt_ref, bt_ref,
                      feats_ref, acc_ref, *, scale, eps):
    layer = pl.program_id(0)

    @pl.when(layer == 0)
    def _():
        acc_ref[...] = tgt_ref[...]

    x = acc_ref[...]
    mem = mem_ref[...]

    # --- decoder self attention (no masks: transformer(embeds, embeds)) ---
    q = jnp.dot(x, sa_wqkv_ref[0, 0], preferred_element_type=jnp.float32) + sa_bqkv_ref[0, 0]
    k = jnp.dot(x, sa_wqkv_ref[0, 1], preferred_element_type=jnp.float32) + sa_bqkv_ref[0, 1]
    v = jnp.dot(x, sa_wqkv_ref[0, 2], preferred_element_type=jnp.float32) + sa_bqkv_ref[0, 2]
    sa = _softmax_attn(q, k, v, sa_wo_ref[0], sa_bo_ref[0], scale)
    x = _add_ln(x, sa, ln1g_ref[0], ln1b_ref[0], eps)

    # --- cross attention (Q from tgt, K/V from encoder memory) ---
    q2 = jnp.dot(x, ca_wq_ref[0], preferred_element_type=jnp.float32) + ca_bq_ref[0]
    k2 = jnp.dot(mem, ca_wkv_ref[0, 0], preferred_element_type=jnp.float32) + ca_bkv_ref[0, 0]
    v2 = jnp.dot(mem, ca_wkv_ref[0, 1], preferred_element_type=jnp.float32) + ca_bkv_ref[0, 1]
    ca = _softmax_attn(q2, k2, v2, ca_wo_ref[0], ca_bo_ref[0], scale)
    x = _add_ln(x, ca, ln2g_ref[0], ln2b_ref[0], eps)

    # --- feed-forward ---
    ff = _ffn(x, w1_ref[0], b1_ref[0], w2_ref[0], b2_ref[0])
    x = _add_ln(x, ff, ln3g_ref[0], ln3b_ref[0], eps)

    acc_ref[...] = x

    @pl.when(layer == pl.num_programs(0) - 1)
    def _():
        # final decoder LayerNorm + hidden2tag fused into the epilogue
        y = _layer_norm(x, fng_ref[...], fnb_ref[...], eps)
        feats_ref[...] = (jnp.dot(y, wt_ref[...], preferred_element_type=jnp.float32)
                          + bt_ref[...])


def _viterbi_kernel(feats_ref, trans_ref, score_ref, path_ref, fv_ref, bp_ref,
                    *, seq_len, n_tags, start_idx, stop_idx):
    """CRF Viterbi decode, fully on the scalar core (SMEM in/out/scratch)."""
    S, T = seq_len, n_tags
    NEG_INIT = jnp.float32(-1e30)

    # init forward variable (ping-pong row 0): -10000 everywhere except START
    for j in range(T):
        fv_ref[0, j] = jnp.float32(0.0 if j == start_idx else -10000.0)

    def time_step(t, carry):
        cur = t % 2
        nxt = 1 - cur

        def tag_step(next_tag, carry2):
            def prev_step(prev, c):
                best_v, best_i = c
                val = fv_ref[cur, prev] + trans_ref[next_tag, prev]
                take = val > best_v
                return (jnp.where(take, val, best_v),
                        jnp.where(take, prev, best_i))

            best_v, best_i = lax.fori_loop(0, T, prev_step, (NEG_INIT, jnp.int32(0)))
            bp_ref[t, next_tag] = best_i
            fv_ref[nxt, next_tag] = best_v + feats_ref[t, next_tag]
            return carry2

        return lax.fori_loop(0, T, tag_step, carry)

    lax.fori_loop(0, S, time_step, jnp.int32(0))

    final_row = S % 2  # where the forward variable lives after S steps

    def term_step(tag, c):
        best_v, best_i = c
        val = fv_ref[final_row, tag] + trans_ref[stop_idx, tag]
        take = val > best_v
        return (jnp.where(take, val, best_v), jnp.where(take, tag, best_i))

    best_v, best_i = lax.fori_loop(0, T, term_step, (NEG_INIT, jnp.int32(0)))
    score_ref[0] = best_v
    path_ref[S - 1] = best_i

    def back_step(i, cur_tag):
        t = S - 1 - i
        prev = bp_ref[t, cur_tag]
        path_ref[t - 1] = prev
        return prev

    lax.fori_loop(0, S - 1, back_step, best_i)
    # TODO(synk): PyTorch asserts the final popped backpointer equals START; runtime assert skipped.


# ------------------------------ wrappers --------------------------------------
def pallas_encoder_stack(x, ew, final_norm):
    S, E = x.shape
    L = ew["wqkv"].shape[0]
    F = ew["w1"].shape[2]

    c2 = lambda l: (0, 0)
    s3 = lambda l: (l, 0, 0)
    s4 = lambda l: (l, 0, 0, 0)

    grid_spec = pltpu.PrefetchScalarGridSpec(
        num_scalar_prefetch=0,
        grid=(L,),
        in_specs=[
            pl.BlockSpec((S, E), c2),          # x
            pl.BlockSpec((1, 3, E, E), s4),    # wqkv
            pl.BlockSpec((1, 3, 1, E), s4),    # bqkv
            pl.BlockSpec((1, E, E), s3),       # wo
            pl.BlockSpec((1, 1, E), s3),       # bo
            pl.BlockSpec((1, 1, E), s3),       # ln1 gamma
            pl.BlockSpec((1, 1, E), s3),       # ln1 beta
            pl.BlockSpec((1, E, F), s3),       # w1 (bf16)
            pl.BlockSpec((1, 1, F), s3),       # b1
            pl.BlockSpec((1, F, E), s3),       # w2 (bf16)
            pl.BlockSpec((1, 1, E), s3),       # b2
            pl.BlockSpec((1, 1, E), s3),       # ln2 gamma
            pl.BlockSpec((1, 1, E), s3),       # ln2 beta
            pl.BlockSpec((1, E), c2),          # final norm gamma
            pl.BlockSpec((1, E), c2),          # final norm beta
        ],
        out_specs=pl.BlockSpec((S, E), c2),
        scratch_shapes=[pltpu.VMEM((S, E), jnp.float32)],
    )
    kernel = functools.partial(_enc_stack_kernel, scale=1.0 / (E ** 0.5), eps=LN_EPS)
    return pl.pallas_call(
        kernel,
        out_shape=jax.ShapeDtypeStruct((S, E), jnp.float32),
        grid_spec=grid_spec,
        compiler_params=pltpu.CompilerParams(dimension_semantics=("arbitrary",)),
    )(x, ew["wqkv"], ew["bqkv"], ew["wo"], ew["bo"],
      ew["ln1g"], ew["ln1b"], ew["w1"], ew["b1"], ew["w2"], ew["b2"],
      ew["ln2g"], ew["ln2b"], final_norm[0], final_norm[1])


def pallas_decoder_stack(tgt, mem, dw, final_norm, w_tag, b_tag):
    S, E = tgt.shape
    L = dw["sa_wqkv"].shape[0]
    F = dw["w1"].shape[2]
    T = w_tag.shape[1]

    c2 = lambda l: (0, 0)
    s3 = lambda l: (l, 0, 0)
    s4 = lambda l: (l, 0, 0, 0)

    grid_spec = pltpu.PrefetchScalarGridSpec(
        num_scalar_prefetch=0,
        grid=(L,),
        in_specs=[
            pl.BlockSpec((S, E), c2),          # tgt
            pl.BlockSpec((S, E), c2),          # encoder memory
            pl.BlockSpec((1, 3, E, E), s4),    # sa_wqkv
            pl.BlockSpec((1, 3, 1, E), s4),    # sa_bqkv
            pl.BlockSpec((1, E, E), s3),       # sa_wo
            pl.BlockSpec((1, 1, E), s3),       # sa_bo
            pl.BlockSpec((1, 1, E), s3),       # ln1 gamma
            pl.BlockSpec((1, 1, E), s3),       # ln1 beta
            pl.BlockSpec((1, E, E), s3),       # ca_wq
            pl.BlockSpec((1, 1, E), s3),       # ca_bq
            pl.BlockSpec((1, 2, E, E), s4),    # ca_wkv
            pl.BlockSpec((1, 2, 1, E), s4),    # ca_bkv
            pl.BlockSpec((1, E, E), s3),       # ca_wo
            pl.BlockSpec((1, 1, E), s3),       # ca_bo
            pl.BlockSpec((1, 1, E), s3),       # ln2 gamma
            pl.BlockSpec((1, 1, E), s3),       # ln2 beta
            pl.BlockSpec((1, E, F), s3),       # w1 (bf16)
            pl.BlockSpec((1, 1, F), s3),       # b1
            pl.BlockSpec((1, F, E), s3),       # w2 (bf16)
            pl.BlockSpec((1, 1, E), s3),       # b2
            pl.BlockSpec((1, 1, E), s3),       # ln3 gamma
            pl.BlockSpec((1, 1, E), s3),       # ln3 beta
            pl.BlockSpec((1, E), c2),          # final norm gamma
            pl.BlockSpec((1, E), c2),          # final norm beta
            pl.BlockSpec((E, T), c2),          # hidden2tag weight
            pl.BlockSpec((1, T), c2),          # hidden2tag bias
        ],
        out_specs=pl.BlockSpec((S, T), c2),
        scratch_shapes=[pltpu.VMEM((S, E), jnp.float32)],
    )
    kernel = functools.partial(_dec_stack_kernel, scale=1.0 / (E ** 0.5), eps=LN_EPS)
    return pl.pallas_call(
        kernel,
        out_shape=jax.ShapeDtypeStruct((S, T), jnp.float32),
        grid_spec=grid_spec,
        compiler_params=pltpu.CompilerParams(dimension_semantics=("arbitrary",)),
    )(tgt, mem,
      dw["sa_wqkv"], dw["sa_bqkv"], dw["sa_wo"], dw["sa_bo"], dw["ln1g"], dw["ln1b"],
      dw["ca_wq"], dw["ca_bq"], dw["ca_wkv"], dw["ca_bkv"], dw["ca_wo"], dw["ca_bo"],
      dw["ln2g"], dw["ln2b"],
      dw["w1"], dw["b1"], dw["w2"], dw["b2"], dw["ln3g"], dw["ln3b"],
      final_norm[0], final_norm[1], w_tag, b_tag)


def pallas_viterbi(feats, transitions):
    S = feats.shape[0]
    T = transitions.shape[0]
    kernel = functools.partial(
        _viterbi_kernel, seq_len=S, n_tags=T,
        start_idx=TAG_TO_IX[START_TAG], stop_idx=TAG_TO_IX[STOP_TAG])
    score, path = pl.pallas_call(
        kernel,
        out_shape=(jax.ShapeDtypeStruct((1,), jnp.float32),
                   jax.ShapeDtypeStruct((S,), jnp.int32)),
        in_specs=[SMEM_SPEC, SMEM_SPEC],
        out_specs=(SMEM_SPEC, SMEM_SPEC),
        scratch_shapes=[pltpu.SMEM((2, T), jnp.float32),
                        pltpu.SMEM((S, T), jnp.int32)],
    )(feats, transitions)
    return score[0], path


# --------------------------- parameter init -----------------------------------
def _stacked_dense(key, n_layers, fan_in, fan_out, dtype=jnp.float32, scale=0.1):
    kw, kb = jax.random.split(key)
    w = (scale * jax.random.normal(kw, (n_layers, fan_in, fan_out), jnp.float32)).astype(dtype)
    b = scale * jax.random.normal(kb, (n_layers, 1, fan_out), jnp.float32)
    return w, b


def _stacked_proj(key, n_layers, n_proj, e, scale=0.1):
    """n_proj (E, E) projections stacked on a leading axis (no lane padding needed)."""
    kw, kb = jax.random.split(key)
    w = scale * jax.random.normal(kw, (n_layers, n_proj, e, e), jnp.float32)
    b = scale * jax.random.normal(kb, (n_layers, n_proj, 1, e), jnp.float32)
    return w, b


def _enc_stack_params(key, n_layers, e, ff):
    ks = jax.random.split(key, 4)
    wqkv, bqkv = _stacked_proj(ks[0], n_layers, 3, e)
    wo, bo = _stacked_dense(ks[1], n_layers, e, e)
    w1, b1 = _stacked_dense(ks[2], n_layers, e, ff, dtype=jnp.bfloat16)
    w2, b2 = _stacked_dense(ks[3], n_layers, ff, e, dtype=jnp.bfloat16)
    g = jnp.ones((n_layers, 1, e), jnp.float32)
    z = jnp.zeros((n_layers, 1, e), jnp.float32)
    return dict(wqkv=wqkv, bqkv=bqkv, wo=wo, bo=bo,
                ln1g=g, ln1b=z, w1=w1, b1=b1, w2=w2, b2=b2, ln2g=g, ln2b=z)


def _dec_stack_params(key, n_layers, e, ff):
    ks = jax.random.split(key, 7)
    sa_wqkv, sa_bqkv = _stacked_proj(ks[0], n_layers, 3, e)
    sa_wo, sa_bo = _stacked_dense(ks[1], n_layers, e, e)
    ca_wq, ca_bq = _stacked_dense(ks[2], n_layers, e, e)
    ca_wkv, ca_bkv = _stacked_proj(ks[3], n_layers, 2, e)
    ca_wo, ca_bo = _stacked_dense(ks[4], n_layers, e, e)
    w1, b1 = _stacked_dense(ks[5], n_layers, e, ff, dtype=jnp.bfloat16)
    w2, b2 = _stacked_dense(ks[6], n_layers, ff, e, dtype=jnp.bfloat16)
    g = jnp.ones((n_layers, 1, e), jnp.float32)
    z = jnp.zeros((n_layers, 1, e), jnp.float32)
    return dict(sa_wqkv=sa_wqkv, sa_bqkv=sa_bqkv, sa_wo=sa_wo, sa_bo=sa_bo,
                ln1g=g, ln1b=z,
                ca_wq=ca_wq, ca_bq=ca_bq, ca_wkv=ca_wkv, ca_bkv=ca_bkv,
                ca_wo=ca_wo, ca_bo=ca_bo, ln2g=g, ln2b=z,
                w1=w1, b1=b1, w2=w2, b2=b2, ln3g=g, ln3b=z)


def init_params(key):
    k_emb, k_tag, k_trans, k_enc, k_dec = jax.random.split(key, 5)

    embed = 0.1 * jax.random.normal(k_emb, (VOCAB_SIZE, HIDDEN_DIM), jnp.float32)

    kw, kb = jax.random.split(k_tag)
    w_tag = 0.1 * jax.random.normal(kw, (HIDDEN_DIM, TAGSET_SIZE), jnp.float32)
    b_tag = 0.1 * jax.random.normal(kb, (1, TAGSET_SIZE), jnp.float32)

    transitions = jax.random.normal(k_trans, (TAGSET_SIZE, TAGSET_SIZE), jnp.float32)
    transitions = transitions.at[TAG_TO_IX[START_TAG], :].set(-10000.0)
    transitions = transitions.at[:, TAG_TO_IX[STOP_TAG]].set(-10000.0)

    return dict(
        embed=embed,
        enc=_enc_stack_params(k_enc, NUM_ENC_LAYERS, HIDDEN_DIM, FFN_DIM),
        dec=_dec_stack_params(k_dec, NUM_DEC_LAYERS, HIDDEN_DIM, FFN_DIM),
        enc_norm=(jnp.ones((1, HIDDEN_DIM), jnp.float32),
                  jnp.zeros((1, HIDDEN_DIM), jnp.float32)),
        dec_norm=(jnp.ones((1, HIDDEN_DIM), jnp.float32),
                  jnp.zeros((1, HIDDEN_DIM), jnp.float32)),
        w_tag=w_tag, b_tag=b_tag,
        transitions=transitions,
    )


# ------------------------------- forward --------------------------------------
def transformer_crf_forward(params, sentence):
    embeds = params["embed"][sentence]                                      # (S, E) glue gather
    mem = pallas_encoder_stack(embeds, params["enc"], params["enc_norm"])   # launch 1: 6 enc layers + final LN
    feats = pallas_decoder_stack(embeds, mem, params["dec"], params["dec_norm"],
                                 params["w_tag"], params["b_tag"])          # launch 2: 6 dec layers + LN + hidden2tag
    score, tag_seq = pallas_viterbi(feats, params["transitions"])           # launch 3: CRF Viterbi decode
    return score, tag_seq


# --------------------------------- main ----------------------------------------
if __name__ == "__main__":
    key = jax.random.PRNGKey(0)
    k_params, k_sent = jax.random.split(key)
    params = init_params(k_params)
    sentence = jax.random.randint(k_sent, (SEQ_LEN,), 0, VOCAB_SIZE, dtype=jnp.int32)

    fwd = jax.jit(transformer_crf_forward)
    score, tag_seq = fwd(params, sentence)
    jax.block_until_ready((score, tag_seq))
    print("KERNEL_OK")
</pallas_src>

<mosaic_0001>
module attributes {stable_mosaic.version = 11 : i64} {
  func.func @_enc_stack_kernel(%arg0: i32, %arg1: memref<8x32xf32, #tpu.memory_space<vmem>>, %arg2: memref<1x3x32x32xf32, #tpu.memory_space<vmem>>, %arg3: memref<1x3x1x32xf32, #tpu.memory_space<vmem>>, %arg4: memref<1x32x32xf32, #tpu.memory_space<vmem>>, %arg5: memref<1x1x32xf32, #tpu.memory_space<vmem>>, %arg6: memref<1x1x32xf32, #tpu.memory_space<vmem>>, %arg7: memref<1x1x32xf32, #tpu.memory_space<vmem>>, %arg8: memref<1x32x2048xbf16, #tpu.memory_space<vmem>>, %arg9: memref<1x1x2048xf32, #tpu.memory_space<vmem>>, %arg10: memref<1x2048x32xbf16, #tpu.memory_space<vmem>>, %arg11: memref<1x1x32xf32, #tpu.memory_space<vmem>>, %arg12: memref<1x1x32xf32, #tpu.memory_space<vmem>>, %arg13: memref<1x1x32xf32, #tpu.memory_space<vmem>>, %arg14: memref<1x32xf32, #tpu.memory_space<vmem>>, %arg15: memref<1x32xf32, #tpu.memory_space<vmem>>, %arg16: memref<8x32xf32, #tpu.memory_space<vmem>>, %arg17: memref<8x32xf32, #tpu.memory_space<vmem>>) attributes {dimension_semantics = [#tpu.dimension_semantics<arbitrary>], iteration_bounds = array<i64: 6>, scalar_prefetch = 0 : i64, scratch_operands = 1 : i64, tpu.core_type = #tpu.core_type<tc>, window_params = [{pipeline_mode = #tpu.pipeline_mode<synchronous>, transform_indices = @transform_0, window_bounds = array<i64: 8, 32>}, {transform_indices = @transform_1, window_bounds = array<i64: 1, 3, 32, 32>}, {transform_indices = @transform_2, window_bounds = array<i64: 1, 3, 1, 32>}, {transform_indices = @transform_3, window_bounds = array<i64: 1, 32, 32>}, {transform_indices = @transform_4, window_bounds = array<i64: 1, 1, 32>}, {transform_indices = @transform_5, window_bounds = array<i64: 1, 1, 32>}, {transform_indices = @transform_6, window_bounds = array<i64: 1, 1, 32>}, {transform_indices = @transform_7, window_bounds = array<i64: 1, 32, 2048>}, {transform_indices = @transform_8, window_bounds = array<i64: 1, 1, 2048>}, {transform_indices = @transform_9, window_bounds = array<i64: 1, 2048, 32>}, {transform_indices = @transform_10, window_bounds = array<i64: 1, 1, 32>}, {transform_indices = @transform_11, window_bounds = array<i64: 1, 1, 32>}, {transform_indices = @transform_12, window_bounds = array<i64: 1, 1, 32>}, {pipeline_mode = #tpu.pipeline_mode<synchronous>, transform_indices = @transform_13, window_bounds = array<i64: 1, 32>}, {pipeline_mode = #tpu.pipeline_mode<synchronous>, transform_indices = @transform_14, window_bounds = array<i64: 1, 32>}, {pipeline_mode = #tpu.pipeline_mode<synchronous>, transform_indices = @transform_15, window_bounds = array<i64: 8, 32>}]} {
    %c0_i32 = arith.constant 0 : i32
    %0 = arith.cmpi eq, %arg0, %c0_i32 : i32
    %1 = arith.extui %0 : i1 to i32
    %c0_i32_0 = arith.constant 0 : i32
    %2 = arith.cmpi ne, %1, %c0_i32_0 : i32
    scf.if %2 {
      %c0_78 = arith.constant 0 : index
      %c0_79 = arith.constant 0 : index
      %118 = vector.load %arg1[%c0_78, %c0_79] : memref<8x32xf32, #tpu.memory_space<vmem>>, vector<8x32xf32>
      %c0_80 = arith.constant 0 : index
      %c0_81 = arith.constant 0 : index
      %119 = vector.load %arg17[%c0_80, %c0_81] : memref<8x32xf32, #tpu.memory_space<vmem>>, vector<8x32xf32>
      tpu.vector_store %arg17[%c0_80, %c0_81], %118 {strides = array<i32>} : memref<8x32xf32, #tpu.memory_space<vmem>>, vector<8x32xf32>,
    } else {
    }
    %c0 = arith.constant 0 : index
    %c0_1 = arith.constant 0 : index
    %3 = vector.load %arg17[%c0, %c0_1] : memref<8x32xf32, #tpu.memory_space<vmem>>, vector<8x32xf32>
    %c0_2 = arith.constant 0 : index
    %c0_3 = arith.constant 0 : index
    %c0_4 = arith.constant 0 : index
    %c0_5 = arith.constant 0 : index
    %4 = vector.load %arg2[%c0_2, %c0_3, %c0_4, %c0_5] : memref<1x3x32x32xf32, #tpu.memory_space<vmem>>, vector<1x1x32x32xf32>
    %5 = vector.shape_cast %4 : vector<1x1x32x32xf32> to vector<32x32xf32>
    %cst = arith.constant dense<0.000000e+00> : vector<8x32xf32>
    %6 = tpu.matmul %3, %5, %cst {dimension_numbers = #tpu.dot_dimension_numbers<[1], [0], [0], [1], [0, 0, 1, 1], [], []>} : vector<8x32xf32>, vector<32x32xf32>, vector<8x32xf32> -> vector<8x32xf32>
    %c0_6 = arith.constant 0 : index
    %c0_7 = arith.constant 0 : index
    %c0_8 = arith.constant 0 : index
    %c0_9 = arith.constant 0 : index
    %7 = vector.load %arg3[%c0_6, %c0_7, %c0_8, %c0_9] : memref<1x3x1x32xf32, #tpu.memory_space<vmem>>, vector<1x1x1x32xf32>
    %8 = vector.shape_cast %7 : vector<1x1x1x32xf32> to vector<1x32xf32>
    %9 = vector.broadcast %8 : vector<1x32xf32> to vector<8x32xf32>
    %10 = arith.addf %6, %9 : vector<8x32xf32>
    %c0_10 = arith.constant 0 : index
    %c1 = arith.constant 1 : index
    %c0_11 = arith.constant 0 : index
    %c0_12 = arith.constant 0 : index
    %11 = vector.load %arg2[%c0_10, %c1, %c0_11, %c0_12] : memref<1x3x32x32xf32, #tpu.memory_space<vmem>>, vector<1x1x32x32xf32>
    %12 = vector.shape_cast %11 : vector<1x1x32x32xf32> to vector<32x32xf32>
    %cst_13 = arith.constant dense<0.000000e+00> : vector<8x32xf32>
    %13 = tpu.matmul %3, %12, %cst_13 {dimension_numbers = #tpu.dot_dimension_numbers<[1], [0], [0], [1], [0, 0, 1, 1], [], []>} : vector<8x32xf32>, vector<32x32xf32>, vector<8x32xf32> -> vector<8x32xf32>
    %c0_14 = arith.constant 0 : index
    %c1_15 = arith.constant 1 : index
    %c0_16 = arith.constant 0 : index
    %c0_17 = arith.constant 0 : index
    %14 = vector.load %arg3[%c0_14, %c1_15, %c0_16, %c0_17] : memref<1x3x1x32xf32, #tpu.memory_space<vmem>>, vector<1x1x1x32xf32>
    %15 = vector.shape_cast %14 : vector<1x1x1x32xf32> to vector<1x32xf32>
    %16 = vector.broadcast %15 : vector<1x32xf32> to vector<8x32xf32>
    %17 = arith.addf %13, %16 : vector<8x32xf32>
    %c0_18 = arith.constant 0 : index
    %c2 = arith.constant 2 : index
    %c0_19 = arith.constant 0 : index
    %c0_20 = arith.constant 0 : index
    %18 = vector.load %arg2[%c0_18, %c2, %c0_19, %c0_20] : memref<1x3x32x32xf32, #tpu.memory_space<vmem>>, vector<1x1x32x32xf32>
    %19 = vector.shape_cast %18 : vector<1x1x32x32xf32> to vector<32x32xf32>
    %cst_21 = arith.constant dense<0.000000e+00> : vector<8x32xf32>
    %20 = tpu.matmul %3, %19, %cst_21 {dimension_numbers = #tpu.dot_dimension_numbers<[1], [0], [0], [1], [0, 0, 1, 1], [], []>} : vector<8x32xf32>, vector<32x32xf32>, vector<8x32xf32> -> vector<8x32xf32>
    %c0_22 = arith.constant 0 : index
    %c2_23 = arith.constant 2 : index
    %c0_24 = arith.constant 0 : index
    %c0_25 = arith.constant 0 : index
    %21 = vector.load %arg3[%c0_22, %c2_23, %c0_24, %c0_25] : memref<1x3x1x32xf32, #tpu.memory_space<vmem>>, vector<1x1x1x32xf32>
    %22 = vector.shape_cast %21 : vector<1x1x1x32xf32> to vector<1x32xf32>
    %23 = vector.broadcast %22 : vector<1x32xf32> to vector<8x32xf32>
    %24 = arith.addf %20, %23 : vector<8x32xf32>
    %c0_26 = arith.constant 0 : index
    %c0_27 = arith.constant 0 : index
    %c0_28 = arith.constant 0 : index
    %25 = vector.load %arg4[%c0_26, %c0_27, %c0_28] : memref<1x32x32xf32, #tpu.memory_space<vmem>>, vector<1x32x32xf32>
    %26 = vector.shape_cast %25 : vector<1x32x32xf32> to vector<32x32xf32>
    %c0_29 = arith.constant 0 : index
    %c0_30 = arith.constant 0 : index
    %c0_31 = arith.constant 0 : index
    %27 = vector.load %arg5[%c0_29, %c0_30, %c0_31] : memref<1x1x32xf32, #tpu.memory_space<vmem>>, vector<1x1x32xf32>
    %28 = vector.shape_cast %27 : vector<1x1x32xf32> to vector<1x32xf32>
    %cst_32 = arith.constant dense<0.000000e+00> : vector<8x8xf32>
    %29 = tpu.matmul %10, %17, %cst_32 {dimension_numbers = #tpu.dot_dimension_numbers<[1], [1], [0], [0], [0, 0, 1, 0], [], []>} : vector<8x32xf32>, vector<8x32xf32>, vector<8x8xf32> -> vector<8x8xf32>
    %cst_33 = arith.constant 0.176776692 : f32
    %30 = vector.broadcast %cst_33 : f32 to vector<8x8xf32>
    %31 = arith.mulf %29, %30 : vector<8x8xf32>
    %cst_34 = arith.constant dense<0xFF800000> : vector<8xf32>
    %32 = vector.multi_reduction <maximumf>, %31, %cst_34 [1] : vector<8x8xf32> to vector<8xf32>
    %33 = vector.shape_cast %32 : vector<8xf32> to vector<8x1xf32>
    %34 = vector.broadcast %33 : vector<8x1xf32> to vector<8x8xf32>
    %35 = arith.subf %31, %34 : vector<8x8xf32>
    %36 = math.exp %35 : vector<8x8xf32>
    %cst_35 = arith.constant dense<0.000000e+00> : vector<8xf32>
    %37 = vector.multi_reduction <add>, %36, %cst_35 [1] : vector<8x8xf32> to vector<8xf32>
    %38 = vector.shape_cast %37 : vector<8xf32> to vector<8x1xf32>
    %39 = tpu.reciprocal %38 {approx = true} : vector<8x1xf32> -> vector<8x1xf32>
    %40 = vector.broadcast %39 : vector<8x1xf32> to vector<8x8xf32>
    %41 = arith.mulf %36, %40 : vector<8x8xf32>
    %cst_36 = arith.constant dense<0.000000e+00> : vector<8x32xf32>
    %42 = tpu.matmul %41, %24, %cst_36 {dimension_numbers = #tpu.dot_dimension_numbers<[1], [0], [0], [1], [0, 0, 1, 1], [], []>} : vector<8x8xf32>, vector<8x32xf32>, vector<8x32xf32> -> vector<8x32xf32>
    %cst_37 = arith.constant dense<0.000000e+00> : vector<8x32xf32>
    %43 = tpu.matmul %42, %26, %cst_37 {dimension_numbers = #tpu.dot_dimension_numbers<[1], [0], [0], [1], [0, 0, 1, 1], [], []>} : vector<8x32xf32>, vector<32x32xf32>, vector<8x32xf32> -> vector<8x32xf32>
    %44 = vector.broadcast %28 : vector<1x32xf32> to vector<8x32xf32>
    %45 = arith.addf %43, %44 : vector<8x32xf32>
    %c0_38 = arith.constant 0 : index
    %c0_39 = arith.constant 0 : index
    %c0_40 = arith.constant 0 : index
    %46 = vector.load %arg6[%c0_38, %c0_39, %c0_40] : memref<1x1x32xf32, #tpu.memory_space<vmem>>, vector<1x1x32xf32>
    %47 = vector.shape_cast %46 : vector<1x1x32xf32> to vector<1x32xf32>
    %c0_41 = arith.constant 0 : index
    %c0_42 = arith.constant 0 : index
    %c0_43 = arith.constant 0 : index
    %48 = vector.load %arg7[%c0_41, %c0_42, %c0_43] : memref<1x1x32xf32, #tpu.memory_space<vmem>>, vector<1x1x32xf32>
    %49 = vector.shape_cast %48 : vector<1x1x32xf32> to vector<1x32xf32>
    %50 = arith.addf %3, %45 : vector<8x32xf32>
    %cst_44 = arith.constant dense<0.000000e+00> : vector<8xf32>
    %51 = vector.multi_reduction <add>, %50, %cst_44 [1] : vector<8x32xf32> to vector<8xf32>
    %52 = vector.shape_cast %51 : vector<8xf32> to vector<8x1xf32>
    %cst_45 = arith.constant 3.200000e+01 : f32
    %53 = vector.broadcast %cst_45 : f32 to vector<8x1xf32>
    %54 = arith.divf %52, %53 : vector<8x1xf32>
    %55 = vector.broadcast %54 : vector<8x1xf32> to vector<8x32xf32>
    %56 = arith.subf %50, %55 : vector<8x32xf32>
    %57 = arith.mulf %56, %56 : vector<8x32xf32>
    %cst_46 = arith.constant dense<0.000000e+00> : vector<8xf32>
    %58 = vector.multi_reduction <add>, %57, %cst_46 [1] : vector<8x32xf32> to vector<8xf32>
    %59 = vector.shape_cast %58 : vector<8xf32> to vector<8x1xf32>
    %cst_47 = arith.constant 3.200000e+01 : f32
    %60 = vector.broadcast %cst_47 : f32 to vector<8x1xf32>
    %61 = arith.divf %59, %60 : vector<8x1xf32>
    %cst_48 = arith.constant 9.99999974E-6 : f32
    %62 = vector.broadcast %cst_48 : f32 to vector<8x1xf32>
    %63 = arith.addf %61, %62 : vector<8x1xf32>
    %64 = math.rsqrt %63 : vector<8x1xf32>
    %65 = vector.broadcast %64 : vector<8x1xf32> to vector<8x32xf32>
    %66 = arith.mulf %56, %65 : vector<8x32xf32>
    %67 = vector.broadcast %47 : vector<1x32xf32> to vector<8x32xf32>
    %68 = arith.mulf %66, %67 : vector<8x32xf32>
    %69 = vector.broadcast %49 : vector<1x32xf32> to vector<8x32xf32>
    %70 = arith.addf %68, %69 : vector<8x32xf32>
    %c0_49 = arith.constant 0 : index
    %c0_50 = arith.constant 0 : index
    %c0_51 = arith.constant 0 : index
    %71 = vector.load %arg8[%c0_49, %c0_50, %c0_51] : memref<1x32x2048xbf16, #tpu.memory_space<vmem>>, vector<1x32x2048xbf16>
    %72 = vector.shape_cast %71 : vector<1x32x2048xbf16> to vector<32x2048xbf16>
    %c0_52 = arith.constant 0 : index
    %c0_53 = arith.constant 0 : index
    %c0_54 = arith.constant 0 : index
    %73 = vector.load %arg9[%c0_52, %c0_53, %c0_54] : memref<1x1x2048xf32, #tpu.memory_space<vmem>>, vector<1x1x2048xf32>
    %74 = vector.shape_cast %73 : vector<1x1x2048xf32> to vector<1x2048xf32>
    %c0_55 = arith.constant 0 : index
    %c0_56 = arith.constant 0 : index
    %c0_57 = arith.constant 0 : index
    %75 = vector.load %arg10[%c0_55, %c0_56, %c0_57] : memref<1x2048x32xbf16, #tpu.memory_space<vmem>>, vector<1x2048x32xbf16>
    %76 = vector.shape_cast %75 : vector<1x2048x32xbf16> to vector<2048x32xbf16>
    %c0_58 = arith.constant 0 : index
    %c0_59 = arith.constant 0 : index
    %c0_60 = arith.constant 0 : index
    %77 = vector.load %arg11[%c0_58, %c0_59, %c0_60] : memref<1x1x32xf32, #tpu.memory_space<vmem>>, vector<1x1x32xf32>
    %78 = vector.shape_cast %77 : vector<1x1x32xf32> to vector<1x32xf32>
    %79 = arith.truncf %70 : vector<8x32xf32> to vector<8x32xbf16>
    %cst_61 = arith.constant dense<0.000000e+00> : vector<8x2048xf32>
    %80 = tpu.matmul %79, %72, %cst_61 {dimension_numbers = #tpu.dot_dimension_numbers<[1], [0], [0], [1], [0, 0, 1, 1], [], []>} : vector<8x32xbf16>, vector<32x2048xbf16>, vector<8x2048xf32> -> vector<8x2048xf32>
    %81 = vector.broadcast %74 : vector<1x2048xf32> to vector<8x2048xf32>
    %82 = arith.addf %80, %81 : vector<8x2048xf32>
    %cst_62 = arith.constant 0.000000e+00 : f32
    %83 = vector.broadcast %cst_62 : f32 to vector<8x2048xf32>
    %84 = arith.maximumf %82, %83 : vector<8x2048xf32>
    %85 = arith.truncf %84 : vector<8x2048xf32> to vector<8x2048xbf16>
    %cst_63 = arith.constant dense<0.000000e+00> : vector<8x32xf32>
    %86 = tpu.matmul %85, %76, %cst_63 {dimension_numbers = #tpu.dot_dimension_numbers<[1], [0], [0], [1], [0, 0, 1, 1], [], []>} : vector<8x2048xbf16>, vector<2048x32xbf16>, vector<8x32xf32> -> vector<8x32xf32>
    %87 = vector.broadcast %78 : vector<1x32xf32> to vector<8x32xf32>
    %88 = arith.addf %86, %87 : vector<8x32xf32>
    %c0_64 = arith.constant 0 : index
    %c0_65 = arith.constant 0 : index
    %c0_66 = arith.constant 0 : index
    %89 = vector.load %arg12[%c0_64, %c0_65, %c0_66] : memref<1x1x32xf32, #tpu.memory_space<vmem>>, vector<1x1x32xf32>
    %90 = vector.shape_cast %89 : vector<1x1x32xf32> to vector<1x32xf32>
    %c0_67 = arith.constant 0 : index
    %c0_68 = arith.constant 0 : index
    %c0_69 = arith.constant 0 : index
    %91 = vector.load %arg13[%c0_67, %c0_68, %c0_69] : memref<1x1x32xf32, #tpu.memory_space<vmem>>, vector<1x1x32xf32>
    %92 = vector.shape_cast %91 : vector<1x1x32xf32> to vector<1x32xf32>
    %93 = arith.addf %70, %88 : vector<8x32xf32>
    %cst_70 = arith.constant dense<0.000000e+00> : vector<8xf32>
    %94 = vector.multi_reduction <add>, %93, %cst_70 [1] : vector<8x32xf32> to vector<8xf32>
    %95 = vector.shape_cast %94 : vector<8xf32> to vector<8x1xf32>
    %cst_71 = arith.constant 3.200000e+01 : f32
    %96 = vector.broadcast %cst_71 : f32 to vector<8x1xf32>
    %97 = arith.divf %95, %96 : vector<8x1xf32>
    %98 = vector.broadcast %97 : vector<8x1xf32> to vector<8x32xf32>
    %99 = arith.subf %93, %98 : vector<8x32xf32>
    %100 = arith.mulf %99, %99 : vector<8x32xf32>
    %cst_72 = arith.constant dense<0.000000e+00> : vector<8xf32>
    %101 = vector.multi_reduction <add>, %100, %cst_72 [1] : vector<8x32xf32> to vector<8xf32>
    %102 = vector.shape_cast %101 : vector<8xf32> to vector<8x1xf32>
    %cst_73 = arith.constant 3.200000e+01 : f32
    %103 = vector.broadcast %cst_73 : f32 to vector<8x1xf32>
    %104 = arith.divf %102, %103 : vector<8x1xf32>
    %cst_74 = arith.constant 9.99999974E-6 : f32
    %105 = vector.broadcast %cst_74 : f32 to vector<8x1xf32>
    %106 = arith.addf %104, %105 : vector<8x1xf32>
    %107 = math.rsqrt %106 : vector<8x1xf32>
    %108 = vector.broadcast %107 : vector<8x1xf32> to vector<8x32xf32>
    %109 = arith.mulf %99, %108 : vector<8x32xf32>
    %110 = vector.broadcast %90 : vector<1x32xf32> to vector<8x32xf32>
    %111 = arith.mulf %109, %110 : vector<8x32xf32>
    %112 = vector.broadcast %92 : vector<1x32xf32> to vector<8x32xf32>
    %113 = arith.addf %111, %112 : vector<8x32xf32>
    %c0_75 = arith.constant 0 : index
    %c0_76 = arith.constant 0 : index
    %114 = vector.load %arg17[%c0_75, %c0_76] : memref<8x32xf32, #tpu.memory_space<vmem>>, vector<8x32xf32>
    tpu.vector_store %arg17[%c0_75, %c0_76], %113 {strides = array<i32>} : memref<8x32xf32, #tpu.memory_space<vmem>>, vector<8x32xf32>,
    %c5_i32 = arith.constant 5 : i32
    %115 = arith.cmpi eq, %arg0, %c5_i32 : i32
    %116 = arith.extui %115 : i1 to i32
    %c0_i32_77 = arith.constant 0 : i32
    %117 = arith.cmpi ne, %116, %c0_i32_77 : i32
    scf.if %117 {
      %c0_78 = arith.constant 0 : index
      %c0_79 = arith.constant 0 : index
      %118 = vector.load %arg14[%c0_78, %c0_79] : memref<1x32xf32, #tpu.memory_space<vmem>>, vector<1x32xf32>
      %c0_80 = arith.constant 0 : index
      %c0_81 = arith.constant 0 : index
      %119 = vector.load %arg15[%c0_80, %c0_81] : memref<1x32xf32, #tpu.memory_space<vmem>>, vector<1x32xf32>
      %cst_82 = arith.constant dense<0.000000e+00> : vector<8xf32>
      %120 = vector.multi_reduction <add>, %113, %cst_82 [1] : vector<8x32xf32> to vector<8xf32>
      %121 = vector.shape_cast %120 : vector<8xf32> to vector<8x1xf32>
      %cst_83 = arith.constant 3.200000e+01 : f32
      %122 = vector.broadcast %cst_83 : f32 to vector<8x1xf32>
      %123 = arith.divf %121, %122 : vector<8x1xf32>
      %124 = vector.broadcast %123 : vector<8x1xf32> to vector<8x32xf32>
      %125 = arith.subf %113, %124 : vector<8x32xf32>
      %126 = arith.mulf %125, %125 : vector<8x32xf32>
      %cst_84 = arith.constant dense<0.000000e+00> : vector<8xf32>
      %127 = vector.multi_reduction <add>, %126, %cst_84 [1] : vector<8x32xf32> to vector<8xf32>
      %128 = vector.shape_cast %127 : vector<8xf32> to vector<8x1xf32>
      %cst_85 = arith.constant 3.200000e+01 : f32
      %129 = vector.broadcast %cst_85 : f32 to vector<8x1xf32>
      %130 = arith.divf %128, %129 : vector<8x1xf32>
      %cst_86 = arith.constant 9.99999974E-6 : f32
      %131 = vector.broadcast %cst_86 : f32 to vector<8x1xf32>
      %132 = arith.addf %130, %131 : vector<8x1xf32>
      %133 = math.rsqrt %132 : vector<8x1xf32>
      %134 = vector.broadcast %133 : vector<8x1xf32> to vector<8x32xf32>
      %135 = arith.mulf %125, %134 : vector<8x32xf32>
      %136 = vector.broadcast %118 : vector<1x32xf32> to vector<8x32xf32>
      %137 = arith.mulf %135, %136 : vector<8x32xf32>
      %138 = vector.broadcast %119 : vector<1x32xf32> to vector<8x32xf32>
      %139 = arith.addf %137, %138 : vector<8x32xf32>
      %c0_87 = arith.constant 0 : index
      %c0_88 = arith.constant 0 : index
      %140 = vector.load %arg16[%c0_87, %c0_88] : memref<8x32xf32, #tpu.memory_space<vmem>>, vector<8x32xf32>
      tpu.vector_store %arg16[%c0_87, %c0_88], %139 {strides = array<i32>} : memref<8x32xf32, #tpu.memory_space<vmem>>, vector<8x32xf32>,
    } else {
    }
    return
  }
  func.func @transform_0(%arg0: i32) -> (i32, i32) {
    %c0_i32 = arith.constant 0 : i32
    %c0_i32_0 = arith.constant 0 : i32
    %c0_i32_1 = arith.constant 0 : i32
    return %c0_i32, %c0_i32_0 : i32, i32
  }
  func.func @transform_1(%arg0: i32) -> (i32, i32, i32, i32) {
    %c0_i32 = arith.constant 0 : i32
    %c0_i32_0 = arith.constant 0 : i32
    %c0_i32_1 = arith.constant 0 : i32
    %c0_i32_2 = arith.constant 0 : i32
    return %arg0, %c0_i32, %c0_i32_0, %c0_i32_1 : i32, i32, i32, i32
  }
  func.func @transform_2(%arg0: i32) -> (i32, i32, i32, i32) {
    %c0_i32 = arith.constant 0 : i32
    %c0_i32_0 = arith.constant 0 : i32
    %c0_i32_1 = arith.constant 0 : i32
    %c0_i32_2 = arith.constant 0 : i32
    return %arg0, %c0_i32, %c0_i32_0, %c0_i32_1 : i32, i32, i32, i32
  }
  func.func @transform_3(%arg0: i32) -> (i32, i32, i32) {
    %c0_i32 = arith.constant 0 : i32
    %c0_i32_0 = arith.constant 0 : i32
    %c0_i32_1 = arith.constant 0 : i32
    return %arg0, %c0_i32, %c0_i32_0 : i32, i32, i32
  }
  func.func @transform_4(%arg0: i32) -> (i32, i32, i32) {
    %c0_i32 = arith.constant 0 : i32
    %c0_i32_0 = arith.constant 0 : i32
    %c0_i32_1 = arith.constant 0 : i32
    return %arg0, %c0_i32, %c0_i32_0 : i32, i32, i32
  }
  func.func @transform_5(%arg0: i32) -> (i32, i32, i32) {
    %c0_i32 = arith.constant 0 : i32
    %c0_i32_0 = arith.constant 0 : i32
    %c0_i32_1 = arith.constant 0 : i32
    return %arg0, %c0_i32, %c0_i32_0 : i32, i32, i32
  }
  func.func @transform_6(%arg0: i32) -> (i32, i32, i32) {
    %c0_i32 = arith.constant 0 : i32
    %c0_i32_0 = arith.constant 0 : i32
    %c0_i32_1 = arith.constant 0 : i32
    return %arg0, %c0_i32, %c0_i32_0 : i32, i32, i32
  }
  func.func @transform_7(%arg0: i32) -> (i32, i32, i32) {
    %c0_i32 = arith.constant 0 : i32
    %c0_i32_0 = arith.constant 0 : i32
    %c0_i32_1 = arith.constant 0 : i32
    return %arg0, %c0_i32, %c0_i32_0 : i32, i32, i32
  }
  func.func @transform_8(%arg0: i32) -> (i32, i32, i32) {
    %c0_i32 = arith.constant 0 : i32
    %c0_i32_0 = arith.constant 0 : i32
    %c0_i32_1 = arith.constant 0 : i32
    return %arg0, %c0_i32, %c0_i32_0 : i32, i32, i32
  }
  func.func @transform_9(%arg0: i32) -> (i32, i32, i32) {
    %c0_i32 = arith.constant 0 : i32
    %c0_i32_0 = arith.constant 0 : i32
    %c0_i32_1 = arith.constant 0 : i32
    return %arg0, %c0_i32, %c0_i32_0 : i32, i32, i32
  }
  func.func @transform_10(%arg0: i32) -> (i32, i32, i32) {
    %c0_i32 = arith.constant 0 : i32
    %c0_i32_0 = arith.constant 0 : i32
    %c0_i32_1 = arith.constant 0 : i32
    return %arg0, %c0_i32, %c0_i32_0 : i32, i32, i32
  }
  func.func @transform_11(%arg0: i32) -> (i32, i32, i32) {
    %c0_i32 = arith.constant 0 : i32
    %c0_i32_0 = arith.constant 0 : i32
    %c0_i32_1 = arith.constant 0 : i32
    return %arg0, %c0_i32, %c0_i32_0 : i32, i32, i32
  }
  func.func @transform_12(%arg0: i32) -> (i32, i32, i32) {
    %c0_i32 = arith.constant 0 : i32
    %c0_i32_0 = arith.constant 0 : i32
    %c0_i32_1 = arith.constant 0 : i32
    return %arg0, %c0_i32, %c0_i32_0 : i32, i32, i32
  }
  func.func @transform_13(%arg0: i32) -> (i32, i32) {
    %c0_i32 = arith.constant 0 : i32
    %c0_i32_0 = arith.constant 0 : i32
    %c0_i32_1 = arith.constant 0 : i32
    return %c0_i32, %c0_i32_0 : i32, i32
  }
  func.func @transform_14(%arg0: i32) -> (i32, i32) {
    %c0_i32 = arith.constant 0 : i32
    %c0_i32_0 = arith.constant 0 : i32
    %c0_i32_1 = arith.constant 0 : i32
    return %c0_i32, %c0_i32_0 : i32, i32
  }
  func.func @transform_15(%arg0: i32) -> (i32, i32) {
    %c0_i32 = arith.constant 0 : i32
    %c0_i32_0 = arith.constant 0 : i32
    %c0_i32_1 = arith.constant 0 : i32
    return %c0_i32, %c0_i32_0 : i32, i32
  }
}

module attributes {stable_mosaic.version = 11 : i64} {
  func.func @_dec_stack_kernel(%arg0: i32, %arg1: memref<8x32xf32, #tpu.memory_space<vmem>>, %arg2: memref<8x32xf32, #tpu.memory_space<vmem>>, %arg3: memref<1x3x32x32xf32, #tpu.memory_space<vmem>>, %arg4: memref<1x3x1x32xf32, #tpu.memory_space<vmem>>, %arg5: memref<1x32x32xf32, #tpu.memory_space<vmem>>, %arg6: memref<1x1x32xf32, #tpu.memory_space<vmem>>, %arg7: memref<1x1x32xf32, #tpu.memory_space<vmem>>, %arg8: memref<1x1x32xf32, #tpu.memory_space<vmem>>, %arg9: memref<1x32x32xf32, #tpu.memory_space<vmem>>, %arg10: memref<1x1x32xf32, #tpu.memory_space<vmem>>, %arg11: memref<1x2x32x32xf32, #tpu.memory_space<vmem>>, %arg12: memref<1x2x1x32xf32, #tpu.memory_space<vmem>>, %arg13: memref<1x32x32xf32, #tpu.memory_space<vmem>>, %arg14: memref<1x1x32xf32, #tpu.memory_space<vmem>>, %arg15: memref<1x1x32xf32, #tpu.memory_space<vmem>>, %arg16: memref<1x1x32xf32, #tpu.memory_space<vmem>>, %arg17: memref<1x32x2048xbf16, #tpu.memory_space<vmem>>, %arg18: memref<1x1x2048xf32, #tpu.memory_space<vmem>>, %arg19: memref<1x2048x32xbf16, #tpu.memory_space<vmem>>, %arg20: memref<1x1x32xf32, #tpu.memory_space<vmem>>, %arg21: memref<1x1x32xf32, #tpu.memory_space<vmem>>, %arg22: memref<1x1x32xf32, #tpu.memory_space<vmem>>, %arg23: memref<1x32xf32, #tpu.memory_space<vmem>>, %arg24: memref<1x32xf32, #tpu.memory_space<vmem>>, %arg25: memref<32x5xf32, #tpu.memory_space<vmem>>, %arg26: memref<1x5xf32, #tpu.memory_space<vmem>>, %arg27: memref<8x5xf32, #tpu.memory_space<vmem>>, %arg28: memref<8x32xf32, #tpu.memory_space<vmem>>) attributes {dimension_semantics = [#tpu.dimension_semantics<arbitrary>], iteration_bounds = array<i64: 6>, scalar_prefetch = 0 : i64, scratch_operands = 1 : i64, tpu.core_type = #tpu.core_type<tc>, window_params = [{pipeline_mode = #tpu.pipeline_mode<synchronous>, transform_indices = @transform_0, window_bounds = array<i64: 8, 32>}, {pipeline_mode = #tpu.pipeline_mode<synchronous>, transform_indices = @transform_1, window_bounds = array<i64: 8, 32>}, {transform_indices = @transform_2, window_bounds = array<i64: 1, 3, 32, 32>}, {transform_indices = @transform_3, window_bounds = array<i64: 1, 3, 1, 32>}, {transform_indices = @transform_4, window_bounds = array<i64: 1, 32, 32>}, {transform_indices = @transform_5, window_bounds = array<i64: 1, 1, 32>}, {transform_indices = @transform_6, window_bounds = array<i64: 1, 1, 32>}, {transform_indices = @transform_7, window_bounds = array<i64: 1, 1, 32>}, {transform_indices = @transform_8, window_bounds = array<i64: 1, 32, 32>}, {transform_indices = @transform_9, window_bounds = array<i64: 1, 1, 32>}, {transform_indices = @transform_10, window_bounds = array<i64: 1, 2, 32, 32>}, {transform_indices = @transform_11, window_bounds = array<i64: 1, 2, 1, 32>}, {transform_indices = @transform_12, window_bounds = array<i64: 1, 32, 32>}, {transform_indices = @transform_13, window_bounds = array<i64: 1, 1, 32>}, {transform_indices = @transform_14, window_bounds = array<i64: 1, 1, 32>}, {transform_indices = @transform_15, window_bounds = array<i64: 1, 1, 32>}, {transform_indices = @transform_16, window_bounds = array<i64: 1, 32, 2048>}, {transform_indices = @transform_17, window_bounds = array<i64: 1, 1, 2048>}, {transform_indices = @transform_18, window_bounds = array<i64: 1, 2048, 32>}, {transform_indices = @transform_19, window_bounds = array<i64: 1, 1, 32>}, {transform_indices = @transform_20, window_bounds = array<i64: 1, 1, 32>}, {transform_indices = @transform_21, window_bounds = array<i64: 1, 1, 32>}, {pipeline_mode = #tpu.pipeline_mode<synchronous>, transform_indices = @transform_22, window_bounds = array<i64: 1, 32>}, {pipeline_mode = #tpu.pipeline_mode<synchronous>, transform_indices = @transform_23, window_bounds = array<i64: 1, 32>}, {pipeline_mode = #tpu.pipeline_mode<synchronous>, transform_indices = @transform_24, window_bounds = array<i64: 32, 5>}, {pipeline_mode = #tpu.pipeline_mode<synchronous>, transform_indices = @transform_25, window_bounds = array<i64: 1, 5>}, {pipeline_mode = #tpu.pipeline_mode<synchronous>, transform_indices = @transform_26, window_bounds = array<i64: 8, 5>}]} {
    %c0_i32 = arith.constant 0 : i32
    %0 = arith.cmpi eq, %arg0, %c0_i32 : i32
    %1 = arith.extui %0 : i1 to i32
    %c0_i32_0 = arith.constant 0 : i32
    %2 = arith.cmpi ne, %1, %c0_i32_0 : i32
    scf.if %2 {
      %c0_128 = arith.constant 0 : index
      %c0_129 = arith.constant 0 : index
      %186 = vector.load %arg1[%c0_128, %c0_129] : memref<8x32xf32, #tpu.memory_space<vmem>>, vector<8x32xf32>
      %c0_130 = arith.constant 0 : index
      %c0_131 = arith.constant 0 : index
      %187 = vector.load %arg28[%c0_130, %c0_131] : memref<8x32xf32, #tpu.memory_space<vmem>>, vector<8x32xf32>
      tpu.vector_store %arg28[%c0_130, %c0_131], %186 {strides = array<i32>} : memref<8x32xf32, #tpu.memory_space<vmem>>, vector<8x32xf32>,
    } else {
    }
    %c0 = arith.constant 0 : index
    %c0_1 = arith.constant 0 : index
    %3 = vector.load %arg28[%c0, %c0_1] : memref<8x32xf32, #tpu.memory_space<vmem>>, vector<8x32xf32>
    %c0_2 = arith.constant 0 : index
    %c0_3 = arith.constant 0 : index
    %4 = vector.load %arg2[%c0_2, %c0_3] : memref<8x32xf32, #tpu.memory_space<vmem>>, vector<8x32xf32>
    %c0_4 = arith.constant 0 : index
    %c0_5 = arith.constant 0 : index
    %c0_6 = arith.constant 0 : index
    %c0_7 = arith.constant 0 : index
    %5 = vector.load %arg3[%c0_4, %c0_5, %c0_6, %c0_7] : memref<1x3x32x32xf32, #tpu.memory_space<vmem>>, vector<1x1x32x32xf32>
    %6 = vector.shape_cast %5 : vector<1x1x32x32xf32> to vector<32x32xf32>
    %cst = arith.constant dense<0.000000e+00> : vector<8x32xf32>
    %7 = tpu.matmul %3, %6, %cst {dimension_numbers = #tpu.dot_dimension_numbers<[1], [0], [0], [1], [0, 0, 1, 1], [], []>} : vector<8x32xf32>, vector<32x32xf32>, vector<8x32xf32> -> vector<8x32xf32>
    %c0_8 = arith.constant 0 : index
    %c0_9 = arith.constant 0 : index
    %c0_10 = arith.constant 0 : index
    %c0_11 = arith.constant 0 : index
    %8 = vector.load %arg4[%c0_8, %c0_9, %c0_10, %c0_11] : memref<1x3x1x32xf32, #tpu.memory_space<vmem>>, vector<1x1x1x32xf32>
    %9 = vector.shape_cast %8 : vector<1x1x1x32xf32> to vector<1x32xf32>
    %10 = vector.broadcast %9 : vector<1x32xf32> to vector<8x32xf32>
    %11 = arith.addf %7, %10 : vector<8x32xf32>
    %c0_12 = arith.constant 0 : index
    %c1 = arith.constant 1 : index
    %c0_13 = arith.constant 0 : index
    %c0_14 = arith.constant 0 : index
    %12 = vector.load %arg3[%c0_12, %c1, %c0_13, %c0_14] : memref<1x3x32x32xf32, #tpu.memory_space<vmem>>, vector<1x1x32x32xf32>
    %13 = vector.shape_cast %12 : vector<1x1x32x32xf32> to vector<32x32xf32>
    %cst_15 = arith.constant dense<0.000000e+00> : vector<8x32xf32>
    %14 = tpu.matmul %3, %13, %cst_15 {dimension_numbers = #tpu.dot_dimension_numbers<[1], [0], [0], [1], [0, 0, 1, 1], [], []>} : vector<8x32xf32>, vector<32x32xf32>, vector<8x32xf32> -> vector<8x32xf32>
    %c0_16 = arith.constant 0 : index
    %c1_17 = arith.constant 1 : index
    %c0_18 = arith.constant 0 : index
    %c0_19 = arith.constant 0 : index
    %15 = vector.load %arg4[%c0_16, %c1_17, %c0_18, %c0_19] : memref<1x3x1x32xf32, #tpu.memory_space<vmem>>, vector<1x1x1x32xf32>
    %16 = vector.shape_cast %15 : vector<1x1x1x32xf32> to vector<1x32xf32>
    %17 = vector.broadcast %16 : vector<1x32xf32> to vector<8x32xf32>
    %18 = arith.addf %14, %17 : vector<8x32xf32>
    %c0_20 = arith.constant 0 : index
    %c2 = arith.constant 2 : index
    %c0_21 = arith.constant 0 : index
    %c0_22 = arith.constant 0 : index
    %19 = vector.load %arg3[%c0_20, %c2, %c0_21, %c0_22] : memref<1x3x32x32xf32, #tpu.memory_space<vmem>>, vector<1x1x32x32xf32>
    %20 = vector.shape_cast %19 : vector<1x1x32x32xf32> to vector<32x32xf32>
    %cst_23 = arith.constant dense<0.000000e+00> : vector<8x32xf32>
    %21 = tpu.matmul %3, %20, %cst_23 {dimension_numbers = #tpu.dot_dimension_numbers<[1], [0], [0], [1], [0, 0, 1, 1], [], []>} : vector<8x32xf32>, vector<32x32xf32>, vector<8x32xf32> -> vector<8x32xf32>
    %c0_24 = arith.constant 0 : index
    %c2_25 = arith.constant 2 : index
    %c0_26 = arith.constant 0 : index
    %c0_27 = arith.constant 0 : index
    %22 = vector.load %arg4[%c0_24, %c2_25, %c0_26, %c0_27] : memref<1x3x1x32xf32, #tpu.memory_space<vmem>>, vector<1x1x1x32xf32>
    %23 = vector.shape_cast %22 : vector<1x1x1x32xf32> to vector<1x32xf32>
    %24 = vector.broadcast %23 : vector<1x32xf32> to vector<8x32xf32>
    %25 = arith.addf %21, %24 : vector<8x32xf32>
    %c0_28 = arith.constant 0 : index
    %c0_29 = arith.constant 0 : index
    %c0_30 = arith.constant 0 : index
    %26 = vector.load %arg5[%c0_28, %c0_29, %c0_30] : memref<1x32x32xf32, #tpu.memory_space<vmem>>, vector<1x32x32xf32>
    %27 = vector.shape_cast %26 : vector<1x32x32xf32> to vector<32x32xf32>
    %c0_31 = arith.constant 0 : index
    %c0_32 = arith.constant 0 : index
    %c0_33 = arith.constant 0 : index
    %28 = vector.load %arg6[%c0_31, %c0_32, %c0_33] : memref<1x1x32xf32, #tpu.memory_space<vmem>>, vector<1x1x32xf32>
    %29 = vector.shape_cast %28 : vector<1x1x32xf32> to vector<1x32xf32>
    %cst_34 = arith.constant dense<0.000000e+00> : vector<8x8xf32>
    %30 = tpu.matmul %11, %18, %cst_34 {dimension_numbers = #tpu.dot_dimension_numbers<[1], [1], [0], [0], [0, 0, 1, 0], [], []>} : vector<8x32xf32>, vector<8x32xf32>, vector<8x8xf32> -> vector<8x8xf32>
    %cst_35 = arith.constant 0.176776692 : f32
    %31 = vector.broadcast %cst_35 : f32 to vector<8x8xf32>
    %32 = arith.mulf %30, %31 : vector<8x8xf32>
    %cst_36 = arith.constant dense<0xFF800000> : vector<8xf32>
    %33 = vector.multi_reduction <maximumf>, %32, %cst_36 [1] : vector<8x8xf32> to vector<8xf32>
    %34 = vector.shape_cast %33 : vector<8xf32> to vector<8x1xf32>
    %35 = vector.broadcast %34 : vector<8x1xf32> to vector<8x8xf32>
    %36 = arith.subf %32, %35 : vector<8x8xf32>
    %37 = math.exp %36 : vector<8x8xf32>
    %cst_37 = arith.constant dense<0.000000e+00> : vector<8xf32>
    %38 = vector.multi_reduction <add>, %37, %cst_37 [1] : vector<8x8xf32> to vector<8xf32>
    %39 = vector.shape_cast %38 : vector<8xf32> to vector<8x1xf32>
    %40 = tpu.reciprocal %39 {approx = true} : vector<8x1xf32> -> vector<8x1xf32>
    %41 = vector.broadcast %40 : vector<8x1xf32> to vector<8x8xf32>
    %42 = arith.mulf %37, %41 : vector<8x8xf32>
    %cst_38 = arith.constant dense<0.000000e+00> : vector<8x32xf32>
    %43 = tpu.matmul %42, %25, %cst_38 {dimension_numbers = #tpu.dot_dimension_numbers<[1], [0], [0], [1], [0, 0, 1, 1], [], []>} : vector<8x8xf32>, vector<8x32xf32>, vector<8x32xf32> -> vector<8x32xf32>
    %cst_39 = arith.constant dense<0.000000e+00> : vector<8x32xf32>
    %44 = tpu.matmul %43, %27, %cst_39 {dimension_numbers = #tpu.dot_dimension_numbers<[1], [0], [0], [1], [0, 0, 1, 1], [], []>} : vector<8x32xf32>, vector<32x32xf32>, vector<8x32xf32> -> vector<8x32xf32>
    %45 = vector.broadcast %29 : vector<1x32xf32> to vector<8x32xf32>
    %46 = arith.addf %44, %45 : vector<8x32xf32>
    %c0_40 = arith.constant 0 : index
    %c0_41 = arith.constant 0 : index
    %c0_42 = arith.constant 0 : index
    %47 = vector.load %arg7[%c0_40, %c0_41, %c0_42] : memref<1x1x32xf32, #tpu.memory_space<vmem>>, vector<1x1x32xf32>
    %48 = vector.shape_cast %47 : vector<1x1x32xf32> to vector<1x32xf32>
    %c0_43 = arith.constant 0 : index
    %c0_44 = arith.constant 0 : index
    %c0_45 = arith.constant 0 : index
    %49 = vector.load %arg8[%c0_43, %c0_44, %c0_45] : memref<1x1x32xf32, #tpu.memory_space<vmem>>, vector<1x1x32xf32>
    %50 = vector.shape_cast %49 : vector<1x1x32xf32> to vector<1x32xf32>
    %51 = arith.addf %3, %46 : vector<8x32xf32>
    %cst_46 = arith.constant dense<0.000000e+00> : vector<8xf32>
    %52 = vector.multi_reduction <add>, %51, %cst_46 [1] : vector<8x32xf32> to vector<8xf32>
    %53 = vector.shape_cast %52 : vector<8xf32> to vector<8x1xf32>
    %cst_47 = arith.constant 3.200000e+01 : f32
    %54 = vector.broadcast %cst_47 : f32 to vector<8x1xf32>
    %55 = arith.divf %53, %54 : vector<8x1xf32>
    %56 = vector.broadcast %55 : vector<8x1xf32> to vector<8x32xf32>
    %57 = arith.subf %51, %56 : vector<8x32xf32>
    %58 = arith.mulf %57, %57 : vector<8x32xf32>
    %cst_48 = arith.constant dense<0.000000e+00> : vector<8xf32>
    %59 = vector.multi_reduction <add>, %58, %cst_48 [1] : vector<8x32xf32> to vector<8xf32>
    %60 = vector.shape_cast %59 : vector<8xf32> to vector<8x1xf32>
    %cst_49 = arith.constant 3.200000e+01 : f32
    %61 = vector.broadcast %cst_49 : f32 to vector<8x1xf32>
    %62 = arith.divf %60, %61 : vector<8x1xf32>
    %cst_50 = arith.constant 9.99999974E-6 : f32
    %63 = vector.broadcast %cst_50 : f32 to vector<8x1xf32>
    %64 = arith.addf %62, %63 : vector<8x1xf32>
    %65 = math.rsqrt %64 : vector<8x1xf32>
    %66 = vector.broadcast %65 : vector<8x1xf32> to vector<8x32xf32>
    %67 = arith.mulf %57, %66 : vector<8x32xf32>
    %68 = vector.broadcast %48 : vector<1x32xf32> to vector<8x32xf32>
    %69 = arith.mulf %67, %68 : vector<8x32xf32>
    %70 = vector.broadcast %50 : vector<1x32xf32> to vector<8x32xf32>
    %71 = arith.addf %69, %70 : vector<8x32xf32>
    %c0_51 = arith.constant 0 : index
    %c0_52 = arith.constant 0 : index
    %c0_53 = arith.constant 0 : index
    %72 = vector.load %arg9[%c0_51, %c0_52, %c0_53] : memref<1x32x32xf32, #tpu.memory_space<vmem>>, vector<1x32x32xf32>
    %73 = vector.shape_cast %72 : vector<1x32x32xf32> to vector<32x32xf32>
    %cst_54 = arith.constant dense<0.000000e+00> : vector<8x32xf32>
    %74 = tpu.matmul %71, %73, %cst_54 {dimension_numbers = #tpu.dot_dimension_numbers<[1], [0], [0], [1], [0, 0, 1, 1], [], []>} : vector<8x32xf32>, vector<32x32xf32>, vector<8x32xf32> -> vector<8x32xf32>
    %c0_55 = arith.constant 0 : index
    %c0_56 = arith.constant 0 : index
    %c0_57 = arith.constant 0 : index
    %75 = vector.load %arg10[%c0_55, %c0_56, %c0_57] : memref<1x1x32xf32, #tpu.memory_space<vmem>>, vector<1x1x32xf32>
    %76 = vector.shape_cast %75 : vector<1x1x32xf32> to vector<1x32xf32>
    %77 = vector.broadcast %76 : vector<1x32xf32> to vector<8x32xf32>
    %78 = arith.addf %74, %77 : vector<8x32xf32>
    %c0_58 = arith.constant 0 : index
    %c0_59 = arith.constant 0 : index
    %c0_60 = arith.constant 0 : index
    %c0_61 = arith.constant 0 : index
    %79 = vector.load %arg11[%c0_58, %c0_59, %c0_60, %c0_61] : memref<1x2x32x32xf32, #tpu.memory_space<vmem>>, vector<1x1x32x32xf32>
    %80 = vector.shape_cast %79 : vector<1x1x32x32xf32> to vector<32x32xf32>
    %cst_62 = arith.constant dense<0.000000e+00> : vector<8x32xf32>
    %81 = tpu.matmul %4, %80, %cst_62 {dimension_numbers = #tpu.dot_dimension_numbers<[1], [0], [0], [1], [0, 0, 1, 1], [], []>} : vector<8x32xf32>, vector<32x32xf32>, vector<8x32xf32> -> vector<8x32xf32>
    %c0_63 = arith.constant 0 : index
    %c0_64 = arith.constant 0 : index
    %c0_65 = arith.constant 0 : index
    %c0_66 = arith.constant 0 : index
    %82 = vector.load %arg12[%c0_63, %c0_64, %c0_65, %c0_66] : memref<1x2x1x32xf32, #tpu.memory_space<vmem>>, vector<1x1x1x32xf32>
    %83 = vector.shape_cast %82 : vector<1x1x1x32xf32> to vector<1x32xf32>
    %84 = vector.broadcast %83 : vector<1x32xf32> to vector<8x32xf32>
    %85 = arith.addf %81, %84 : vector<8x32xf32>
    %c0_67 = arith.constant 0 : index
    %c1_68 = arith.constant 1 : index
    %c0_69 = arith.constant 0 : index
    %c0_70 = arith.constant 0 : index
    %86 = vector.load %arg11[%c0_67, %c1_68, %c0_69, %c0_70] : memref<1x2x32x32xf32, #tpu.memory_space<vmem>>, vector<1x1x32x32xf32>
    %87 = vector.shape_cast %86 : vector<1x1x32x32xf32> to vector<32x32xf32>
    %cst_71 = arith.constant dense<0.000000e+00> : vector<8x32xf32>
    %88 = tpu.matmul %4, %87, %cst_71 {dimension_numbers = #tpu.dot_dimension_numbers<[1], [0], [0], [1], [0, 0, 1, 1], [], []>} : vector<8x32xf32>, vector<32x32xf32>, vector<8x32xf32> -> vector<8x32xf32>
    %c0_72 = arith.constant 0 : index
    %c1_73 = arith.constant 1 : index
    %c0_74 = arith.constant 0 : index
    %c0_75 = arith.constant 0 : index
    %89 = vector.load %arg12[%c0_72, %c1_73, %c0_74, %c0_75] : memref<1x2x1x32xf32, #tpu.memory_space<vmem>>, vector<1x1x1x32xf32>
    %90 = vector.shape_cast %89 : vector<1x1x1x32xf32> to vector<1x32xf32>
    %91 = vector.broadcast %90 : vector<1x32xf32> to vector<8x32xf32>
    %92 = arith.addf %88, %91 : vector<8x32xf32>
    %c0_76 = arith.constant 0 : index
    %c0_77 = arith.constant 0 : index
    %c0_78 = arith.constant 0 : index
    %93 = vector.load %arg13[%c0_76, %c0_77, %c0_78] : memref<1x32x32xf32, #tpu.memory_space<vmem>>, vector<1x32x32xf32>
    %94 = vector.shape_cast %93 : vector<1x32x32xf32> to vector<32x32xf32>
    %c0_79 = arith.constant 0 : index
    %c0_80 = arith.constant 0 : index
    %c0_81 = arith.constant 0 : index
    %95 = vector.load %arg14[%c0_79, %c0_80, %c0_81] : memref<1x1x32xf32, #tpu.memory_space<vmem>>, vector<1x1x32xf32>
    %96 = vector.shape_cast %95 : vector<1x1x32xf32> to vector<1x32xf32>
    %cst_82 = arith.constant dense<0.000000e+00> : vector<8x8xf32>
    %97 = tpu.matmul %78, %85, %cst_82 {dimension_numbers = #tpu.dot_dimension_numbers<[1], [1], [0], [0], [0, 0, 1, 0], [], []>} : vector<8x32xf32>, vector<8x32xf32>, vector<8x8xf32> -> vector<8x8xf32>
    %cst_83 = arith.constant 0.176776692 : f32
    %98 = vector.broadcast %cst_83 : f32 to vector<8x8xf32>
    %99 = arith.mulf %97, %98 : vector<8x8xf32>
    %cst_84 = arith.constant dense<0xFF800000> : vector<8xf32>
    %100 = vector.multi_reduction <maximumf>, %99, %cst_84 [1] : vector<8x8xf32> to vector<8xf32>
    %101 = vector.shape_cast %100 : vector<8xf32> to vector<8x1xf32>
    %102 = vector.broadcast %101 : vector<8x1xf32> to vector<8x8xf32>
    %103 = arith.subf %99, %102 : vector<8x8xf32>
    %104 = math.exp %103 : vector<8x8xf32>
    %cst_85 = arith.constant dense<0.000000e+00> : vector<8xf32>
    %105 = vector.multi_reduction <add>, %104, %cst_85 [1] : vector<8x8xf32> to vector<8xf32>
    %106 = vector.shape_cast %105 : vector<8xf32> to vector<8x1xf32>
    %107 = tpu.reciprocal %106 {approx = true} : vector<8x1xf32> -> vector<8x1xf32>
    %108 = vector.broadcast %107 : vector<8x1xf32> to vector<8x8xf32>
    %109 = arith.mulf %104, %108 : vector<8x8xf32>
    %cst_86 = arith.constant dense<0.000000e+00> : vector<8x32xf32>
    %110 = tpu.matmul %109, %92, %cst_86 {dimension_numbers = #tpu.dot_dimension_numbers<[1], [0], [0], [1], [0, 0, 1, 1], [], []>} : vector<8x8xf32>, vector<8x32xf32>, vector<8x32xf32> -> vector<8x32xf32>
    %cst_87 = arith.constant dense<0.000000e+00> : vector<8x32xf32>
    %111 = tpu.matmul %110, %94, %cst_87 {dimension_numbers = #tpu.dot_dimension_numbers<[1], [0], [0], [1], [0, 0, 1, 1], [], []>} : vector<8x32xf32>, vector<32x32xf32>, vector<8x32xf32> -> vector<8x32xf32>
    %112 = vector.broadcast %96 : vector<1x32xf32> to vector<8x32xf32>
    %113 = arith.addf %111, %112 : vector<8x32xf32>
    %c0_88 = arith.constant 0 : index
    %c0_89 = arith.constant 0 : index
    %c0_90 = arith.constant 0 : index
    %114 = vector.load %arg15[%c0_88, %c0_89, %c0_90] : memref<1x1x32xf32, #tpu.memory_space<vmem>>, vector<1x1x32xf32>
    %115 = vector.shape_cast %114 : vector<1x1x32xf32> to vector<1x32xf32>
    %c0_91 = arith.constant 0 : index
    %c0_92 = arith.constant 0 : index
    %c0_93 = arith.constant 0 : index
    %116 = vector.load %arg16[%c0_91, %c0_92, %c0_93] : memref<1x1x32xf32, #tpu.memory_space<vmem>>, vector<1x1x32xf32>
    %117 = vector.shape_cast %116 : vector<1x1x32xf32> to vector<1x32xf32>
    %118 = arith.addf %71, %113 : vector<8x32xf32>
    %cst_94 = arith.constant dense<0.000000e+00> : vector<8xf32>
    %119 = vector.multi_reduction <add>, %118, %cst_94 [1] : vector<8x32xf32> to vector<8xf32>
    %120 = vector.shape_cast %119 : vector<8xf32> to vector<8x1xf32>
    %cst_95 = arith.constant 3.200000e+01 : f32
    %121 = vector.broadcast %cst_95 : f32 to vector<8x1xf32>
    %122 = arith.divf %120, %121 : vector<8x1xf32>
    %123 = vector.broadcast %122 : vector<8x1xf32> to vector<8x32xf32>
    %124 = arith.subf %118, %123 : vector<8x32xf32>
    %125 = arith.mulf %124, %124 : vector<8x32xf32>
    %cst_96 = arith.constant dense<0.000000e+00> : vector<8xf32>
    %126 = vector.multi_reduction <add>, %125, %cst_96 [1] : vector<8x32xf32> to vector<8xf32>
    %127 = vector.shape_cast %126 : vector<8xf32> to vector<8x1xf32>
    %cst_97 = arith.constant 3.200000e+01 : f32
    %128 = vector.broadcast %cst_97 : f32 to vector<8x1xf32>
    %129 = arith.divf %127, %128 : vector<8x1xf32>
    %cst_98 = arith.constant 9.99999974E-6 : f32
    %130 = vector.broadcast %cst_98 : f32 to vector<8x1xf32>
    %131 = arith.addf %129, %130 : vector<8x1xf32>
    %132 = math.rsqrt %131 : vector<8x1xf32>
    %133 = vector.broadcast %132 : vector<8x1xf32> to vector<8x32xf32>
    %134 = arith.mulf %124, %133 : vector<8x32xf32>
    %135 = vector.broadcast %115 : vector<1x32xf32> to vector<8x32xf32>
    %136 = arith.mulf %134, %135 : vector<8x32xf32>
    %137 = vector.broadcast %117 : vector<1x32xf32> to vector<8x32xf32>
    %138 = arith.addf %136, %137 : vector<8x32xf32>
    %c0_99 = arith.constant 0 : index
    %c0_100 = arith.constant 0 : index
    %c0_101 = arith.constant 0 : index
    %139 = vector.load %arg17[%c0_99, %c0_100, %c0_101] : memref<1x32x2048xbf16, #tpu.memory_space<vmem>>, vector<1x32x2048xbf16>
    %140 = vector.shape_cast %139 : vector<1x32x2048xbf16> to vector<32x2048xbf16>
    %c0_102 = arith.constant 0 : index
    %c0_103 = arith.constant 0 : index
    %c0_104 = arith.constant 0 : index
    %141 = vector.load %arg18[%c0_102, %c0_103, %c0_104] : memref<1x1x2048xf32, #tpu.memory_space<vmem>>, vector<1x1x2048xf32>
    %142 = vector.shape_cast %141 : vector<1x1x2048xf32> to vector<1x2048xf32>
    %c0_105 = arith.constant 0 : index
    %c0_106 = arith.constant 0 : index
    %c0_107 = arith.constant 0 : index
    %143 = vector.load %arg19[%c0_105, %c0_106, %c0_107] : memref<1x2048x32xbf16, #tpu.memory_space<vmem>>, vector<1x2048x32xbf16>
    %144 = vector.shape_cast %143 : vector<1x2048x32xbf16> to vector<2048x32xbf16>
    %c0_108 = arith.constant 0 : index
    %c0_109 = arith.constant 0 : index
    %c0_110 = arith.constant 0 : index
    %145 = vector.load %arg20[%c0_108, %c0_109, %c0_110] : memref<1x1x32xf32, #tpu.memory_space<vmem>>, vector<1x1x32xf32>
    %146 = vector.shape_cast %145 : vector<1x1x32xf32> to vector<1x32xf32>
    %147 = arith.truncf %138 : vector<8x32xf32> to vector<8x32xbf16>
    %cst_111 = arith.constant dense<0.000000e+00> : vector<8x2048xf32>
    %148 = tpu.matmul %147, %140, %cst_111 {dimension_numbers = #tpu.dot_dimension_numbers<[1], [0], [0], [1], [0, 0, 1, 1], [], []>} : vector<8x32xbf16>, vector<32x2048xbf16>, vector<8x2048xf32> -> vector<8x2048xf32>
    %149 = vector.broadcast %142 : vector<1x2048xf32> to vector<8x2048xf32>
    %150 = arith.addf %148, %149 : vector<8x2048xf32>
    %cst_112 = arith.constant 0.000000e+00 : f32
    %151 = vector.broadcast %cst_112 : f32 to vector<8x2048xf32>
    %152 = arith.maximumf %150, %151 : vector<8x2048xf32>
    %153 = arith.truncf %152 : vector<8x2048xf32> to vector<8x2048xbf16>
    %cst_113 = arith.constant dense<0.000000e+00> : vector<8x32xf32>
    %154 = tpu.matmul %153, %144, %cst_113 {dimension_numbers = #tpu.dot_dimension_numbers<[1], [0], [0], [1], [0, 0, 1, 1], [], []>} : vector<8x2048xbf16>, vector<2048x32xbf16>, vector<8x32xf32> -> vector<8x32xf32>
    %155 = vector.broadcast %146 : vector<1x32xf32> to vector<8x32xf32>
    %156 = arith.addf %154, %155 : vector<8x32xf32>
    %c0_114 = arith.constant 0 : index
    %c0_115 = arith.constant 0 : index
    %c0_116 = arith.constant 0 : index
    %157 = vector.load %arg21[%c0_114, %c0_115, %c0_116] : memref<1x1x32xf32, #tpu.memory_space<vmem>>, vector<1x1x32xf32>
    %158 = vector.shape_cast %157 : vector<1x1x32xf32> to vector<1x32xf32>
    %c0_117 = arith.constant 0 : index
    %c0_118 = arith.constant 0 : index
    %c0_119 = arith.constant 0 : index
    %159 = vector.load %arg22[%c0_117, %c0_118, %c0_119] : memref<1x1x32xf32, #tpu.memory_space<vmem>>, vector<1x1x32xf32>
    %160 = vector.shape_cast %159 : vector<1x1x32xf32> to vector<1x32xf32>
    %161 = arith.addf %138, %156 : vector<8x32xf32>
    %cst_120 = arith.constant dense<0.000000e+00> : vector<8xf32>
    %162 = vector.multi_reduction <add>, %161, %cst_120 [1] : vector<8x32xf32> to vector<8xf32>
    %163 = vector.shape_cast %162 : vector<8xf32> to vector<8x1xf32>
    %cst_121 = arith.constant 3.200000e+01 : f32
    %164 = vector.broadcast %cst_121 : f32 to vector<8x1xf32>
    %165 = arith.divf %163, %164 : vector<8x1xf32>
    %166 = vector.broadcast %165 : vector<8x1xf32> to vector<8x32xf32>
    %167 = arith.subf %161, %166 : vector<8x32xf32>
    %168 = arith.mulf %167, %167 : vector<8x32xf32>
    %cst_122 = arith.constant dense<0.000000e+00> : vector<8xf32>
    %169 = vector.multi_reduction <add>, %168, %cst_122 [1] : vector<8x32xf32> to vector<8xf32>
    %170 = vector.shape_cast %169 : vector<8xf32> to vector<8x1xf32>
    %cst_123 = arith.constant 3.200000e+01 : f32
    %171 = vector.broadcast %cst_123 : f32 to vector<8x1xf32>
    %172 = arith.divf %170, %171 : vector<8x1xf32>
    %cst_124 = arith.constant 9.99999974E-6 : f32
    %173 = vector.broadcast %cst_124 : f32 to vector<8x1xf32>
    %174 = arith.addf %172, %173 : vector<8x1xf32>
    %175 = math.rsqrt %174 : vector<8x1xf32>
    %176 = vector.broadcast %175 : vector<8x1xf32> to vector<8x32xf32>
    %177 = arith.mulf %167, %176 : vector<8x32xf32>
    %178 = vector.broadcast %158 : vector<1x32xf32> to vector<8x32xf32>
    %179 = arith.mulf %177, %178 : vector<8x32xf32>
    %180 = vector.broadcast %160 : vector<1x32xf32> to vector<8x32xf32>
    %181 = arith.addf %179, %180 : vector<8x32xf32>
    %c0_125 = arith.constant 0 : index
    %c0_126 = arith.constant 0 : index
    %182 = vector.load %arg28[%c0_125, %c0_126] : memref<8x32xf32, #tpu.memory_space<vmem>>, vector<8x32xf32>
    tpu.vector_store %arg28[%c0_125, %c0_126], %181 {strides = array<i32>} : memref<8x32xf32, #tpu.memory_space<vmem>>, vector<8x32xf32>,
    %c5_i32 = arith.constant 5 : i32
    %183 = arith.cmpi eq, %arg0, %c5_i32 : i32
    %184 = arith.extui %183 : i1 to i32
    %c0_i32_127 = arith.constant 0 : i32
    %185 = arith.cmpi ne, %184, %c0_i32_127 : i32
    scf.if %185 {
      %c0_128 = arith.constant 0 : index
      %c0_129 = arith.constant 0 : index
      %186 = vector.load %arg23[%c0_128, %c0_129] : memref<1x32xf32, #tpu.memory_space<vmem>>, vector<1x32xf32>
      %c0_130 = arith.constant 0 : index
      %c0_131 = arith.constant 0 : index
      %187 = vector.load %arg24[%c0_130, %c0_131] : memref<1x32xf32, #tpu.memory_space<vmem>>, vector<1x32xf32>
      %cst_132 = arith.constant dense<0.000000e+00> : vector<8xf32>
      %188 = vector.multi_reduction <add>, %181, %cst_132 [1] : vector<8x32xf32> to vector<8xf32>
      %189 = vector.shape_cast %188 : vector<8xf32> to vector<8x1xf32>
      %cst_133 = arith.constant 3.200000e+01 : f32
      %190 = vector.broadcast %cst_133 : f32 to vector<8x1xf32>
      %191 = arith.divf %189, %190 : vector<8x1xf32>
      %192 = vector.broadcast %191 : vector<8x1xf32> to vector<8x32xf32>
      %193 = arith.subf %181, %192 : vector<8x32xf32>
      %194 = arith.mulf %193, %193 : vector<8x32xf32>
      %cst_134 = arith.constant dense<0.000000e+00> : vector<8xf32>
      %195 = vector.multi_reduction <add>, %194, %cst_134 [1] : vector<8x32xf32> to vector<8xf32>
      %196 = vector.shape_cast %195 : vector<8xf32> to vector<8x1xf32>
      %cst_135 = arith.constant 3.200000e+01 : f32
      %197 = vector.broadcast %cst_135 : f32 to vector<8x1xf32>
      %198 = arith.divf %196, %197 : vector<8x1xf32>
      %cst_136 = arith.constant 9.99999974E-6 : f32
      %199 = vector.broadcast %cst_136 : f32 to vector<8x1xf32>
      %200 = arith.addf %198, %199 : vector<8x1xf32>
      %201 = math.rsqrt %200 : vector<8x1xf32>
      %202 = vector.broadcast %201 : vector<8x1xf32> to vector<8x32xf32>
      %203 = arith.mulf %193, %202 : vector<8x32xf32>
      %204 = vector.broadcast %186 : vector<1x32xf32> to vector<8x32xf32>
      %205 = arith.mulf %203, %204 : vector<8x32xf32>
      %206 = vector.broadcast %187 : vector<1x32xf32> to vector<8x32xf32>
      %207 = arith.addf %205, %206 : vector<8x32xf32>
      %c0_137 = arith.constant 0 : index
      %c0_138 = arith.constant 0 : index
      %208 = vector.load %arg25[%c0_137, %c0_138] : memref<32x5xf32, #tpu.memory_space<vmem>>, vector<32x5xf32>
      %cst_139 = arith.constant dense<0.000000e+00> : vector<8x5xf32>
      %209 = tpu.matmul %207, %208, %cst_139 {dimension_numbers = #tpu.dot_dimension_numbers<[1], [0], [0], [1], [0, 0, 1, 1], [], []>} : vector<8x32xf32>, vector<32x5xf32>, vector<8x5xf32> -> vector<8x5xf32>
      %c0_140 = arith.constant 0 : index
      %c0_141 = arith.constant 0 : index
      %210 = vector.load %arg26[%c0_140, %c0_141] : memref<1x5xf32, #tpu.memory_space<vmem>>, vector<1x5xf32>
      %211 = vector.broadcast %210 : vector<1x5xf32> to vector<8x5xf32>
      %212 = arith.addf %209, %211 : vector<8x5xf32>
      %c0_142 = arith.constant 0 : index
      %c0_143 = arith.constant 0 : index
      %213 = vector.load %arg27[%c0_142, %c0_143] : memref<8x5xf32, #tpu.memory_space<vmem>>, vector<8x5xf32>
      tpu.vector_store %arg27[%c0_142, %c0_143], %212 {strides = array<i32>} : memref<8x5xf32, #tpu.memory_space<vmem>>, vector<8x5xf32>,
    } else {
    }
    return
  }
  func.func @transform_0(%arg0: i32) -> (i32, i32) {
    %c0_i32 = arith.constant 0 : i32
    %c0_i32_0 = arith.constant 0 : i32
    %c0_i32_1 = arith.constant 0 : i32
    return %c0_i32, %c0_i32_0 : i32, i32
  }
  func.func @transform_1(%arg0: i32) -> (i32, i32) {
    %c0_i32 = arith.constant 0 : i32
    %c0_i32_0 = arith.constant 0 : i32
    %c0_i32_1 = arith.constant 0 : i32
    return %c0_i32, %c0_i32_0 : i32, i32
  }
  func.func @transform_2(%arg0: i32) -> (i32, i32, i32, i32) {
    %c0_i32 = arith.constant 0 : i32
    %c0_i32_0 = arith.constant 0 : i32
    %c0_i32_1 = arith.constant 0 : i32
    %c0_i32_2 = arith.constant 0 : i32
    return %arg0, %c0_i32, %c0_i32_0, %c0_i32_1 : i32, i32, i32, i32
  }
  func.func @transform_3(%arg0: i32) -> (i32, i32, i32, i32) {
    %c0_i32 = arith.constant 0 : i32
    %c0_i32_0 = arith.constant 0 : i32
    %c0_i32_1 = arith.constant 0 : i32
    %c0_i32_2 = arith.constant 0 : i32
    return %arg0, %c0_i32, %c0_i32_0, %c0_i32_1 : i32, i32, i32, i32
  }
  func.func @transform_4(%arg0: i32) -> (i32, i32, i32) {
    %c0_i32 = arith.constant 0 : i32
    %c0_i32_0 = arith.constant 0 : i32
    %c0_i32_1 = arith.constant 0 : i32
    return %arg0, %c0_i32, %c0_i32_0 : i32, i32, i32
  }
  func.func @transform_5(%arg0: i32) -> (i32, i32, i32) {
    %c0_i32 = arith.constant 0 : i32
    %c0_i32_0 = arith.constant 0 : i32
    %c0_i32_1 = arith.constant 0 : i32
    return %arg0, %c0_i32, %c0_i32_0 : i32, i32, i32
  }
  func.func @transform_6(%arg0: i32) -> (i32, i32, i32) {
    %c0_i32 = arith.constant 0 : i32
    %c0_i32_0 = arith.constant 0 : i32
    %c0_i32_1 = arith.constant 0 : i32
    return %arg0, %c0_i32, %c0_i32_0 : i32, i32, i32
  }
  func.func @transform_7(%arg0: i32) -> (i32, i32, i32) {
    %c0_i32 = arith.constant 0 : i32
    %c0_i32_0 = arith.constant 0 : i32
    %c0_i32_1 = arith.constant 0 : i32
    return %arg0, %c0_i32, %c0_i32_0 : i32, i32, i32
  }
  func.func @transform_8(%arg0: i32) -> (i32, i32, i32) {
    %c0_i32 = arith.constant 0 : i32
    %c0_i32_0 = arith.constant 0 : i32
    %c0_i32_1 = arith.constant 0 : i32
    return %arg0, %c0_i32, %c0_i32_0 : i32, i32, i32
  }
  func.func @transform_9(%arg0: i32) -> (i32, i32, i32) {
    %c0_i32 = arith.constant 0 : i32
    %c0_i32_0 = arith.constant 0 : i32
    %c0_i32_1 = arith.constant 0 : i32
    return %arg0, %c0_i32, %c0_i32_0 : i32, i32, i32
  }
  func.func @transform_10(%arg0: i32) -> (i32, i32, i32, i32) {
    %c0_i32 = arith.constant 0 : i32
    %c0_i32_0 = arith.constant 0 : i32
    %c0_i32_1 = arith.constant 0 : i32
    %c0_i32_2 = arith.constant 0 : i32
    return %arg0, %c0_i32, %c0_i32_0, %c0_i32_1 : i32, i32, i32, i32
  }
  func.func @transform_11(%arg0: i32) -> (i32, i32, i32, i32) {
    %c0_i32 = arith.constant 0 : i32
    %c0_i32_0 = arith.constant 0 : i32
    %c0_i32_1 = arith.constant 0 : i32
    %c0_i32_2 = arith.constant 0 : i32
    return %arg0, %c0_i32, %c0_i32_0, %c0_i32_1 : i32, i32, i32, i32
  }
  func.func @transform_12(%arg0: i32) -> (i32, i32, i32) {
    %c0_i32 = arith.constant 0 : i32
    %c0_i32_0 = arith.constant 0 : i32
    %c0_i32_1 = arith.constant 0 : i32
    return %arg0, %c0_i32, %c0_i32_0 : i32, i32, i32
  }
  func.func @transform_13(%arg0: i32) -> (i32, i32, i32) {
    %c0_i32 = arith.constant 0 : i32
    %c0_i32_0 = arith.constant 0 : i32
    %c0_i32_1 = arith.constant 0 : i32
    return %arg0, %c0_i32, %c0_i32_0 : i32, i32, i32
  }
  func.func @transform_14(%arg0: i32) -> (i32, i32, i32) {
    %c0_i32 = arith.constant 0 : i32
    %c0_i32_0 = arith.constant 0 : i32
    %c0_i32_1 = arith.constant 0 : i32
    return %arg0, %c0_i32, %c0_i32_0 : i32, i32, i32
  }
  func.func @transform_15(%arg0: i32) -> (i32, i32, i32) {
    %c0_i32 = arith.constant 0 : i32
    %c0_i32_0 = arith.constant 0 : i32
    %c0_i32_1 = arith.constant 0 : i32
    return %arg0, %c0_i32, %c0_i32_0 : i32, i32, i32
  }
  func.func @transform_16(%arg0: i32) -> (i32, i32, i32) {
    %c0_i32 = arith.constant 0 : i32
    %c0_i32_0 = arith.constant 0 : i32
    %c0_i32_1 = arith.constant 0 : i32
    return %arg0, %c0_i32, %c0_i32_0 : i32, i32, i32
  }
  func.func @transform_17(%arg0: i32) -> (i32, i32, i32) {
    %c0_i32 = arith.constant 0 : i32
    %c0_i32_0 = arith.constant 0 : i32
    %c0_i32_1 = arith.constant 0 : i32
    return %arg0, %c0_i32, %c0_i32_0 : i32, i32, i32
  }
  func.func @transform_18(%arg0: i32) -> (i32, i32, i32) {
    %c0_i32 = arith.constant 0 : i32
    %c0_i32_0 = arith.constant 0 : i32
    %c0_i32_1 = arith.constant 0 : i32
    return %arg0, %c0_i32, %c0_i32_0 : i32, i32, i32
  }
  func.func @transform_19(%arg0: i32) -> (i32, i32, i32) {
    %c0_i32 = arith.constant 0 : i32
    %c0_i32_0 = arith.constant 0 : i32
    %c0_i32_1 = arith.constant 0 : i32
    return %arg0, %c0_i32, %c0_i32_0 : i32, i32, i32
  }
  func.func @transform_20(%arg0: i32) -> (i32, i32, i32) {
    %c0_i32 = arith.constant 0 : i32
    %c0_i32_0 = arith.constant 0 : i32
    %c0_i32_1 = arith.constant 0 : i32
    return %arg0, %c0_i32, %c0_i32_0 : i32, i32, i32
  }
  func.func @transform_21(%arg0: i32) -> (i32, i32, i32) {
    %c0_i32 = arith.constant 0 : i32
    %c0_i32_0 = arith.constant 0 : i32
    %c0_i32_1 = arith.constant 0 : i32
    return %arg0, %c0_i32, %c0_i32_0 : i32, i32, i32
  }
  func.func @transform_22(%arg0: i32) -> (i32, i32) {
    %c0_i32 = arith.constant 0 : i32
    %c0_i32_0 = arith.constant 0 : i32
    %c0_i32_1 = arith.constant 0 : i32
    return %c0_i32, %c0_i32_0 : i32, i32
  }
  func.func @transform_23(%arg0: i32) -> (i32, i32) {
    %c0_i32 = arith.constant 0 : i32
    %c0_i32_0 = arith.constant 0 : i32
    %c0_i32_1 = arith.constant 0 : i32
    return %c0_i32, %c0_i32_0 : i32, i32
  }
  func.func @transform_24(%arg0: i32) -> (i32, i32) {
    %c0_i32 = arith.constant 0 : i32
    %c0_i32_0 = arith.constant 0 : i32
    %c0_i32_1 = arith.constant 0 : i32
    return %c0_i32, %c0_i32_0 : i32, i32
  }
  func.func @transform_25(%arg0: i32) -> (i32, i32) {
    %c0_i32 = arith.constant 0 : i32
    %c0_i32_0 = arith.constant 0 : i32
    %c0_i32_1 = arith.constant 0 : i32
    return %c0_i32, %c0_i32_0 : i32, i32
  }
  func.func @transform_26(%arg0: i32) -> (i32, i32) {
    %c0_i32 = arith.constant 0 : i32
    %c0_i32_0 = arith.constant 0 : i32
    %c0_i32_1 = arith.constant 0 : i32
    return %c0_i32, %c0_i32_0 : i32, i32
  }
}

module attributes {stable_mosaic.version = 11 : i64} {
  func.func @_viterbi_kernel(%arg0: memref<8x5xf32, #tpu.memory_space<smem>>, %arg1: memref<5x5xf32, #tpu.memory_space<smem>>, %arg2: memref<1xf32, #tpu.memory_space<smem>>, %arg3: memref<8xi32, #tpu.memory_space<smem>>, %arg4: memref<2x5xf32, #tpu.memory_space<smem>>, %arg5: memref<8x5xi32, #tpu.memory_space<smem>>) attributes {dimension_semantics = [], scalar_prefetch = 0 : i64, scratch_operands = 2 : i64, tpu.core_type = #tpu.core_type<tc>} {
    %cst = arith.constant -1.000000e+04 : f32
    %c0 = arith.constant 0 : index
    %c0_0 = arith.constant 0 : index
    %0 = memref.load %arg4[%c0, %c0_0] : memref<2x5xf32, #tpu.memory_space<smem>>
    memref.store %cst, %arg4[%c0, %c0_0] : memref<2x5xf32, #tpu.memory_space<smem>>
    %cst_1 = arith.constant -1.000000e+04 : f32
    %c0_2 = arith.constant 0 : index
    %c1 = arith.constant 1 : index
    %1 = memref.load %arg4[%c0_2, %c1] : memref<2x5xf32, #tpu.memory_space<smem>>
    memref.store %cst_1, %arg4[%c0_2, %c1] : memref<2x5xf32, #tpu.memory_space<smem>>
    %cst_3 = arith.constant -1.000000e+04 : f32
    %c0_4 = arith.constant 0 : index
    %c2 = arith.constant 2 : index
    %2 = memref.load %arg4[%c0_4, %c2] : memref<2x5xf32, #tpu.memory_space<smem>>
    memref.store %cst_3, %arg4[%c0_4, %c2] : memref<2x5xf32, #tpu.memory_space<smem>>
    %cst_5 = arith.constant 0.000000e+00 : f32
    %c0_6 = arith.constant 0 : index
    %c3 = arith.constant 3 : index
    %3 = memref.load %arg4[%c0_6, %c3] : memref<2x5xf32, #tpu.memory_space<smem>>
    memref.store %cst_5, %arg4[%c0_6, %c3] : memref<2x5xf32, #tpu.memory_space<smem>>
    %cst_7 = arith.constant -1.000000e+04 : f32
    %c0_8 = arith.constant 0 : index
    %c4 = arith.constant 4 : index
    %4 = memref.load %arg4[%c0_8, %c4] : memref<2x5xf32, #tpu.memory_space<smem>>
    memref.store %cst_7, %arg4[%c0_8, %c4] : memref<2x5xf32, #tpu.memory_space<smem>>
    %cst_9 = arith.constant -1.000000e+30 : f32
    %c0_i32 = arith.constant 0 : i32
    %c8_i32 = arith.constant 8 : i32
    %5 = arith.addi %c0_i32, %c8_i32 : i32
    %c1_i32 = arith.constant 1 : i32
    scf.for %arg6 = %c0_i32 to %5 step %c1_i32  : i32 {
      %c2_i32 = arith.constant 2 : i32
      %c0_i32_20 = arith.constant 0 : i32
      %12 = arith.cmpi eq, %c2_i32, %c0_i32_20 : i32
      %c1_i32_21 = arith.constant 1 : i32
      %13 = arith.select %12, %c1_i32_21, %c2_i32 : i32
      %14 = arith.remsi %arg6, %13 : i32
      %c0_i32_22 = arith.constant 0 : i32
      %15 = arith.cmpi ne, %14, %c0_i32_22 : i32
      %c0_i32_23 = arith.constant 0 : i32
      %16 = arith.cmpi slt, %14, %c0_i32_23 : i32
      %c0_i32_24 = arith.constant 0 : i32
      %17 = arith.cmpi slt, %13, %c0_i32_24 : i32
      %18 = arith.xori %16, %17 : i1
      %19 = arith.andi %18, %15 : i1
      %20 = arith.addi %14, %13 : i32
      %21 = arith.select %19, %20, %14 : i32
      %c1_i32_25 = arith.constant 1 : i32
      %22 = arith.subi %c1_i32_25, %21 : i32
      %c0_i32_26 = arith.constant 0 : i32
      %c5_i32_27 = arith.constant 5 : i32
      %23 = arith.addi %c0_i32_26, %c5_i32_27 : i32
      %c1_i32_28 = arith.constant 1 : i32
      scf.for %arg7 = %c0_i32_26 to %23 step %c1_i32_28  : i32 {
        %c0_i32_30 = arith.constant 0 : i32
        %c0_i32_31 = arith.constant 0 : i32
        %c5_i32_32 = arith.constant 5 : i32
        %24 = arith.addi %c0_i32_31, %c5_i32_32 : i32
        %c1_i32_33 = arith.constant 1 : i32
        %25:2 = scf.for %arg8 = %c0_i32_31 to %24 step %c1_i32_33 iter_args(%arg9 = %cst_9, %arg10 = %c0_i32_30) -> (f32, i32)  : i32 {
          %36 = arith.index_cast %21 : i32 to index
          %37 = arith.index_cast %arg8 : i32 to index
          %38 = memref.load %arg4[%36, %37] : memref<2x5xf32, #tpu.memory_space<smem>>
          %39 = arith.index_cast %arg7 : i32 to index
          %40 = arith.index_cast %arg8 : i32 to index
          %41 = memref.load %arg1[%39, %40] : memref<5x5xf32, #tpu.memory_space<smem>>
          %42 = arith.addf %38, %41 : f32
          %43 = arith.cmpf ogt, %42, %arg9 : f32
          %44 = arith.select %43, %42, %arg9 : f32
          %45 = arith.select %43, %arg8, %arg10 : i32
          scf.yield %44, %45 : f32, i32
        }
        %c5_i32_34 = arith.constant 5 : i32
        %26 = arith.index_cast %arg6 : i32 to index
        %27 = arith.index_cast %arg7 : i32 to index
        %28 = memref.load %arg5[%26, %27] : memref<8x5xi32, #tpu.memory_space<smem>>
        memref.store %25#1, %arg5[%26, %27] : memref<8x5xi32, #tpu.memory_space<smem>>
        %29 = arith.index_cast %arg6 : i32 to index
        %30 = arith.index_cast %arg7 : i32 to index
        %31 = memref.load %arg0[%29, %30] : memref<8x5xf32, #tpu.memory_space<smem>>
        %32 = arith.addf %25#0, %31 : f32
        %33 = arith.index_cast %22 : i32 to index
        %34 = arith.index_cast %arg7 : i32 to index
        %35 = memref.load %arg4[%33, %34] : memref<2x5xf32, #tpu.memory_space<smem>>
        memref.store %32, %arg4[%33, %34] : memref<2x5xf32, #tpu.memory_space<smem>>
      }
      %c5_i32_29 = arith.constant 5 : i32
    }
    %c8_i32_10 = arith.constant 8 : i32
    %cst_11 = arith.constant -1.000000e+30 : f32
    %c0_i32_12 = arith.constant 0 : i32
    %c0_i32_13 = arith.constant 0 : i32
    %c5_i32 = arith.constant 5 : i32
    %6 = arith.addi %c0_i32_13, %c5_i32 : i32
    %c1_i32_14 = arith.constant 1 : i32
    %7:2 = scf.for %arg6 = %c0_i32_13 to %6 step %c1_i32_14 iter_args(%arg7 = %cst_11, %arg8 = %c0_i32_12) -> (f32, i32)  : i32 {
      %c0_20 = arith.constant 0 : index
      %12 = arith.index_cast %arg6 : i32 to index
      %13 = memref.load %arg4[%c0_20, %12] : memref<2x5xf32, #tpu.memory_space<smem>>
      %c4_21 = arith.constant 4 : index
      %14 = arith.index_cast %arg6 : i32 to index
      %15 = memref.load %arg1[%c4_21, %14] : memref<5x5xf32, #tpu.memory_space<smem>>
      %16 = arith.addf %13, %15 : f32
      %17 = arith.cmpf ogt, %16, %arg7 : f32
      %18 = arith.select %17, %16, %arg7 : f32
      %19 = arith.select %17, %arg6, %arg8 : i32
      scf.yield %18, %19 : f32, i32
    }
    %c5_i32_15 = arith.constant 5 : i32
    %c0_16 = arith.constant 0 : index
    %8 = memref.load %arg2[%c0_16] : memref<1xf32, #tpu.memory_space<smem>>
    memref.store %7#0, %arg2[%c0_16] : memref<1xf32, #tpu.memory_space<smem>>
    %c7 = arith.constant 7 : index
    %9 = memref.load %arg3[%c7] : memref<8xi32, #tpu.memory_space<smem>>
    memref.store %7#1, %arg3[%c7] : memref<8xi32, #tpu.memory_space<smem>>
    %c0_i32_17 = arith.constant 0 : i32
    %c7_i32 = arith.constant 7 : i32
    %10 = arith.addi %c0_i32_17, %c7_i32 : i32
    %c1_i32_18 = arith.constant 1 : i32
    %11 = scf.for %arg6 = %c0_i32_17 to %10 step %c1_i32_18 iter_args(%arg7 = %7#1) -> (i32)  : i32 {
      %c7_i32_20 = arith.constant 7 : i32
      %12 = arith.subi %c7_i32_20, %arg6 : i32
      %13 = arith.index_cast %12 : i32 to index
      %14 = arith.index_cast %arg7 : i32 to index
      %15 = memref.load %arg5[%13, %14] : memref<8x5xi32, #tpu.memory_space<smem>>
      %c1_i32_21 = arith.constant 1 : i32
      %16 = arith.subi %12, %c1_i32_21 : i32
      %17 = arith.index_cast %16 : i32 to index
      %18 = memref.load %arg3[%17] : memref<8xi32, #tpu.memory_space<smem>>
      memref.store %15, %arg3[%17] : memref<8xi32, #tpu.memory_space<smem>>
      scf.yield %15 : i32
    }
    %c7_i32_19 = arith.constant 7 : i32
    return
  }
}

</mosaic_0001>

<bundles_post_ra>
// kernel: transformer_crf_forward.3
= control target key start
LH: loop header
LB: loop body
LE: loop exit
PB: predicated region body
PF: predicated region fallthrough
CT: control target
= control target key end

     0   :  { %s4130_s18 = smov 0   ;;  %s4577_s0 = inlined_call_operand.vmem [shape: f32[8,32], index: 0, kind: input, shape index: {}]   ;;  %s4578_s1 = inlined_call_operand.vmem [shape: f32[6,3,32,32], index: 1, kind: input, shape index: {}]   ;;  %s4579_s2 = inlined_call_operand.vmem [shape: f32[6,3,1,32], index: 2, kind: input, shape index: {}]   ;;  %s4580_s3 = inlined_call_operand.vmem [shape: f32[6,32,32], index: 3, kind: input, shape index: {}]   ;;  %s4581_s4 = inlined_call_operand.vmem [shape: f32[6,1,32], index: 4, kind: input, shape index: {}]   ;;  %s4582_s5 = inlined_call_operand.vmem [shape: f32[6,1,32], index: 5, kind: input, shape index: {}]   ;;  %s4583_s6 = inlined_call_operand.vmem [shape: f32[6,1,32], index: 6, kind: input, shape index: {}]   ;;  %s4584_s7 = inlined_call_operand.vmem [shape: bf16[6,32,2048], index: 7, kind: input, shape index: {}]   ;;  %s4585_s8 = inlined_call_operand.vmem [shape: f32[6,1,2048], index: 8, kind: input, shape index: {}]   ;;  %s4586_s9 = inlined_call_operand.vmem [shape: bf16[6,2048,32], index: 9, kind: input, shape index: {}]   ;;  %s4587_s10 = inlined_call_operand.vmem [shape: f32[6,1,32], index: 10, kind: input, shape index: {}]   ;;  %s4588_s11 = inlined_call_operand.vmem [shape: f32[6,1,32], index: 11, kind: input, shape index: {}]   ;;  %s4589_s12 = inlined_call_operand.vmem [shape: f32[6,1,32], index: 12, kind: input, shape index: {}]   ;;  %s4590_s13 = inlined_call_operand.vmem [shape: f32[1,32], index: 13, kind: input, shape index: {}]   ;;  %s4591_s14 = inlined_call_operand.vmem [shape: f32[1,32], index: 14, kind: input, shape index: {}]   ;;  %s4592_s15 = inlined_call_operand.vmem [shape: f32[8,32], index: 15, kind: output, shape index: {}]  }
   0x1   :  { %4594 = sst [smem:[#allocation4_spill]] %s4577_s0 }
   0x2   :  { %4595 = sst [smem:[#allocation5_spill]] %s4578_s1 }
   0x3   :  { %4596 = sst [smem:[#allocation6_spill]] %s4579_s2 }
   0x4   :  { %4597 = sst [smem:[#allocation7_spill]] %s4580_s3 }
   0x5   :  { %4598 = sst [smem:[#allocation8_spill]] %s4590_s13 }
   0x6   :  { %4599 = sst [smem:[#allocation9_spill]] %s4591_s14 }
   0x7   :  { %4600 = sst [smem:[#allocation10_spill]] %s4592_s15 }
   0x8 LB: > { %4601 = sst [smem:[#allocation3_spill]] %s4044_s18  ;;  %s4136_s19 = sadd.s32 4294967295, %s4044_s18   ;;  %s4044_s18 = sphi %s4130_s18, %s25_s18  }
   0x9   : > { %p3396_p0 = scmp.ge.s32.totalorder %s4044_s18, 1  ;;  %p528_p1 = scmp.lt.s32.totalorder %s4044_s18, 7 }
   0xb   : > { %p529_p2 = pnand %p3396_p0, %p528_p1 }
   0xc   : > { %p612_p3 = scmp.lt.s32.totalorder (!%p529_p2), %s4136_s19, 5  ;;  %s4602_s3 = sld [smem:[#allocation7_spill]] (!%p529_p2) }
   0xd   : > { %532 = sbr.rel (%p529_p2) target bundleno = 2700 (0xa8c), region = 80  ;;  %s4603_s1 = sld [smem:[#allocation5_spill]] (!%p529_p2) }
   0xe   : > { %s4604_s2 = sld [smem:[#allocation6_spill]] (!%p529_p2)  ;;  %p3405_p4 = scmp.ne.s32.totalorder (!%p529_p2), %s4136_s19, 0 }
  0x14   : > { %s4142_s20 = scalar_select %p612_p3, %s4136_s19, 5 }
  0x15   : > { %vm664_vm0 = vcmask (!%p3405_p4), 261120  }
  0x16   : > { %s3886_s21 = smul.u32 96, %s4142_s20  ;;  %s3605_s22 = sshll.u32 %s4142_s20, 5 }
  0x17   : > { %s3887_s23 = smul.u32 3, %s4142_s20  ;;  %s4150_s26 = scalar_lea.vmem %s4602_s3, %s3605_s22 }
  0x18   : > { %s4155_s29 = scalar_lea.vmem %s4603_s1, %s3886_s21  ;;  %s3606_s27 = sshll.u32 %s4142_s20, 8 }
  0x19   : > { %s4164_s14 = scalar_lea.vmem %s4604_s2, %s3887_s23  ;;  %s4178_s1 = scalar_lea.vmem %s4584_s7, %s3606_s27 }
  0x1a   : > { %s3402_s30 = sshll.u32 %s4142_s20, 4  ;;  %s3607_s18 = sshll.u32 %s4142_s20, 10 }
  0x1b   : > { %s4184_s15 = scalar_lea.vmem %s4585_s8, %s3402_s30  ;;  %s4190_s13 = scalar_lea.vmem %s4586_s9, %s3607_s18 }
  0x1c   : > { %s651_s3 = scalar_lea.vmem %s4587_s10, %s4142_s20  ;;  %s654_s27 = scalar_lea.vmem %s4588_s11, %s4142_s20 }
  0x1d   : > { %s657_s17 = scalar_lea.vmem %s4589_s12, %s4142_s20  ;;  %662 = sbr.rel (%p3405_p4) target bundleno = 38 (0x26), region = 84 }
  0x1e   : > { %s4605_s23 = sld [smem:[#allocation4_spill]] (!%p3405_p4) }
  0x24   : > { %v663_v0 = vld [vmem:[%s4605_s23] sm:$0xff] }
  0x25   : > { %665 = vst.msk [vmem:[#allocation2] sm:$0xff] %vm664_vm0, %v663_v0 }
  0x26 PF: > { %v3408_v1 = vld [vmem:[%s4155_s29 + $0x20] sm:$0xff]  ;;  %v3409_v2 = vld [vmem:[%s4155_s29 + $0x28] sm:$0xff]  ;;  %v4046_v4 = vmov 0.0|0.0   ;;  %v3410_v7 = vld [vmem:[%s4155_s29 + $0x30] sm:$0xff]  ;;  %vm4047_vm1 = vmmov 0   ;;  %v4048_v10 = vmov 0.0   ;;  %s4607_s18 = scalar_lea.vmem %s4582_s5, %s4142_s20  ;;  %s4608_s25 = scalar_lea.vmem %s4583_s6, %s4142_s20 }
  0x27   : > { %v667_v3 = vld [vmem:[%s4155_s29] sm:$0xff]  ;;  %3868 = vmatprep.subr.bf16.mxu1 %v4046_v4  ;;  %v3869_v5 = vpack.c.bf16 %v3409_v2, %v3408_v1  ;;  %3862 = vmatprep.subr.bf16.mxu0 %v4046_v4  ;;  %v668_v6 = vld [vmem:[%s4155_s29 + $0x8] sm:$0xff]  ;;  %v3411_v8 = vld [vmem:[%s4155_s29 + $0x38] sm:$0xff]  ;;  %vm678_vm2 = vcmask 261120   ;;  %vm1000_vm3 = vcmask 64512   ;;  %p3600_p5 = scmp.ne.s32.totalorder %s4136_s19, 5 }
  0x28   : > { %v3863_v9 = vpack.c.bf16 %v668_v6, %v667_v3  ;;  %3827 = vmatprep.mubr.msk.f32.mxu1 %vm4047_vm1, %v4048_v10  ;;  %v669_v11 = vld [vmem:[%s4155_s29 + $0x10] sm:$0xff]  ;;  %v670_v12 = vld [vmem:[%s4155_s29 + $0x18] sm:$0xff]  ;;  %3816 = vmatprep.mubr.msk.f32.mxu0 %vm4047_vm1, %v4048_v10  ;;  %v3872_v13 = vpack.c.bf16 %v3411_v8, %v3410_v7  ;;  %v3413_v16 = vld [vmem:[%s4164_s14 + $0x1] ss:$0 sm:$0xff]  ;;  %s4610_s16 = sld [smem:[#allocation9_spill]] (!%p3600_p5) }
  0x29   : > { %3870 = vmatpush3.bf16.msra.mxu1 %v3869_v5  ;;  %v3866_v14 = vpack.c.bf16 %v670_v12, %v669_v11  ;;  %v3406_v17 = vld [vmem:[%s4164_s14] ss:$0 sm:$0xff]  ;;  %v3416_v25 = vld [vmem:[%s4155_s29 + $0x48] sm:$0xff]  ;;  %v3417_v26 = vld [vmem:[%s4155_s29 + $0x50] sm:$0xff] }
  0x2a   : > { %3864 = vmatpush3.bf16.msra.mxu0 %v3863_v9  ;;  %3871 = vmatprep.subr.bf16.mxu1 %v4046_v4  ;;  %v3415_v24 = vld [vmem:[%s4155_s29 + $0x40] sm:$0xff]  ;;  %v3418_v28 = vld [vmem:[%s4155_s29 + $0x58] sm:$0xff]  ;;  %v919_v44 = vld [vmem:[%s4150_s26 + $0x8] sm:$0xff] }
  0x2b   : > { %3865 = vmatprep.subr.bf16.mxu0 %v4046_v4  ;;  %v3875_v27 = vpack.c.bf16 %v3416_v25, %v3415_v24  ;;  %v3878_v29 = vpack.c.bf16 %v3418_v28, %v3417_v26  ;;  %v3420_v40 = vld [vmem:[%s4164_s14 + $0x2] ss:$0 sm:$0xff]  ;;  %v920_v45 = vld [vmem:[%s4150_s26 + $0x10] sm:$0xff]  ;;  %v921_v47 = vld [vmem:[%s4150_s26 + $0x18] sm:$0xff]  ;;  %s4611_s14 = sld [smem:[#allocation10_spill]] (!%p3600_p5) }
  0x2c   : > { %v4222_v15 = vld [vmem:[#allocation2] sm:$0xff]  ;;  %v3884_v48 = vpack.c.bf16 %v921_v47, %v920_v45  ;;  %v1196_v3 = vld [vmem:[%s4178_s1 + $0x8] sm:$0xff] }
  0x2d   : > { %3873 = vmatpush3.bf16.msra.mxu1 %v3872_v13  ;;  %v918_v43 = vld [vmem:[%s4150_s26] sm:$0xff]  ;;  %s4606_s26 = scalar_lea.vmem %s4581_s4, %s4142_s20  ;;  %v1204_v5 = vld [vmem:[%s4178_s1 + $0x48] sm:$0xff] }
  0x2e   : > { %3867 = vmatpush3.bf16.msra.mxu0 %v3866_v14  ;;  %3841 = vmatprep.subr.mxu1 %v4048_v10  ;;  %v3881_v46 = vpack.c.bf16 %v919_v44, %v918_v43  ;;  %v3425_v54 = vld [vmem:[%s4606_s26] ss:$0 sm:$0xff]  ;;  %v3431_v7 = vcombine.low %v1196_v3, %v1204_v5  ;;  %v3432_v8 = vcombine.high %v1196_v3, %v1204_v5  ;;  %v1212_v11 = vld [vmem:[%s4178_s1 + $0x88] sm:$0xff]  ;;  %v1225_v3 = vld [vmem:[%s4178_s1 + $0xf0] sm:$0xff] }
  0x2f   : > { %3874 = vmatprep.subr.bf16.mxu0 %v4046_v4  ;;  %v1195_v1 = vld [vmem:[%s4178_s1] sm:$0xff]  ;;  %v1220_v13 = vld [vmem:[%s4178_s1 + $0xc8] sm:$0xff]  ;;  %v1226_v5 = vld [vmem:[%s4178_s1 + $0xf8] sm:$0xff] }
  0x30   : > { %3828 = vmatmul.mubr.msk.f32.vlgmr.msra.gmra.mrb[0].mxu1 %vm678_vm2, %v4222_v15  ;;  %v1203_v2 = vld [vmem:[%s4178_s1 + $0x40] sm:$0xff]  ;;  %v1200_v44 = vld [vmem:[%s4178_s1 + $0x28] sm:$0xff] }
  0x31   : > { %3817 = vmatmul.mubr.msk.f32.vlgmr.msra.gmra.mrb[0].mxu0 %vm678_vm2, %v4222_v15  ;;  %3843 = vmatprep.mubr.msk.f32.mxu1 %vm4047_vm1, %v4048_v10  ;;  %v3429_v6 = vcombine.low %v1195_v1, %v1203_v2  ;;  %v1211_v9 = vld [vmem:[%s4178_s1 + $0x80] sm:$0xff]  ;;  %v1208_v45 = vld [vmem:[%s4178_s1 + $0x68] sm:$0xff] }
  0x32   : > { %3838 = vmatprep.mubr.msk.f32.mxu0 %vm4047_vm1, %v4048_v10  ;;  %3876 = vmatpush3.bf16.msra.mxu0 %v3875_v27  ;;  %v1207_v43 = vld [vmem:[%s4178_s1 + $0x60] sm:$0xff] }
  0x33   : > { %3877 = vmatprep.subr.bf16.mxu0 %v4046_v4 }
  0x36   : > { %3879 = vmatpush3.bf16.msra.mxu0 %v3878_v29 }
  0x37   : > { %3880 = vmatprep.subr.bf16.mxu0 %v4046_v4 }
  0x39   : > { %3839 = vmatmul.mubr.msk.f32.vlgmr.msra.gmra.mrb[2].mxu0 %vm678_vm2, %v4222_v15 }
  0x3a   : > { %3859 = vmatprep.mubr.msk.f32.mxu0 %vm4047_vm1, %v4048_v10  ;;  %3882 = vmatpush3.bf16.msra.mxu0 %v3881_v46 }
  0x3b   : > { %3883 = vmatprep.subr.bf16.mxu0 %v4046_v4  ;;  %v3430_v4 = vcombine.high %v1195_v1, %v1203_v2  ;;  %v1217_v2 = vld [vmem:[%s4178_s1 + $0xb0] sm:$0xff] }
  0x3e   : > { %3885 = vmatpush3.bf16.msra.mxu0 %v3884_v48 }
  0x3f   : > { %1773 = vmatprep.subr.bf16.mxu0 %v3432_v8  ;;  %v3458_v8 = vcombine.high %v1217_v2, %v1225_v3 }
 0x103   : > { %v831_v18 = vpop.f32.mrb[0].mxu1 }
 0x104   : > { %v832_v19 = vadd.f32 %v3413_v16, %v831_v18  ;;  %v3829_v20 = vpop.f32.mrb[1].mxu1  ;;  %v748_v21 = vpop.f32.mrb[0].mxu0  ;;  %v3448_v16 = vcombine.high %v1212_v11, %v1220_v13  ;;  %v1205_v18 = vld [vmem:[%s4178_s1 + $0x50] sm:$0xff] }
 0x105   : > { %v749_v22 = vadd.f32 %v3406_v17, %v748_v21  ;;  %v3818_v23 = vpop.f32.mrb[1].mxu0  ;;  %v1197_v17 = vld [vmem:[%s4178_s1 + $0x10] sm:$0xff]  ;;  %v1206_v21 = vld [vmem:[%s4178_s1 + $0x58] sm:$0xff] }
 0x106   : > { %3842 = vmatpush3.xpose.msk.msra.mxu1 %vm678_vm2, %v832_v19  ;;  %v1198_v19 = vld [vmem:[%s4178_s1 + $0x18] sm:$0xff]  ;;  %v3434_v20 = vcombine.high %v1197_v17, %v1205_v18  ;;  %v3433_v23 = vcombine.low %v1197_v17, %v1205_v18  ;;  %v3905_v17 = vld [vmem:[%s4190_s13 + $0xc8] sm:$0xff]  }
 0x107   : > { %3846 = vmatprep.subr.mxu1 %v4048_v10  ;;  %v3435_v24 = vcombine.low %v1198_v19, %v1206_v21  ;;  %v3436_v25 = vcombine.high %v1198_v19, %v1206_v21  ;;  %v3906_v18 = vld [vmem:[%s4190_s13 + $0x8] sm:$0xff]   ;;  %v3909_v21 = vld [vmem:[%s4190_s13 + $0xd0] sm:$0xff]  }
 0x108   : > { %v3907_v19 = vld [vmem:[%s4190_s13 + $0x88] sm:$0xff]  }
 0x109   : > { %3844 = vmatmul.mubr.msk.f32.vlgmr.msra.gmra.mrb[2].mxu1 %vm678_vm2, %v749_v22  ;;  %v4049_v22 = vmov 0  }
 0x10a   : > { %3848 = vmatprep.mubr.msk.f32.mxu1 %vm4047_vm1, %v4048_v10  ;;  %v1219_v10 = vld [vmem:[%s4178_s1 + $0xc0] sm:$0xff] }
 0x10b   : > { %v3446_v12 = vcombine.high %v1211_v9, %v1219_v10  ;;  %v3445_v14 = vcombine.low %v1211_v9, %v1219_v10  ;;  %v3457_v10 = vcombine.low %v1217_v2, %v1225_v3 }
 0x10c   : > { %v914_v39 = vpop.f32.mrb[2].mxu0 }
 0x10d   : > { %v3840_v41 = vpop.f32.mrb[3].mxu0  ;;  %v915_v42 = vadd.f32 %v3420_v40, %v914_v39 }
 0x10f   : > { %3847 = vmatpush3.msra.mxu1 %v915_v42  ;;  %v1199_v42 = vld [vmem:[%s4178_s1 + $0x20] sm:$0xff] }
 0x110   : > { %1732 = vmatprep.subr.bf16.mxu1 %v3430_v4  ;;  %v3438_v48 = vcombine.high %v1199_v42, %v1207_v43  ;;  %v1218_v4 = vld [vmem:[%s4178_s1 + $0xb8] sm:$0xff] }
 0x111   : > { %v3460_v9 = vcombine.high %v1218_v4, %v1226_v5 }
 0x1dc   : > { %v995_v30 = vpop.f32.mrb[2].mxu1 }
 0x1dd   : > { %v999_v31 = vmul.f32 0.17677669, %v995_v30  ;;  %v3845_v32 = vpop.f32.mrb[3].mxu1  ;;  %v3427_v30 = vld [vmem:[%s4607_s18] ss:$0 sm:$0xff] }
 0x1de   : > { %v3428_v32 = vld [vmem:[%s4608_s25] ss:$0 sm:$0xff] }
 0x1df   : > { %v1001_v33 = vsel %vm1000_vm3, %v999_v31, -inf }
 0x1e0   : > { %1002 = vmax.xlane.f32.xlu0 %v1001_v33 }
 0x26d   : > { %v1003_v34 = vpop.xlane.xlu0 %1002 }
 0x26e   : > { %v1004_v35 = vsub.f32 %v999_v31, %v1003_v34  ;;  %v1213_v34 = vld [vmem:[%s4178_s1 + $0x90] sm:$0xff] }
 0x270   : > { %v1005_v36 = vmul.f32 1.442695, %v1004_v35  ;;  %v1221_v35 = vld [vmem:[%s4178_s1 + $0xd0] sm:$0xff] }
 0x271   : > { %v3450_v40 = vcombine.high %v1213_v34, %v1221_v35  ;;  %v3449_v46 = vcombine.low %v1213_v34, %v1221_v35  ;;  %v3922_v34 = vld [vmem:[%s4190_s13 + $0x28] sm:$0xff]  }
 0x272   : > { %4028 = vpow2.f32 %v1005_v36  ;;  %v1214_v36 = vld [vmem:[%s4178_s1 + $0x98] sm:$0xff]  ;;  %v3923_v35 = vld [vmem:[%s4190_s13 + $0xa8] sm:$0xff]  }
 0x27c   : > { %v4029_v37 = vpop.eup %4028 }
 0x27d   : > { %v1007_v38 = vsel %vm1000_vm3, %v4029_v37, 0.0 }
 0x27e   : > { %1008 = vadd.xlane.f32.xlu0 %v1007_v38 }
 0x30b   : > { %v1009_v49 = vpop.xlane.xlu0 %1008 }
 0x30c   : > { %4030 = vrcp.f32 %v1009_v49  ;;  %v3440_v49 = vcombine.high %v1200_v44, %v1208_v45 }
 0x316   : > { %v4031_v50 = vpop.eup %4030 }
 0x317   : > { %v1011_v51 = vmul.f32 %v4031_v50, %v4029_v37  ;;  %v1222_v37 = vld [vmem:[%s4178_s1 + $0xd8] sm:$0xff]  ;;  %v1215_v50 = vld [vmem:[%s4178_s1 + $0xa0] sm:$0xff] }
 0x318   : > { %v3452_v41 = vcombine.high %v1214_v36, %v1222_v37  ;;  %v3451_v47 = vcombine.low %v1214_v36, %v1222_v37  ;;  %v3924_v36 = vld [vmem:[%s4190_s13 + $0x70] sm:$0xff]  }
 0x319   : > { %3849 = vmatmul.mubr.msk.f32.vlgmr.msra.gmra.mrb[4].mxu1 %vm1000_vm3, %v1011_v51  ;;  %v1223_v51 = vld [vmem:[%s4178_s1 + $0xe0] sm:$0xff]  ;;  %v3925_v37 = vld [vmem:[%s4190_s13 + $0xf0] sm:$0xff]  }
 0x31a   : > { %1733 = vmatpush1.bf16.msra.mxu1 %v3429_v6  ;;  %1764 = vmatprep.mubr.bf16.mxu1 %v4049_v22 }
 0x31b   : > { %1734 = vmatprep.subr.bf16.mxu1 %v3446_v12  ;;  %v3900_v12 = vld [vmem:[%s4190_s13 + $0x40] sm:$0xff]  }
 0x31e   : > { %1735 = vmatpush1.bf16.msra.mxu1 %v3445_v14  ;;  %v3902_v14 = vld [vmem:[%s4190_s13] sm:$0xff]  }
 0x31f   : > { %1814 = vmatprep.subr.bf16.mxu1 %v3434_v20  ;;  %v3908_v20 = vld [vmem:[%s4190_s13 + $0x50] sm:$0xff]  }
 0x3ec   : > { %v1081_v52 = vpop.f32.mrb[4].mxu1 }
 0x3ed   : > { %v3850_v53 = vpop.f32.mrb[5].mxu1  ;;  %3860 = vmatmul.mubr.msk.f32.vlgmr.msra.gmra.mrb[4].mxu0 %vm678_vm2, %v1081_v52  ;;  %v1216_v52 = vld [vmem:[%s4178_s1 + $0xa8] sm:$0xff] }
 0x3ee   : > { %1774 = vmatpush1.bf16.msra.mxu0 %v3431_v7  ;;  %1805 = vmatprep.mubr.bf16.mxu0 %v4049_v22  ;;  %v1224_v53 = vld [vmem:[%s4178_s1 + $0xe8] sm:$0xff] }
 0x3ef   : > { %1775 = vmatprep.subr.bf16.mxu0 %v3448_v16  ;;  %v3904_v16 = vld [vmem:[%s4190_s13 + $0x48] sm:$0xff]  }
 0x4c0   : > { %v1160_v55 = vpop.f32.mrb[4].mxu0 }
 0x4c1   : > { %v1161_v56 = vadd.f32 %v3425_v54, %v1160_v55  ;;  %v3861_v57 = vpop.f32.mrb[5].mxu0  ;;  %v3437_v54 = vcombine.low %v1199_v42, %v1207_v43  ;;  %v3439_v55 = vcombine.low %v1200_v44, %v1208_v45  ;;  %v3929_v42 = vld [vmem:[%s4190_s13 + $0xf8] sm:$0xff]   ;;  %v3932_v45 = vld [vmem:[%s4190_s13 + $0x140] sm:$0xff]  }
 0x4c2   : > { %v3456_v57 = vcombine.high %v1216_v52, %v1224_v53  ;;  %v3930_v43 = vld [vmem:[%s4190_s13 + $0x38] sm:$0xff]  }
 0x4c3   : > { %v1166_v58 = vadd.f32 %v1161_v56, %v4222_v15  ;;  %v3447_v15 = vcombine.low %v1212_v11, %v1220_v13  ;;  %v3454_v56 = vcombine.high %v1215_v50, %v1223_v51  ;;  %v3459_v11 = vcombine.low %v1218_v4, %v1226_v5  ;;  %v3901_v13 = vld [vmem:[%s4190_s13 + $0xc0] sm:$0xff]   ;;  %v3931_v44 = vld [vmem:[%s4190_s13 + $0xb8] sm:$0xff]  }
 0x4c5   : > { %v1167_v59 = vsel %vm678_vm2, %v1166_v58, 0.0  ;;  %1776 = vmatpush1.bf16.msra.mxu0 %v3447_v15  ;;  %v3903_v15 = vld [vmem:[%s4190_s13 + $0x80] sm:$0xff]  }
 0x4c6   : > { %1168 = vadd.xlane.f32.xlu1 %v1167_v59  ;;  %1855 = vmatprep.subr.bf16.mxu0 %v3436_v25  ;;  %v1209_v59 = vld [vmem:[%s4178_s1 + $0x70] sm:$0xff]  ;;  %v3913_v25 = vld [vmem:[%s4190_s13 + $0xd8] sm:$0xff]  }
 0x553   : > { %v1169_v60 = vpop.xlane.xlu1 %1168 }
 0x554   : > { %v1171_v61 = vmul.f32 0.03125, %v1169_v60  ;;  %v1202_v60 = vld [vmem:[%s4178_s1 + $0x38] sm:$0xff] }
 0x556   : > { %v1172_v62 = vsub.f32 %v1166_v58, %v1171_v61  ;;  %v1201_v58 = vld [vmem:[%s4178_s1 + $0x30] sm:$0xff]  ;;  %v1210_v61 = vld [vmem:[%s4178_s1 + $0x78] sm:$0xff] }
 0x557   : > { %v3444_v1 = vcombine.high %v1202_v60, %v1210_v61  ;;  %v3441_v6 = vcombine.low %v1201_v58, %v1209_v59  ;;  %v3443_v7 = vcombine.low %v1202_v60, %v1210_v61 }
 0x558   : > { %v1173_v63 = vmul.f32 %v1172_v62, %v1172_v62 }
 0x55a   : > { %v1174_v0 = vsel %vm678_vm2, %v1173_v63, 0.0  ;;  %v3455_v63 = vcombine.low %v1216_v52, %v1224_v53 }
 0x55b   : > { %1175 = vadd.xlane.f32.xlu1 %v1174_v0  ;;  %v3442_v0 = vcombine.high %v1201_v58, %v1209_v59 }
 0x5e8   : > { %v1176_v26 = vpop.xlane.xlu1 %1175 }
 0x5e9   : > { %v1177_v27 = vmul.f32 0.03125, %v1176_v26  ;;  %v3914_v26 = vld [vmem:[%s4190_s13 + $0x18] sm:$0xff]  }
 0x5eb   : > { %v1178_v28 = vadd.f32 1e-05, %v1177_v27  ;;  %v3915_v27 = vld [vmem:[%s4190_s13 + $0x98] sm:$0xff]  }
 0x5ed   : > { %4032 = vrsqrt.f32 %v1178_v28  ;;  %v3916_v28 = vld [vmem:[%s4190_s13 + $0x60] sm:$0xff]  }
 0x5f7   : > { %v4033_v29 = vpop.eup %4032 }
 0x5f8   : > { %v1180_v31 = vmul.f32 %v4033_v29, %v1172_v62  ;;  %v3453_v62 = vcombine.low %v1215_v50, %v1223_v51  ;;  %v3917_v29 = vld [vmem:[%s4190_s13 + $0xe0] sm:$0xff]   ;;  %v4373_v50 = vld [vmem:[%s4184_s15 + $0x8] sm:$0xff] }
 0x5fa   : > { %v1187_v33 = vmul.f32 %v3427_v30, %v1180_v31  ;;  %v3918_v30 = vld [vmem:[%s4190_s13 + $0x20] sm:$0xff]  }
 0x5fb   : > { %v3919_v31 = vld [vmem:[%s4190_s13 + $0xa0] sm:$0xff]  }
 0x5fc   : > { %v4291_v38 = vadd.f32 %v3428_v32, %v1187_v33  ;;  %v3920_v32 = vld [vmem:[%s4190_s13 + $0x68] sm:$0xff]  }
 0x5fd   : > { %v3921_v33 = vld [vmem:[%s4190_s13 + $0xe8] sm:$0xff]  }
 0x5fe   : > { %v4295_v39 = vpack.c.bf16 %v4291_v38, %v4291_v38 }
 0x600   : > { %3461 = vmatmul.mubr.msk.bf16.vlgmr.msra.gmra.mrb[8].mxu1 %vm678_vm2, %v4295_v39  ;;  %3462 = vmatmul.mubr.msk.bf16.vlgmr.msra.gmra.mrb[8].mxu0 %vm678_vm2, %v4295_v39 }
 0x601   : > { %1815 = vmatpush1.bf16.msra.mxu1 %v3433_v23  ;;  %1856 = vmatpush1.bf16.msra.mxu0 %v3435_v24  ;;  %v3911_v23 = vld [vmem:[%s4190_s13 + $0x90] sm:$0xff]   ;;  %v3912_v24 = vld [vmem:[%s4190_s13 + $0x58] sm:$0xff]  }
 0x602   : > { %1816 = vmatprep.subr.bf16.mxu1 %v3450_v40  ;;  %1857 = vmatprep.subr.bf16.mxu0 %v3452_v41  ;;  %v3927_v40 = vld [vmem:[%s4190_s13 + $0xb0] sm:$0xff]   ;;  %v3928_v41 = vld [vmem:[%s4190_s13 + $0x78] sm:$0xff]  }
 0x603   : > { %1846 = vmatprep.mubr.bf16.mxu1 %v4049_v22  ;;  %1887 = vmatprep.mubr.bf16.mxu0 %v4049_v22 }
 0x605   : > { %1817 = vmatpush1.bf16.msra.mxu1 %v3449_v46  ;;  %1858 = vmatpush1.bf16.msra.mxu0 %v3451_v47  ;;  %v3933_v46 = vld [vmem:[%s4190_s13 + $0x1c0] sm:$0xff]   ;;  %v1489_v47 = vlaneseq }
 0x606   : > { %1896 = vmatprep.subr.bf16.mxu1 %v3438_v48  ;;  %1937 = vmatprep.subr.bf16.mxu0 %v3440_v49 }
 0x607   : > { %v4369_v48 = vshrl.u32 %v1489_v47, 7  ;;  %v3943_v47 = vld [vmem:[%s4190_s13 + $0x190] sm:$0xff]  }
 0x608   : > { %3463 = vmatmul.mubr.msk.bf16.vlgmr.msra.gmra.mrb[12].mxu1 %vm678_vm2, %v4295_v39  ;;  %3464 = vmatmul.mubr.msk.bf16.vlgmr.msra.gmra.mrb[12].mxu0 %vm678_vm2, %v4295_v39 }
 0x609   : > { %1897 = vmatpush1.bf16.msra.mxu1 %v3437_v54  ;;  %1938 = vmatpush1.bf16.msra.mxu0 %v3439_v55  ;;  %v1515_v49 = vsub.s32 6, %v4369_v48  ;;  %v1491_v52 = vsub.s32 0, %v4369_v48  ;;  %v1499_v53 = vsub.s32 2, %v4369_v48  ;;  %v4383_v54 = vld [vmem:[%s4184_s15] sm:$0xff]  ;;  %v1495_v55 = vsub.s32 1, %v4369_v48 }
 0x60a   : > { %1898 = vmatprep.subr.bf16.mxu1 %v3454_v56  ;;  %1939 = vmatprep.subr.bf16.mxu0 %v3456_v57  ;;  %v1503_v56 = vsub.s32 3, %v4369_v48 }
 0x60b   : > { %1928 = vmatprep.mubr.bf16.mxu1 %v4049_v22  ;;  %1969 = vmatprep.mubr.bf16.mxu0 %v4049_v22  ;;  %v4378_v51 = vrot.slane %v4373_v50, %v1515_v49  ;;  %v1492_v57 = vrot.slane %v4383_v54, %v1491_v52  ;;  %v1500_v58 = vrot.slane %v4383_v54, %v1499_v53 }
 0x60c   : > { %v1496_v59 = vrot.slane %v4383_v54, %v1495_v55  ;;  %v1504_v60 = vrot.slane %v4383_v54, %v1503_v56 }
 0x60d   : > { %1899 = vmatpush1.bf16.msra.mxu1 %v3453_v62  ;;  %1940 = vmatpush1.bf16.msra.mxu0 %v3455_v63 }
 0x60e   : > { %1978 = vmatprep.subr.bf16.mxu1 %v3442_v0  ;;  %2019 = vmatprep.subr.bf16.mxu0 %v3444_v1 }
 0x610   : > { %3465 = vmatmul.mubr.msk.bf16.vlgmr.msra.gmra.mrb[16].mxu1 %vm678_vm2, %v4295_v39  ;;  %3466 = vmatmul.mubr.msk.bf16.vlgmr.msra.gmra.mrb[16].mxu0 %vm678_vm2, %v4295_v39 }
 0x611   : > { %1979 = vmatpush1.bf16.msra.mxu1 %v3441_v6  ;;  %2020 = vmatpush1.bf16.msra.mxu0 %v3443_v7  ;;  %v1511_v7 = vsub.s32 5, %v4369_v48 }
 0x612   : > { %1980 = vmatprep.subr.bf16.mxu1 %v3458_v8  ;;  %2021 = vmatprep.subr.bf16.mxu0 %v3460_v9  ;;  %v1519_v8 = vsub.s32 7, %v4369_v48 }
 0x613   : > { %2010 = vmatprep.mubr.bf16.mxu1 %v4049_v22  ;;  %2051 = vmatprep.mubr.bf16.mxu0 %v4049_v22  ;;  %v3910_v22 = vld [vmem:[%s4190_s13 + $0x10] sm:$0xff]  }
 0x615   : > { %1981 = vmatpush1.bf16.msra.mxu1 %v3457_v10  ;;  %2022 = vmatpush1.bf16.msra.mxu0 %v3459_v11 }
 0x616   : > { %3632 = vmatprep.subr.bf16.mxu1 %v3900_v12  ;;  %3654 = vmatprep.subr.bf16.mxu0 %v3901_v13 }
 0x618   : > { %3467 = vmatmul.mubr.msk.bf16.vlgmr.msra.gmra.mrb[20].mxu1 %vm678_vm2, %v4295_v39  ;;  %3468 = vmatmul.mubr.msk.bf16.vlgmr.msra.gmra.mrb[20].mxu0 %vm678_vm2, %v4295_v39  ;;  %v3926_v39 = vld [vmem:[%s4190_s13 + $0x30] sm:$0xff]  }
 0x619   : > { %3633 = vmatpush3.bf16.msra.mxu1 %v3902_v14  ;;  %3655 = vmatpush3.bf16.msra.mxu0 %v3903_v15 }
 0x61a   : > { %3634 = vmatprep.subr.bf16.mxu1 %v3904_v16  ;;  %3656 = vmatprep.subr.bf16.mxu0 %v3905_v17  ;;  %v1512_v17 = vrot.slane %v4383_v54, %v1511_v7 }
 0x61d   : > { %3635 = vmatpush3.bf16.msra.mxu1 %v3906_v18  ;;  %3657 = vmatpush3.bf16.msra.mxu0 %v3907_v19  ;;  %v1520_v18 = vrot.slane %v4383_v54, %v1519_v8  ;;  %v3934_v19 = vld [vmem:[%s4190_s13 + $0x100] sm:$0xff]  }
 0x61e   : > { %3636 = vmatprep.subr.bf16.mxu1 %v3908_v20  ;;  %3658 = vmatprep.subr.bf16.mxu0 %v3909_v21  ;;  %v3935_v20 = vld [vmem:[%s4190_s13 + $0x180] sm:$0xff]  }
 0x621   : > { %3637 = vmatpush3.bf16.msra.mxu1 %v3910_v22  ;;  %3659 = vmatpush3.bf16.msra.mxu0 %v3911_v23  ;;  %v3936_v23 = vld [vmem:[%s4190_s13 + $0x148] sm:$0xff]  }
 0x622   : > { %3638 = vmatprep.subr.bf16.mxu1 %v3912_v24  ;;  %3660 = vmatprep.subr.bf16.mxu0 %v3913_v25  ;;  %v3937_v24 = vld [vmem:[%s4190_s13 + $0x1c8] sm:$0xff]  }
 0x625   : > { %3639 = vmatpush3.bf16.msra.mxu1 %v3914_v26  ;;  %3661 = vmatpush3.bf16.msra.mxu0 %v3915_v27 }
 0x626   : > { %3640 = vmatprep.subr.bf16.mxu1 %v3916_v28  ;;  %3662 = vmatprep.subr.bf16.mxu0 %v3917_v29 }
 0x629   : > { %3641 = vmatpush3.bf16.msra.mxu1 %v3918_v30  ;;  %3663 = vmatpush3.bf16.msra.mxu0 %v3919_v31 }
 0x62a   : > { %3642 = vmatprep.subr.bf16.mxu1 %v3920_v32  ;;  %3664 = vmatprep.subr.bf16.mxu0 %v3921_v33  ;;  %v3938_v33 = vld [vmem:[%s4190_s13 + $0x108] sm:$0xff]  }
 0x62d   : > { %3643 = vmatpush3.bf16.msra.mxu1 %v3922_v34  ;;  %3665 = vmatpush3.bf16.msra.mxu0 %v3923_v35  ;;  %v3939_v34 = vld [vmem:[%s4190_s13 + $0x188] sm:$0xff]  }
 0x62e   : > { %3644 = vmatprep.subr.bf16.mxu1 %v3924_v36  ;;  %3666 = vmatprep.subr.bf16.mxu0 %v3925_v37  ;;  %v3940_v37 = vld [vmem:[%s4190_s13 + $0x150] sm:$0xff]  }
 0x631   : > { %3645 = vmatpush3.bf16.msra.mxu1 %v3926_v39  ;;  %3667 = vmatpush3.bf16.msra.mxu0 %v3927_v40  ;;  %v3941_v39 = vld [vmem:[%s4190_s13 + $0x1d0] sm:$0xff]  }
 0x632   : > { %3646 = vmatprep.subr.bf16.mxu1 %v3928_v41  ;;  %3668 = vmatprep.subr.bf16.mxu0 %v3929_v42  ;;  %v1524_v42 = vrot.slane %v4373_v50, %v1491_v52 }
 0x635   : > { %3647 = vmatpush3.bf16.msra.mxu1 %v3930_v43  ;;  %3669 = vmatpush3.bf16.msra.mxu0 %v3931_v44  ;;  %v1532_v43 = vrot.slane %v4373_v50, %v1499_v53 }
 0x636   : > { %3676 = vmatprep.subr.bf16.mxu1 %v3932_v45  ;;  %3698 = vmatprep.subr.bf16.mxu0 %v3933_v46  ;;  %v3942_v46 = vld [vmem:[%s4190_s13 + $0x110] sm:$0xff]  }
 0x6d3   : > { %v1766_v61 = vpop.f32.mrb[8].mxu1  ;;  %v1807_v62 = vpop.f32.mrb[8].mxu0 }
 0x6d4   : > { %v1767_v63 = vadd.f32 %v1766_v61, %v1492_v57  ;;  %v1808_v0 = vadd.f32 %v1807_v62, %v1500_v58  ;;  %v1768_v1 = vpop.f32.mrb[9].mxu1  ;;  %v1809_v2 = vpop.f32.mrb[9].mxu0  ;;  %v3944_v57 = vld [vmem:[%s4190_s13 + $0x158] sm:$0xff]  }
 0x6d5   : > { %v1769_v3 = vadd.f32 %v1768_v1, %v1496_v59  ;;  %v1810_v4 = vadd.f32 %v1809_v2, %v1504_v60  ;;  %v1770_v5 = vpop.f32.mrb[10].mxu1  ;;  %v1811_v6 = vpop.f32.mrb[10].mxu0  ;;  %v3945_v58 = vld [vmem:[%s4190_s13 + $0x1d8] sm:$0xff]  }
 0x6d6   : > { %v2060_v9 = vmax.f32 %v1767_v63, 0.0  ;;  %v2062_v10 = vmax.f32 %v1808_v0, 0.0  ;;  %v1771_v11 = vpop.f32.mrb[11].mxu1  ;;  %v1812_v12 = vpop.f32.mrb[11].mxu0  ;;  %v3946_v1 = vld [vmem:[%s4190_s13 + $0x118] sm:$0xff]   ;;  %v3948_v6 = vld [vmem:[%s4190_s13 + $0x160] sm:$0xff]  }
 0x6d7   : > { %v2061_v13 = vmax.f32 %v1769_v3, 0.0  ;;  %v2063_v14 = vmax.f32 %v1810_v4, 0.0  ;;  %v3947_v2 = vld [vmem:[%s4190_s13 + $0x198] sm:$0xff]   ;;  %v1507_v3 = vsub.s32 4, %v4369_v48  ;;  %v3950_v11 = vld [vmem:[%s4190_s13 + $0x120] sm:$0xff]  }
 0x6d8   : > { %v2076_v21 = vpack.c.bf16 %v2060_v9, %v2060_v9  ;;  %v2078_v22 = vpack.c.bf16 %v2062_v10, %v2062_v10  ;;  %v3949_v9 = vld [vmem:[%s4190_s13 + $0x1e0] sm:$0xff]   ;;  %v3994_v48 = vld [vmem:[%s4190_s13 + $0x238] sm:$0xff]  }
 0x6d9   : > { %v2077_v15 = vpack.c.bf16 %v2061_v13, %v2061_v13  ;;  %v2079_v16 = vpack.c.bf16 %v2063_v14, %v2063_v14  ;;  %v1540_v10 = vrot.slane %v4373_v50, %v1507_v3  ;;  %v3951_v12 = vld [vmem:[%s4190_s13 + $0x1a0] sm:$0xff]   ;;  %v3952_v13 = vld [vmem:[%s4190_s13 + $0x168] sm:$0xff]  }
 0x6da   : > { %v3953_v14 = vld [vmem:[%s4190_s13 + $0x1e8] sm:$0xff]  }
 0x6db   : > { %v4407_v25 = vpop.f32.mrb[12].mxu1  ;;  %v4409_v26 = vpop.f32.mrb[12].mxu0  ;;  %2898 = vmatprep.mubr.bf16.mxu1 %v2077_v15  ;;  %2938 = vmatprep.mubr.bf16.mxu0 %v2079_v16 }
 0x6dc   : > { %v1850_v27 = vpop.f32.mrb[13].mxu1  ;;  %v1891_v28 = vpop.f32.mrb[13].mxu0  ;;  %2899 = vmatmul.mubr.bf16.vlgmr.msra.gmra.mrb[24].mxu1 %v2076_v21  ;;  %2939 = vmatmul.mubr.bf16.vlgmr.msra.gmra.mrb[24].mxu0 %v2078_v22 }
 0x6dd   : > { %v1851_v29 = vadd.f32 %v1850_v27, %v1512_v17  ;;  %v1892_v30 = vadd.f32 %v1891_v28, %v1520_v18  ;;  %3677 = vmatpush3.bf16.msra.mxu1 %v3934_v19  ;;  %3699 = vmatpush3.bf16.msra.mxu0 %v3935_v20  ;;  %v1852_v31 = vpop.f32.mrb[14].mxu1  ;;  %v1893_v32 = vpop.f32.mrb[14].mxu0  ;;  %v1508_v27 = vrot.slane %v4383_v54, %v1507_v3  ;;  %v3975_v3 = vld [vmem:[%s4190_s13 + $0x290] sm:$0xff]  }
 0x6de   : > { %v1853_v35 = vpop.f32.mrb[15].mxu1  ;;  %v1894_v36 = vpop.f32.mrb[15].mxu0  ;;  %3678 = vmatprep.subr.bf16.mxu1 %v3936_v23  ;;  %3700 = vmatprep.subr.bf16.mxu0 %v3937_v24  ;;  %v3954_v23 = vld [vmem:[%s4190_s13 + $0x128] sm:$0xff]   ;;  %v3957_v31 = vld [vmem:[%s4190_s13 + $0x1f0] sm:$0xff]   ;;  %v1528_v32 = vrot.slane %v4373_v50, %v1495_v55  ;;  %v3961_v55 = vld [vmem:[%s4190_s13 + $0x1f8] sm:$0xff]  }
 0x6df   : > { %v2065_v40 = vmax.f32 %v1851_v29, 0.0  ;;  %v2067_v41 = vmax.f32 %v1892_v30, 0.0  ;;  %v3955_v24 = vld [vmem:[%s4190_s13 + $0x1a8] sm:$0xff]   ;;  %v3956_v30 = vld [vmem:[%s4190_s13 + $0x170] sm:$0xff]   ;;  %v3960_v36 = vld [vmem:[%s4190_s13 + $0x178] sm:$0xff]  }
 0x6e1   : > { %v2081_v44 = vpack.c.bf16 %v2065_v40, %v2065_v40  ;;  %v2083_v45 = vpack.c.bf16 %v2067_v41, %v2067_v41  ;;  %3679 = vmatpush3.bf16.msra.mxu1 %v3938_v33  ;;  %3701 = vmatpush3.bf16.msra.mxu0 %v3939_v34  ;;  %v1536_v33 = vrot.slane %v4373_v50, %v1503_v56  ;;  %v3962_v56 = vld [vmem:[%s4190_s13 + $0x138] sm:$0xff]  }
 0x6e2   : > { %3680 = vmatprep.subr.bf16.mxu1 %v3940_v37  ;;  %3702 = vmatprep.subr.bf16.mxu0 %v3941_v39  ;;  %v1849_v34 = vadd.f32 %v4407_v25, %v1508_v27  ;;  %v3963_v40 = vld [vmem:[%s4190_s13 + $0x1b8] sm:$0xff]   ;;  %v3964_v25 = vld [vmem:[%s4190_s13 + $0x240] sm:$0xff]   ;;  %v1552_v27 = vrot.slane %v4373_v50, %v1519_v8 }
 0x6e3   : > { %v1930_v59 = vpop.f32.mrb[16].mxu1  ;;  %v1971_v60 = vpop.f32.mrb[16].mxu0  ;;  %2978 = vmatprep.mubr.bf16.mxu1 %v2081_v44  ;;  %3018 = vmatprep.mubr.bf16.mxu0 %v2083_v45  ;;  %v3966_v45 = vld [vmem:[%s4190_s13 + $0x200] sm:$0xff]   ;;  %v3995_v8 = vld [vmem:[%s4190_s13 + $0x2b8] sm:$0xff]  }
 0x6e4   : > { %v4421_v52 = vadd.f32 %v1930_v59, %v1524_v42  ;;  %v4423_v53 = vadd.f32 %v1971_v60, %v1532_v43  ;;  %v1932_v61 = vpop.f32.mrb[17].mxu1  ;;  %v1973_v62 = vpop.f32.mrb[17].mxu0  ;;  %v2064_v41 = vmax.f32 %v1849_v34, 0.0  ;;  %v3968_v59 = vld [vmem:[%s4190_s13 + $0x248] sm:$0xff]  }
 0x6e5   : > { %3681 = vmatpush3.bf16.msra.mxu1 %v3942_v46  ;;  %3703 = vmatpush3.bf16.msra.mxu0 %v3943_v47  ;;  %v1934_v63 = vpop.f32.mrb[18].mxu1  ;;  %v1975_v0 = vpop.f32.mrb[18].mxu0  ;;  %v1933_v37 = vadd.f32 %v1932_v61, %v1528_v32  ;;  %v1974_v39 = vadd.f32 %v1973_v62, %v1536_v33  ;;  %v3969_v60 = vld [vmem:[%s4190_s13 + $0x2c8] sm:$0xff]   ;;  %v3996_v32 = vld [vmem:[%s4190_s13 + $0x340] sm:$0xff]  }
 0x6e6   : > { %v1935_v4 = vpop.f32.mrb[19].mxu1  ;;  %v1976_v5 = vpop.f32.mrb[19].mxu0  ;;  %3682 = vmatprep.subr.bf16.mxu1 %v3944_v57  ;;  %3704 = vmatprep.subr.bf16.mxu0 %v3945_v58  ;;  %v2080_v46 = vpack.c.bf16 %v2064_v41, %v2064_v41  ;;  %v3967_v57 = vld [vmem:[%s4190_s13 + $0x280] sm:$0xff]   ;;  %v3970_v62 = vld [vmem:[%s4190_s13 + $0x208] sm:$0xff]   ;;  %v3972_v0 = vld [vmem:[%s4190_s13 + $0x250] sm:$0xff]   ;;  %v2070_v33 = vmax.f32 %v4423_v53, 0.0 }
 0x6e7   : > { %v2069_v43 = vmax.f32 %v1933_v37, 0.0  ;;  %v2071_v44 = vmax.f32 %v1974_v39, 0.0  ;;  %v3971_v63 = vld [vmem:[%s4190_s13 + $0x288] sm:$0xff]   ;;  %v3976_v4 = vld [vmem:[%s4190_s13 + $0x258] sm:$0xff]   ;;  %v4005_v41 = vld [vmem:[%s4190_s13 + $0x3d0] sm:$0xff]  }
 0x6e8   : > { %v3977_v5 = vld [vmem:[%s4190_s13 + $0x2d8] sm:$0xff]   ;;  %v4001_v53 = vld [vmem:[%s4190_s13 + $0x3c8] sm:$0xff]  }
 0x6e9   : > { %3683 = vmatpush3.bf16.msra.mxu1 %v3946_v1  ;;  %3705 = vmatpush3.bf16.msra.mxu0 %v3947_v2  ;;  %v2085_v58 = vpack.c.bf16 %v2069_v43, %v2069_v43  ;;  %v2087_v61 = vpack.c.bf16 %v2071_v44, %v2071_v44  ;;  %v3973_v1 = vld [vmem:[%s4190_s13 + $0x2d0] sm:$0xff]   ;;  %v4002_v39 = vld [vmem:[%s4190_s13 + $0x308] sm:$0xff]   ;;  %v4009_v43 = vld [vmem:[%s4190_s13 + $0x3d8] sm:$0xff]  }
 0x6ea   : > { %3684 = vmatprep.subr.bf16.mxu1 %v3948_v6  ;;  %3706 = vmatprep.subr.bf16.mxu0 %v3949_v9  ;;  %v3974_v2 = vld [vmem:[%s4190_s13 + $0x210] sm:$0xff]   ;;  %v3978_v6 = vld [vmem:[%s4190_s13 + $0x218] sm:$0xff]  }
 0x6eb   : > { %v2012_v15 = vpop.f32.mrb[20].mxu1  ;;  %v2053_v16 = vpop.f32.mrb[20].mxu0  ;;  %v3979_v9 = vld [vmem:[%s4190_s13 + $0x298] sm:$0xff]  }
 0x6ec   : > { %v4435_v17 = vadd.f32 %v2012_v15, %v1540_v10  ;;  %v4438_v18 = vadd.f32 %v2053_v16, %v4378_v51  ;;  %v4440_v19 = vpop.f32.mrb[21].mxu1  ;;  %v4442_v20 = vpop.f32.mrb[21].mxu0  ;;  %v1516_v51 = vrot.slane %v4383_v54, %v1515_v49  ;;  %v3958_v49 = vld [vmem:[%s4190_s13 + $0x130] sm:$0xff]   ;;  %v3980_v10 = vld [vmem:[%s4190_s13 + $0x260] sm:$0xff]   ;;  %v3985_v15 = vld [vmem:[%s4190_s13 + $0x2e8] sm:$0xff]  }
 0x6ed   : > { %3685 = vmatpush3.bf16.msra.mxu1 %v3950_v11  ;;  %3707 = vmatpush3.bf16.msra.mxu0 %v3951_v12  ;;  %v2016_v21 = vpop.f32.mrb[22].mxu1  ;;  %v2057_v22 = vpop.f32.mrb[22].mxu0  ;;  %v3959_v54 = vld [vmem:[%s4190_s13 + $0x1b0] sm:$0xff]   ;;  %v3981_v11 = vld [vmem:[%s4190_s13 + $0x2e0] sm:$0xff]   ;;  %v3986_v16 = vld [vmem:[%s4190_s13 + $0x228] sm:$0xff]  }
 0x6ee   : > { %v2017_v28 = vpop.f32.mrb[23].mxu1  ;;  %v2058_v29 = vpop.f32.mrb[23].mxu0  ;;  %3686 = vmatprep.subr.bf16.mxu1 %v3952_v13  ;;  %3708 = vmatprep.subr.bf16.mxu0 %v3953_v14  ;;  %v1890_v35 = vadd.f32 %v4409_v26, %v1516_v51  ;;  %v3965_v26 = vld [vmem:[%s4190_s13 + $0x2c0] sm:$0xff]   ;;  %v3984_v14 = vld [vmem:[%s4190_s13 + $0x268] sm:$0xff]   ;;  %v3988_v22 = vld [vmem:[%s4190_s13 + $0x270] sm:$0xff]  }
 0x6ef   : > { %v3982_v12 = vld [vmem:[%s4190_s13 + $0x220] sm:$0xff]   ;;  %v3987_v21 = vld [vmem:[%s4190_s13 + $0x2a8] sm:$0xff]   ;;  %v3990_v51 = vld [vmem:[%s4190_s13 + $0x230] sm:$0xff]  }
 0x6f0   : > { %v2066_v42 = vmax.f32 %v1890_v35, 0.0  ;;  %v3983_v13 = vld [vmem:[%s4190_s13 + $0x2a0] sm:$0xff]   ;;  %v3991_v28 = vld [vmem:[%s4190_s13 + $0x2b0] sm:$0xff]   ;;  %v3992_v29 = vld [vmem:[%s4190_s13 + $0x278] sm:$0xff]   ;;  %v2086_v35 = vpack.c.bf16 %v2070_v33, %v2070_v33 }
 0x6f1   : > { %3687 = vmatpush3.bf16.msra.mxu1 %v3954_v23  ;;  %3709 = vmatpush3.bf16.msra.mxu0 %v3955_v24  ;;  %v3989_v23 = vld [vmem:[%s4190_s13 + $0x2f0] sm:$0xff]   ;;  %v1544_v24 = vrot.slane %v4373_v50, %v1511_v7  ;;  %v2056_v7 = vadd.f32 %v4442_v20, %v1552_v27  ;;  %v2068_v50 = vmax.f32 %v4421_v52, 0.0  ;;  %v3999_v52 = vld [vmem:[%s4190_s13 + $0x380] sm:$0xff]   ;;  %v4010_v44 = vld [vmem:[%s4190_s13 + $0x318] sm:$0xff]  }
 0x6f2   : > { %3688 = vmatprep.subr.bf16.mxu1 %v3956_v30  ;;  %3710 = vmatprep.subr.bf16.mxu0 %v3957_v31  ;;  %v2082_v47 = vpack.c.bf16 %v2066_v42, %v2066_v42  ;;  %v3993_v30 = vld [vmem:[%s4190_s13 + $0x2f8] sm:$0xff]   ;;  %v4006_v42 = vld [vmem:[%s4190_s13 + $0x310] sm:$0xff]  }
 0x6f3   : > { %v2015_v31 = vadd.f32 %v4440_v19, %v1544_v24  ;;  %v2075_v34 = vmax.f32 %v2056_v7, 0.0  ;;  %v3998_v19 = vld [vmem:[%s4190_s13 + $0x300] sm:$0xff]   ;;  %v2084_v20 = vpack.c.bf16 %v2068_v50, %v2068_v50 }
 0x6f5   : > { %3689 = vmatpush3.bf16.msra.mxu1 %v3958_v49  ;;  %3711 = vmatpush3.bf16.msra.mxu0 %v3959_v54  ;;  %v3997_v49 = vld [vmem:[%s4190_s13 + $0x3c0] sm:$0xff]   ;;  %v2073_v54 = vmax.f32 %v2015_v31, 0.0  ;;  %v2091_v37 = vpack.c.bf16 %v2075_v34, %v2075_v34 }
 0x6f6   : > { %3690 = vmatprep.subr.bf16.mxu1 %v3960_v36  ;;  %3712 = vmatprep.subr.bf16.mxu0 %v3961_v55  ;;  %v4000_v36 = vld [vmem:[%s4190_s13 + $0x348] sm:$0xff]  }
 0x6f7   : > { %v2089_v55 = vpack.c.bf16 %v2073_v54, %v2073_v54 }
 0x6f9   : > { %3691 = vmatpush3.bf16.msra.mxu1 %v3962_v56  ;;  %3713 = vmatpush3.bf16.msra.mxu0 %v3963_v40  ;;  %v4003_v56 = vld [vmem:[%s4190_s13 + $0x388] sm:$0xff]   ;;  %v4004_v40 = vld [vmem:[%s4190_s13 + $0x350] sm:$0xff]  }
 0x6fa   : > { %3720 = vmatprep.subr.bf16.mxu1 %v3964_v25  ;;  %3742 = vmatprep.subr.bf16.mxu0 %v3965_v26  ;;  %v4007_v25 = vld [vmem:[%s4190_s13 + $0x390] sm:$0xff]   ;;  %v4008_v26 = vld [vmem:[%s4190_s13 + $0x358] sm:$0xff]  }
 0x6fc   : > { %2979 = vmatmul.mubr.bf16.vlgmr.msra.gmra.mrb[28].mxu1 %v2080_v46  ;;  %3019 = vmatmul.mubr.bf16.vlgmr.msra.gmra.mrb[28].mxu0 %v2082_v47  ;;  %v4012_v46 = vld [vmem:[%s4190_s13 + $0x360] sm:$0xff]  }
 0x6fd   : > { %3721 = vmatpush3.bf16.msra.mxu1 %v3966_v45  ;;  %3058 = vmatprep.mubr.bf16.mxu1 %v2085_v58  ;;  %v4011_v45 = vld [vmem:[%s4190_s13 + $0x398] sm:$0xff]   ;;  %v4013_v47 = vld [vmem:[%s4190_s13 + $0x3e0] sm:$0xff]  }
 0x6fe   : > { %3743 = vmatpush3.bf16.msra.mxu0 %v3967_v57  ;;  %3098 = vmatprep.mubr.bf16.mxu0 %v2087_v61  ;;  %v4014_v57 = vld [vmem:[%s4190_s13 + $0x320] sm:$0xff]   ;;  %v4018_v61 = vld [vmem:[%s4190_s13 + $0x328] sm:$0xff]  }
 0x6ff   : > { %3722 = vmatprep.subr.bf16.mxu1 %v3968_v59  ;;  %3744 = vmatprep.subr.bf16.mxu0 %v3969_v60  ;;  %v4015_v58 = vld [vmem:[%s4190_s13 + $0x3a0] sm:$0xff]   ;;  %v4016_v59 = vld [vmem:[%s4190_s13 + $0x368] sm:$0xff]  }
 0x700   : > { %v4017_v60 = vld [vmem:[%s4190_s13 + $0x3e8] sm:$0xff]  }
 0x701   : > { %3723 = vmatpush3.bf16.msra.mxu1 %v3970_v62  ;;  %v4019_v62 = vld [vmem:[%s4190_s13 + $0x3a8] sm:$0xff]  }
 0x702   : > { %3745 = vmatpush3.bf16.msra.mxu0 %v3971_v63  ;;  %3724 = vmatprep.subr.bf16.mxu1 %v3972_v0  ;;  %v4020_v63 = vld [vmem:[%s4190_s13 + $0x370] sm:$0xff]  }
 0x703   : > { %3746 = vmatprep.subr.bf16.mxu0 %v3973_v1  ;;  %v4021_v0 = vld [vmem:[%s4190_s13 + $0x3f0] sm:$0xff]  }
 0x704   : > { %v4022_v1 = vld [vmem:[%s4190_s13 + $0x330] sm:$0xff]  }
 0x705   : > { %3725 = vmatpush3.bf16.msra.mxu1 %v3974_v2  ;;  %v4023_v2 = vld [vmem:[%s4190_s13 + $0x3b0] sm:$0xff]  }
 0x706   : > { %3747 = vmatpush3.bf16.msra.mxu0 %v3975_v3  ;;  %3726 = vmatprep.subr.bf16.mxu1 %v3976_v4  ;;  %v4024_v3 = vld [vmem:[%s4190_s13 + $0x378] sm:$0xff]  }
 0x707   : > { %3748 = vmatprep.subr.bf16.mxu0 %v3977_v5  ;;  %v4025_v4 = vld [vmem:[%s4190_s13 + $0x3f8] sm:$0xff]  }
 0x708   : > { %v4026_v5 = vld [vmem:[%s4190_s13 + $0x338] sm:$0xff]  }
 0x709   : > { %3727 = vmatpush3.bf16.msra.mxu1 %v3978_v6  ;;  %v2072_v6 = vmax.f32 %v4435_v17, 0.0 }
 0x70a   : > { %3749 = vmatpush3.bf16.msra.mxu0 %v3979_v9  ;;  %3728 = vmatprep.subr.bf16.mxu1 %v3980_v10  ;;  %v4027_v9 = vld [vmem:[%s4190_s13 + $0x3b8] sm:$0xff]   ;;  %v2074_v10 = vmax.f32 %v4438_v18, 0.0 }
 0x70b   : > { %3750 = vmatprep.subr.bf16.mxu0 %v3981_v11  ;;  %v2088_v11 = vpack.c.bf16 %v2072_v6, %v2072_v6 }
 0x70d   : > { %3729 = vmatpush3.bf16.msra.mxu1 %v3982_v12  ;;  %v2090_v12 = vpack.c.bf16 %v2074_v10, %v2074_v10 }
 0x70e   : > { %3751 = vmatpush3.bf16.msra.mxu0 %v3983_v13  ;;  %3730 = vmatprep.subr.bf16.mxu1 %v3984_v14 }
 0x70f   : > { %3752 = vmatprep.subr.bf16.mxu0 %v3985_v15  ;;  %v3469_v15 = vld [vmem:[%s651_s3] ss:$0 sm:$0xff] }
 0x711   : > { %3731 = vmatpush3.bf16.msra.mxu1 %v3986_v16 }
 0x712   : > { %3753 = vmatpush3.bf16.msra.mxu0 %v3987_v21  ;;  %3732 = vmatprep.subr.bf16.mxu1 %v3988_v22 }
 0x713   : > { %3754 = vmatprep.subr.bf16.mxu0 %v3989_v23 }
 0x715   : > { %3733 = vmatpush3.bf16.msra.mxu1 %v3990_v51 }
 0x716   : > { %3755 = vmatpush3.bf16.msra.mxu0 %v3991_v28  ;;  %3734 = vmatprep.subr.bf16.mxu1 %v3992_v29 }
 0x717   : > { %3756 = vmatprep.subr.bf16.mxu0 %v3993_v30 }
 0x719   : > { %3735 = vmatpush3.bf16.msra.mxu1 %v3994_v48 }
 0x71a   : > { %3757 = vmatpush3.bf16.msra.mxu0 %v3995_v8  ;;  %3764 = vmatprep.subr.bf16.mxu1 %v3996_v32 }
 0x71b   : > { %3786 = vmatprep.subr.bf16.mxu0 %v3997_v49 }
 0x71c   : > { %3059 = vmatmul.mubr.bf16.vlgmr.msra.gmra.mrb[32].mxu1 %v2084_v20 }
 0x71d   : > { %3099 = vmatmul.mubr.bf16.vlgmr.msra.gmra.mrb[32].mxu0 %v2086_v35  ;;  %3765 = vmatpush3.bf16.msra.mxu1 %v3998_v19 }
 0x71e   : > { %3138 = vmatprep.mubr.bf16.mxu1 %v2089_v55  ;;  %3787 = vmatpush3.bf16.msra.mxu0 %v3999_v52 }
 0x71f   : > { %3178 = vmatprep.mubr.bf16.mxu0 %v2091_v37  ;;  %3766 = vmatprep.subr.bf16.mxu1 %v4000_v36 }
 0x720   : > { %3788 = vmatprep.subr.bf16.mxu0 %v4001_v53 }
 0x721   : > { %3767 = vmatpush3.bf16.msra.mxu1 %v4002_v39 }
 0x722   : > { %3789 = vmatpush3.bf16.msra.mxu0 %v4003_v56  ;;  %3768 = vmatprep.subr.bf16.mxu1 %v4004_v40 }
 0x723   : > { %3790 = vmatprep.subr.bf16.mxu0 %v4005_v41 }
 0x725   : > { %3769 = vmatpush3.bf16.msra.mxu1 %v4006_v42 }
 0x726   : > { %3791 = vmatpush3.bf16.msra.mxu0 %v4007_v25  ;;  %3770 = vmatprep.subr.bf16.mxu1 %v4008_v26 }
 0x727   : > { %3792 = vmatprep.subr.bf16.mxu0 %v4009_v43 }
 0x729   : > { %3771 = vmatpush3.bf16.msra.mxu1 %v4010_v44 }
 0x72a   : > { %3793 = vmatpush3.bf16.msra.mxu0 %v4011_v45  ;;  %3772 = vmatprep.subr.bf16.mxu1 %v4012_v46 }
 0x72b   : > { %3794 = vmatprep.subr.bf16.mxu0 %v4013_v47 }
 0x72d   : > { %3773 = vmatpush3.bf16.msra.mxu1 %v4014_v57 }
 0x72e   : > { %3795 = vmatpush3.bf16.msra.mxu0 %v4015_v58  ;;  %3774 = vmatprep.subr.bf16.mxu1 %v4016_v59 }
 0x72f   : > { %3796 = vmatprep.subr.bf16.mxu0 %v4017_v60 }
 0x731   : > { %3775 = vmatpush3.bf16.msra.mxu1 %v4018_v61 }
 0x732   : > { %3797 = vmatpush3.bf16.msra.mxu0 %v4019_v62  ;;  %3776 = vmatprep.subr.bf16.mxu1 %v4020_v63 }
 0x733   : > { %3798 = vmatprep.subr.bf16.mxu0 %v4021_v0 }
 0x735   : > { %3777 = vmatpush3.bf16.msra.mxu1 %v4022_v1 }
 0x736   : > { %3799 = vmatpush3.bf16.msra.mxu0 %v4023_v2  ;;  %3778 = vmatprep.subr.bf16.mxu1 %v4024_v3 }
 0x737   : > { %3800 = vmatprep.subr.bf16.mxu0 %v4025_v4 }
 0x739   : > { %3779 = vmatpush3.bf16.msra.mxu1 %v4026_v5 }
 0x73a   : > { %3801 = vmatpush3.bf16.msra.mxu0 %v4027_v9 }
 0x73c   : > { %3139 = vmatmul.mubr.bf16.vlgmr.msra.gmra.mrb[36].mxu1 %v2088_v11  ;;  %v3599_v11 = vld [vmem:[%s657_s17] ss:$0 sm:$0xff]  ;;  %s4609_s17 = sld [smem:[#allocation8_spill]] (!%p3600_p5) }
 0x73d   : > { %3179 = vmatmul.mubr.bf16.vlgmr.msra.gmra.mrb[36].mxu0 %v2090_v12 }
 0x7af   : > { %v3648_v13 = vpop.f32.mrb[24].mxu1  ;;  %v3670_v14 = vpop.f32.mrb[24].mxu0 }
 0x7b0   : > { %v3649_v17 = vpop.f32.mrb[25].mxu1  ;;  %v3671_v16 = vpop.f32.mrb[25].mxu0 }
 0x7b1   : > { %v3650_v21 = vadd.f32 %v3649_v17, %v3648_v13  ;;  %v3672_v22 = vadd.f32 %v3671_v16, %v3670_v14  ;;  %v3651_v23 = vpop.f32.mrb[26].mxu1  ;;  %v3673_v18 = vpop.f32.mrb[26].mxu0 }
 0x7b2   : > { %v3652_v24 = vpop.f32.mrb[27].mxu1  ;;  %v3674_v27 = vpop.f32.mrb[27].mxu0 }
 0x7b3   : > { %v2901_v51 = vadd.f32 %v3650_v21, %v3469_v15 }
 0x7b5   : > { %v2941_v28 = vadd.f32 %v3672_v22, %v2901_v51  ;;  %v3601_v51 = vld [vmem:[%s4609_s17] ss:$0 sm:$0xff] (!%p3600_p5) }
 0x7cf   : > { %v3692_v29 = vpop.f32.mrb[28].mxu1  ;;  %v3714_v30 = vpop.f32.mrb[28].mxu0 }
 0x7d0   : > { %v3693_v31 = vpop.f32.mrb[29].mxu1  ;;  %v3715_v7 = vpop.f32.mrb[29].mxu0 }
 0x7d1   : > { %v3694_v48 = vadd.f32 %v3693_v31, %v3692_v29  ;;  %v3716_v50 = vadd.f32 %v3715_v7, %v3714_v30  ;;  %v3695_v8 = vpop.f32.mrb[30].mxu1  ;;  %v3717_v32 = vpop.f32.mrb[30].mxu0  ;;  %v3602_v29 = vld [vmem:[%s4610_s16] ss:$0 sm:$0xff] (!%p3600_p5) }
 0x7d2   : > { %v3696_v33 = vpop.f32.mrb[31].mxu1  ;;  %v3718_v49 = vpop.f32.mrb[31].mxu0 }
 0x7d3   : > { %v2981_v54 = vadd.f32 %v3694_v48, %v2941_v28 }
 0x7d5   : > { %v3021_v34 = vadd.f32 %v3716_v50, %v2981_v54 }
 0x7ef   : > { %v3736_v19 = vpop.f32.mrb[32].mxu1 }
 0x7f0   : > { %v3758_v20 = vpop.f32.mrb[32].mxu0  ;;  %v3737_v52 = vpop.f32.mrb[33].mxu1 }
 0x7f1   : > { %v3738_v35 = vadd.f32 %v3737_v52, %v3736_v19  ;;  %v3759_v36 = vpop.f32.mrb[33].mxu0  ;;  %v3739_v55 = vpop.f32.mrb[34].mxu1 }
 0x7f2   : > { %v3760_v53 = vadd.f32 %v3759_v36, %v3758_v20  ;;  %v3761_v37 = vpop.f32.mrb[34].mxu0  ;;  %v3740_v39 = vpop.f32.mrb[35].mxu1 }
 0x7f3   : > { %v3061_v56 = vadd.f32 %v3738_v35, %v3021_v34  ;;  %v3762_v40 = vpop.f32.mrb[35].mxu0 }
 0x7f5   : > { %v3101_v41 = vadd.f32 %v3760_v53, %v3061_v56 }
 0x80f   : > { %v3780_v42 = vpop.f32.mrb[36].mxu1 }
 0x810   : > { %v3802_v25 = vpop.f32.mrb[36].mxu0  ;;  %v3781_v26 = vpop.f32.mrb[37].mxu1 }
 0x811   : > { %v3782_v43 = vadd.f32 %v3781_v26, %v3780_v42  ;;  %v3803_v44 = vpop.f32.mrb[37].mxu0  ;;  %v3783_v45 = vpop.f32.mrb[38].mxu1 }
 0x812   : > { %v3804_v46 = vadd.f32 %v3803_v44, %v3802_v25  ;;  %v3805_v47 = vpop.f32.mrb[38].mxu0  ;;  %v3784_v57 = vpop.f32.mrb[39].mxu1 }
 0x813   : > { %v3141_v58 = vadd.f32 %v3782_v43, %v3101_v41  ;;  %v3806_v59 = vpop.f32.mrb[39].mxu0 }
 0x815   : > { %v3181_v60 = vadd.f32 %v3804_v46, %v3141_v58 }
 0x817   : > { %v3188_v61 = vadd.f32 %v3181_v60, %v4291_v38  ;;  %v3598_v38 = vld [vmem:[%s654_s27] ss:$0 sm:$0xff] }
 0x819   : > { %v3189_v62 = vsel %vm678_vm2, %v3188_v61, 0.0 }
 0x81a   : > { %3190 = vadd.xlane.f32.xlu0 %v3189_v62 }
 0x8a7   : > { %v3191_v63 = vpop.xlane.xlu0 %3190 }
 0x8a8   : > { %v3192_v0 = vmul.f32 0.03125, %v3191_v63 }
 0x8aa   : > { %v3193_v1 = vsub.f32 %v3188_v61, %v3192_v0 }
 0x8ac   : > { %v3194_v2 = vmul.f32 %v3193_v1, %v3193_v1 }
 0x8ae   : > { %v3195_v3 = vsel %vm678_vm2, %v3194_v2, 0.0 }
 0x8af   : > { %3196 = vadd.xlane.f32.xlu1 %v3195_v3 }
 0x93c   : > { %v3197_v4 = vpop.xlane.xlu1 %3196 }
 0x93d   : > { %v3198_v5 = vmul.f32 0.03125, %v3197_v4 }
 0x93f   : > { %v3199_v6 = vadd.f32 1e-05, %v3198_v5 }
 0x941   : > { %4034 = vrsqrt.f32 %v3199_v6 }
 0x94b   : > { %v4035_v9 = vpop.eup %4034 }
 0x94c   : > { %v3201_v10 = vmul.f32 %v4035_v9, %v3193_v1  ;;  %3220 = sbr.rel (%p3600_p5) target bundleno = 2700 (0xa8c), region = 88 }
 0x94e   : > { %v3208_v12 = vmul.f32 %v3598_v38, %v3201_v10 }
 0x950   : > { %v3215_v13 = vadd.f32 %v3599_v11, %v3208_v12 }
 0x952   : > { %3216 = vst.msk [vmem:[#allocation2] sm:$0xff] %vm678_vm2, %v3215_v13  ;;  %v3223_v14 = vsel (!%p3600_p5), %vm678_vm2, %v3215_v13, 0.0 }
 0x953   : > { %3224 = vadd.xlane.f32.xlu0 %v3223_v14 }
 0x9e0   : > { %v3225_v15 = vpop.xlane.xlu0 %3224 }
 0x9e1   : > { %v3226_v17 = vmul.f32 0.03125, %v3225_v15 }
 0x9e3   : > { %v3227_v16 = vsub.f32 %v3215_v13, %v3226_v17 }
 0x9e5   : > { %v3228_v21 = vmul.f32 %v3227_v16, %v3227_v16 }
 0x9e7   : > { %v3229_v22 = vsel %vm678_vm2, %v3228_v21, 0.0 }
 0x9e8   : > { %3230 = vadd.xlane.f32.xlu0 %v3229_v22 }
 0xa75   : > { %v3231_v23 = vpop.xlane.xlu0 %3230 }
 0xa76   : > { %v3232_v18 = vmul.f32 0.03125, %v3231_v23 }
 0xa78   : > { %v3233_v24 = vadd.f32 1e-05, %v3232_v18 }
 0xa7a   : > { %4036 = vrsqrt.f32 %v3233_v24 }
 0xa84   : > { %v4037_v27 = vpop.eup %4036 }
 0xa85   : > { %v3235_v28 = vmul.f32 %v4037_v27, %v3227_v16 }
 0xa87   : > { %v3242_v30 = vmul.f32 %v3601_v51, %v3235_v28 }
 0xa89   : > { %v3249_v31 = vadd.f32 %v3602_v29, %v3242_v30 }
 0xa8b   : > { %3250 = vst.msk [vmem:[%s4611_s14] sm:$0xff] %vm678_vm2, %v3249_v31 }
 0xa8c PF: > { %s4612_s26 = sld [smem:[#allocation3_spill]] }
 0xa92   : > { %s25_s18 = sadd.s32 1, %s4612_s26  }
 0xa93   : > { %p22_p6 = scmp.ge.s32.totalorder %s25_s18, 8  }
 0xa95   :  { %24 = sbr.rel (!%p22_p6) target bundleno = 8 (0x8), region = 151 }

// kernel: transformer_crf_forward.4
= control target key start
LH: loop header
LB: loop body
LE: loop exit
PB: predicated region body
PF: predicated region fallthrough
CT: control target
= control target key end

     0   :  { %s5477_s27 = smov 0   ;;  %s6059_s0 = inlined_call_operand.vmem [shape: f32[8,32], index: 0, kind: input, shape index: {}]   ;;  %s6060_s1 = inlined_call_operand.vmem [shape: f32[8,32], index: 1, kind: input, shape index: {}]   ;;  %s6061_s2 = inlined_call_operand.vmem [shape: f32[6,3,32,32], index: 2, kind: input, shape index: {}]   ;;  %s6062_s3 = inlined_call_operand.vmem [shape: f32[6,3,1,32], index: 3, kind: input, shape index: {}]   ;;  %s6063_s4 = inlined_call_operand.vmem [shape: f32[6,32,32], index: 4, kind: input, shape index: {}]   ;;  %s6064_s5 = inlined_call_operand.vmem [shape: f32[6,1,32], index: 5, kind: input, shape index: {}]   ;;  %s6065_s6 = inlined_call_operand.vmem [shape: f32[6,1,32], index: 6, kind: input, shape index: {}]   ;;  %s6066_s7 = inlined_call_operand.vmem [shape: f32[6,1,32], index: 7, kind: input, shape index: {}]   ;;  %s6067_s8 = inlined_call_operand.vmem [shape: f32[6,32,32], index: 8, kind: input, shape index: {}]   ;;  %s6068_s9 = inlined_call_operand.vmem [shape: f32[6,1,32], index: 9, kind: input, shape index: {}]   ;;  %s6069_s10 = inlined_call_operand.vmem [shape: f32[6,2,32,32], index: 10, kind: input, shape index: {}]   ;;  %s6070_s11 = inlined_call_operand.vmem [shape: f32[6,2,1,32], index: 11, kind: input, shape index: {}]   ;;  %s6071_s12 = inlined_call_operand.vmem [shape: f32[6,32,32], index: 12, kind: input, shape index: {}]   ;;  %s6072_s13 = inlined_call_operand.vmem [shape: f32[6,1,32], index: 13, kind: input, shape index: {}]   ;;  %s6073_s14 = inlined_call_operand.vmem [shape: f32[6,1,32], index: 14, kind: input, shape index: {}]   ;;  %s6074_s15 = inlined_call_operand.vmem [shape: f32[6,1,32], index: 15, kind: input, shape index: {}]   ;;  %s6075_s16 = inlined_call_operand.vmem [shape: bf16[6,32,2048], index: 16, kind: input, shape index: {}]   ;;  %s6076_s17 = inlined_call_operand.vmem [shape: f32[6,1,2048], index: 17, kind: input, shape index: {}]   ;;  %s6077_s18 = inlined_call_operand.vmem [shape: bf16[6,2048,32], index: 18, kind: input, shape index: {}]   ;;  %s6078_s19 = inlined_call_operand.vmem [shape: f32[6,1,32], index: 19, kind: input, shape index: {}]   ;;  %s6079_s20 = inlined_call_operand.vmem [shape: f32[6,1,32], index: 20, kind: input, shape index: {}]   ;;  %s6080_s21 = inlined_call_operand.vmem [shape: f32[6,1,32], index: 21, kind: input, shape index: {}]   ;;  %s6081_s22 = inlined_call_operand.vmem [shape: f32[1,32], index: 22, kind: input, shape index: {}]   ;;  %s6082_s23 = inlined_call_operand.vmem [shape: f32[1,32], index: 23, kind: input, shape index: {}]   ;;  %s6083_s24 = inlined_call_operand.vmem [shape: f32[32,5], index: 24, kind: input, shape index: {}]   ;;  %s6084_s25 = inlined_call_operand.vmem [shape: f32[1,5], index: 25, kind: input, shape index: {}]   ;;  %s6085_s26 = inlined_call_operand.vmem [shape: f32[8,5], index: 26, kind: output, shape index: {}]  }
   0x1   :  { %6091 = sst [smem:[#allocation7_spill]] %s6059_s0 }
   0x2   :  { %6092 = sst [smem:[#allocation8_spill]] %s6060_s1 }
   0x3   :  { %6093 = sst [smem:[#allocation9_spill]] %s6061_s2 }
   0x4   :  { %6094 = sst [smem:[#allocation10_spill]] %s6062_s3 }
   0x5   :  { %6095 = sst [smem:[#allocation11_spill]] %s6063_s4 }
   0x6   :  { %6096 = sst [smem:[#allocation12_spill]] %s6064_s5 }
   0x7   :  { %6097 = sst [smem:[#allocation13_spill]] %s6065_s6 }
   0x8   :  { %6098 = sst [smem:[#allocation14_spill]] %s6066_s7 }
   0x9   :  { %6099 = sst [smem:[#allocation15_spill]] %s6067_s8 }
   0xa   :  { %6100 = sst [smem:[#allocation16_spill]] %s6068_s9 }
   0xb   :  { %6101 = sst [smem:[#allocation17_spill]] %s6069_s10 }
   0xc   :  { %6102 = sst [smem:[#allocation18_spill]] %s6070_s11 }
   0xd   :  { %6103 = sst [smem:[#allocation19_spill]] %s6071_s12 }
   0xe   :  { %6104 = sst [smem:[#allocation20_spill]] %s6075_s16 }
   0xf   :  { %6105 = sst [smem:[#allocation21_spill]] %s6076_s17 }
  0x10   :  { %6106 = sst [smem:[#allocation22_spill]] %s6079_s20 }
  0x11   :  { %6107 = sst [smem:[#allocation23_spill]] %s6080_s21 }
  0x12   :  { %6108 = sst [smem:[#allocation24_spill]] %s6081_s22 }
  0x13   :  { %6109 = sst [smem:[#allocation25_spill]] %s6082_s23 }
  0x14   :  { %6110 = sst [smem:[#allocation26_spill]] %s6083_s24 }
  0x15   :  { %6111 = sst [smem:[#allocation27_spill]] %s6084_s25 }
  0x16   :  { %6112 = sst [smem:[#allocation28_spill]] %s6085_s26 }
  0x17 LB: > { %6113 = sst [smem:[#allocation3_spill]] %s5333_s27  ;;  %s5483_s3 = sadd.s32 4294967295, %s5333_s27   ;;  %s5333_s27 = sphi %s5477_s27, %s36_s27  }
  0x18   : > { %6114 = sst [smem:[#allocation4_spill]] %s5483_s3  ;;  %p4522_p0 = scmp.ge.s32.totalorder %s5333_s27, 1 }
  0x19   : > { %p874_p1 = scmp.lt.s32.totalorder %s5333_s27, 7 }
  0x1b   : > { %p875_p2 = pnand %p4522_p0, %p874_p1 }
  0x1d   : > { %878 = sbr.rel (%p875_p2) target bundleno = 4435 (0x1153), region = 124 }
  0x24   : > { %p1011_p3 = scmp.lt.s32.totalorder %s5483_s3, 5  ;;  %s6115_s9 = sld [smem:[#allocation11_spill]] }
  0x25   : > { %s6117_s10 = sld [smem:[#allocation9_spill]]  ;;  %s6120_s24 = sld [smem:[#allocation10_spill]] }
  0x26   : > { %s5489_s7 = scalar_select %p1011_p3, %s5483_s3, 5 }
  0x27   : > { %s6125_s0 = sld [smem:[#allocation17_spill]]  ;;  %s6126_s11 = sld [smem:[#allocation18_spill]] }
  0x28   : > { %s5166_s28 = smul.u32 96, %s5489_s7  ;;  %s4758_s8 = sshll.u32 %s5489_s7, 5 }
  0x29   : > { %s5167_s4 = smul.u32 3, %s5489_s7  ;;  %s4530_s20 = sshll.u32 %s5489_s7, 1 }
  0x2a   : > { %s5497_s30 = scalar_lea.vmem %s6115_s9, %s4758_s8  ;;  %s6127_s12 = sld [smem:[#allocation19_spill]] }
  0x2b   : > { %6116 = sst [smem:[#allocation5_spill]] %s5497_s30  ;;  %s5502_s6 = scalar_lea.vmem %s6117_s10, %s5166_s28 }
  0x2c   : > { %6118 = sst [smem:[#allocation6_spill]] %s5502_s6  ;;  %s5511_s3 = scalar_lea.vmem %s6120_s24, %s5167_s4 }
  0x2d   : > { %s6123_s6 = sld [smem:[#allocation15_spill]]  ;;  %s4760_s24 = sshll.u32 %s5489_s7, 6 }
  0x2e   : > { %s5534_s9 = scalar_lea.vmem %s6125_s0, %s4760_s24  ;;  %s5540_s5 = scalar_lea.vmem %s6126_s11, %s4530_s20 }
  0x2f   : > { %s4762_s21 = sshll.u32 %s5489_s7, 8  ;;  %s6128_s16 = sld [smem:[#allocation20_spill]] }
  0x30   : > { %s5545_s26 = scalar_lea.vmem %s6127_s12, %s4758_s8  ;;  %s6129_s17 = sld [smem:[#allocation21_spill]] }
  0x31   : > { %s4763_s22 = sshll.u32 %s5489_s7, 10  ;;  %s1081_s30 = scalar_lea.vmem %s6078_s19, %s5489_s7 }
  0x32   : > { %s5575_s4 = scalar_lea.vmem %s6077_s18, %s4763_s22 }
  0x33   : > { %s5524_s27 = scalar_lea.vmem %s6123_s6, %s4758_s8  ;;  %s4535_s8 = sshll.u32 %s5489_s7, 4 }
  0x35   : > { %s5563_s25 = scalar_lea.vmem %s6128_s16, %s4762_s21  ;;  %s6130_s21 = sld [smem:[#allocation22_spill]] }
  0x36   : > { %s5569_s1 = scalar_lea.vmem %s6129_s17, %s4535_s8  ;;  %s6131_s16 = sld [smem:[#allocation23_spill]] }
  0x37   : > { %s6132_s8 = sld [smem:[#allocation4_spill]] }
  0x3b   : > { %s1084_s2 = scalar_lea.vmem %s6130_s21, %s5489_s7 }
  0x3c   : > { %s1087_s6 = scalar_lea.vmem %s6131_s16, %s5489_s7 }
  0x3d   : > { %p4538_p4 = scmp.ne.s32.totalorder %s6132_s8, 0 }
  0x3e   : > { %s6133_s23 = sld [smem:[#allocation7_spill]] (!%p4538_p4)  ;;  %vm1094_vm0 = vcmask (!%p4538_p4), 261120  }
  0x3f   : > { %1092 = sbr.rel (%p4538_p4) target bundleno = 70 (0x46), region = 128 }
  0x44   : > { %v1093_v0 = vld [vmem:[%s6133_s23] sm:$0xff] (!%p4538_p4) }
  0x45   : > { %1095 = vst.msk [vmem:[#allocation2] sm:$0xff] (!%p4538_p4), %vm1094_vm0, %v1093_v0 }
  0x46 PF: > { %s6134_s22 = sld [smem:[#allocation6_spill]]  ;;  %v5335_v4 = vmov 0.0|0.0   ;;  %vm5336_vm1 = vmmov 0   ;;  %v5337_v10 = vmov 0.0   ;;  %vm1109_vm2 = vcmask 261120   ;;  %s6135_s11 = sld [smem:[#allocation5_spill]] }
  0x47   : > { %5118 = vmatprep.subr.bf16.mxu1 %v5335_v4  ;;  %5112 = vmatprep.subr.bf16.mxu0 %v5335_v4  ;;  %v4546_v16 = vld [vmem:[%s5511_s3 + $0x1] ss:$0 sm:$0xff]  ;;  %v4539_v17 = vld [vmem:[%s5511_s3] ss:$0 sm:$0xff]  ;;  %vm1431_vm3 = vcmask 64512   ;;  %s6136_s17 = sld [smem:[#allocation12_spill]]  ;;  %s6146_s28 = scalar_lea.vmem %s6073_s14, %s5489_s7 }
  0x48   : > { %5012 = vmatprep.mubr.msk.f32.mxu1 %vm5336_vm1, %v5337_v10  ;;  %5001 = vmatprep.mubr.msk.f32.mxu0 %vm5336_vm1, %v5337_v10  ;;  %v4553_v40 = vld [vmem:[%s5511_s3 + $0x2] ss:$0 sm:$0xff]  ;;  %s6138_s29 = sld [smem:[#allocation8_spill]]  ;;  %s6139_s20 = sld [smem:[#allocation13_spill]] }
  0x49   : > { %s6141_s23 = sld [smem:[#allocation14_spill]]  ;;  %s6143_s12 = sld [smem:[#allocation16_spill]] }
  0x4a   : > { %s6147_s0 = scalar_lea.vmem %s6074_s15, %s5489_s7 }
  0x4c   : > { %v4541_v1 = vld [vmem:[%s6134_s22 + $0x20] sm:$0xff]  ;;  %v4542_v2 = vld [vmem:[%s6134_s22 + $0x28] sm:$0xff]  ;;  %v4543_v7 = vld [vmem:[%s6134_s22 + $0x30] sm:$0xff] }
  0x4d   : > { %v1098_v3 = vld [vmem:[%s6134_s22] sm:$0xff]  ;;  %v5119_v5 = vpack.c.bf16 %v4542_v2, %v4541_v1  ;;  %v1099_v6 = vld [vmem:[%s6134_s22 + $0x8] sm:$0xff]  ;;  %v4544_v8 = vld [vmem:[%s6134_s22 + $0x38] sm:$0xff]  ;;  %s6137_s3 = scalar_lea.vmem %s6136_s17, %s5489_s7 }
  0x4e   : > { %v5113_v9 = vpack.c.bf16 %v1099_v6, %v1098_v3  ;;  %v1100_v11 = vld [vmem:[%s6134_s22 + $0x10] sm:$0xff]  ;;  %v1101_v12 = vld [vmem:[%s6134_s22 + $0x18] sm:$0xff]  ;;  %v5122_v13 = vpack.c.bf16 %v4544_v8, %v4543_v7  ;;  %v5609_v15 = vld [vmem:[#allocation2] sm:$0xff]  ;;  %s6140_s21 = scalar_lea.vmem %s6139_s20, %s5489_s7 }
  0x4f   : > { %5120 = vmatpush3.bf16.msra.mxu1 %v5119_v5  ;;  %v5116_v14 = vpack.c.bf16 %v1101_v12, %v1100_v11  ;;  %v4548_v24 = vld [vmem:[%s6134_s22 + $0x40] sm:$0xff]  ;;  %v4549_v25 = vld [vmem:[%s6134_s22 + $0x48] sm:$0xff]  ;;  %v4550_v26 = vld [vmem:[%s6134_s22 + $0x50] sm:$0xff]  ;;  %s6144_s16 = scalar_lea.vmem %s6143_s12, %s5489_s7 }
  0x50   : > { %5114 = vmatpush3.bf16.msra.mxu0 %v5113_v9  ;;  %5121 = vmatprep.subr.bf16.mxu1 %v5335_v4  ;;  %v5125_v27 = vpack.c.bf16 %v4549_v25, %v4548_v24  ;;  %v4551_v28 = vld [vmem:[%s6134_s22 + $0x58] sm:$0xff]  ;;  %v1349_v43 = vld [vmem:[%s6135_s11] sm:$0xff]  ;;  %v1350_v44 = vld [vmem:[%s6135_s11 + $0x8] sm:$0xff]  ;;  %s6142_s22 = scalar_lea.vmem %s6141_s23, %s5489_s7  ;;  %s6150_s23 = sld [smem:[#allocation4_spill]] }
  0x51   : > { %5115 = vmatprep.subr.bf16.mxu0 %v5335_v4  ;;  %v5128_v29 = vpack.c.bf16 %v4551_v28, %v4550_v26  ;;  %v1351_v45 = vld [vmem:[%s6135_s11 + $0x10] sm:$0xff]  ;;  %v5131_v46 = vpack.c.bf16 %v1350_v44, %v1349_v43  ;;  %v1352_v47 = vld [vmem:[%s6135_s11 + $0x18] sm:$0xff]  ;;  %v4558_v54 = vld [vmem:[%s6137_s3] ss:$0 sm:$0xff] }
  0x52   : > { %v5134_v48 = vpack.c.bf16 %v1352_v47, %v1351_v45  ;;  %v1710_v1 = vld [vmem:[%s5534_s9] sm:$0xff]  ;;  %v1711_v2 = vld [vmem:[%s5534_s9 + $0x8] sm:$0xff]  ;;  %v1712_v7 = vld [vmem:[%s5534_s9 + $0x10] sm:$0xff] }
  0x53   : > { %5123 = vmatpush3.bf16.msra.mxu1 %v5122_v13  ;;  %v5143_v3 = vpack.c.bf16 %v1711_v2, %v1710_v1  ;;  %v1626_v5 = vld [vmem:[%s5524_s27] sm:$0xff]  ;;  %v1627_v6 = vld [vmem:[%s5524_s27 + $0x8] sm:$0xff]  ;;  %v1713_v9 = vld [vmem:[%s5534_s9 + $0x18] sm:$0xff] }
  0x54   : > { %5117 = vmatpush3.bf16.msra.mxu0 %v5116_v14  ;;  %5026 = vmatprep.subr.mxu1 %v5337_v10  ;;  %v5137_v8 = vpack.c.bf16 %v1627_v6, %v1626_v5  ;;  %v5146_v11 = vpack.c.bf16 %v1713_v9, %v1712_v7  ;;  %v1097_v12 = vld [vmem:[%s6138_s29] sm:$0xff]  ;;  %v1628_v13 = vld [vmem:[%s5524_s27 + $0x10] sm:$0xff]  ;;  %v1629_v14 = vld [vmem:[%s5524_s27 + $0x18] sm:$0xff] }
  0x55   : > { %5124 = vmatprep.subr.bf16.mxu0 %v5335_v4  ;;  %v4561_v24 = vld [vmem:[%s6142_s22] ss:$0 sm:$0xff]  ;;  %v4568_v28 = vld [vmem:[%s5534_s9 + $0x30] sm:$0xff] }
  0x56   : > { %5013 = vmatmul.mubr.msk.f32.vlgmr.msra.gmra.mrb[0].mxu1 %vm1109_vm2, %v5609_v15  ;;  %v2152_v9 = vld [vmem:[%s5563_s25] sm:$0xff]  ;;  %p4751_p5 = scmp.ne.s32.totalorder %s6150_s23, 5 }
  0x57   : > { %5002 = vmatmul.mubr.msk.f32.vlgmr.msra.gmra.mrb[0].mxu0 %vm1109_vm2, %v5609_v15  ;;  %5028 = vmatprep.mubr.msk.f32.mxu1 %vm5336_vm1, %v5337_v10  ;;  %vm5340_vm4 = vmmov (!%p4751_p5), 0   ;;  %s6152_s3 = sld [smem:[#allocation24_spill]] (!%p4751_p5)  ;;  %s6153_s29 = sld [smem:[#allocation25_spill]] (!%p4751_p5)  ;;  %vm4291_vm5 = vcmask (!%p4751_p5), 39936  }
  0x58   : > { %5023 = vmatprep.mubr.msk.f32.mxu0 %vm5336_vm1, %v5337_v10  ;;  %5126 = vmatpush3.bf16.msra.mxu0 %v5125_v27 }
  0x59   : > { %5127 = vmatprep.subr.bf16.mxu0 %v5335_v4 }
  0x5c   : > { %5129 = vmatpush3.bf16.msra.mxu0 %v5128_v29  ;;  %v4569_v29 = vld [vmem:[%s5534_s9 + $0x38] sm:$0xff] }
  0x5d   : > { %5130 = vmatprep.subr.bf16.mxu0 %v5335_v4 }
  0x5f   : > { %5024 = vmatmul.mubr.msk.f32.vlgmr.msra.gmra.mrb[2].mxu0 %vm1109_vm2, %v5609_v15 }
  0x60   : > { %5044 = vmatprep.mubr.msk.f32.mxu0 %vm5336_vm1, %v5337_v10  ;;  %5132 = vmatpush3.bf16.msra.mxu0 %v5131_v46 }
  0x61   : > { %5133 = vmatprep.subr.bf16.mxu0 %v5335_v4 }
  0x64   : > { %5135 = vmatpush3.bf16.msra.mxu0 %v5134_v48 }
  0x65   : > { %5142 = vmatprep.subr.bf16.mxu0 %v5335_v4 }
 0x129   : > { %v1262_v18 = vpop.f32.mrb[0].mxu1 }
 0x12a   : > { %v1263_v19 = vadd.f32 %v4546_v16, %v1262_v18  ;;  %v5014_v20 = vpop.f32.mrb[1].mxu1  ;;  %v1179_v21 = vpop.f32.mrb[0].mxu0 }
 0x12b   : > { %v1180_v22 = vadd.f32 %v4539_v17, %v1179_v21  ;;  %v5003_v23 = vpop.f32.mrb[1].mxu0  ;;  %v4560_v20 = vld [vmem:[%s6140_s21] ss:$0 sm:$0xff] }
 0x12c   : > { %5027 = vmatpush3.xpose.msk.msra.mxu1 %vm1109_vm2, %v1263_v19  ;;  %v4567_v23 = vld [vmem:[%s5534_s9 + $0x28] sm:$0xff] }
 0x12d   : > { %5031 = vmatprep.subr.mxu1 %v5337_v10 }
 0x12f   : > { %5029 = vmatmul.mubr.msk.f32.vlgmr.msra.gmra.mrb[2].mxu1 %vm1109_vm2, %v1180_v22  ;;  %v4566_v22 = vld [vmem:[%s5534_s9 + $0x20] sm:$0xff] }
 0x130   : > { %5033 = vmatprep.mubr.msk.f32.mxu1 %vm5336_vm1, %v5337_v10  ;;  %v5149_v26 = vpack.c.bf16 %v4567_v23, %v4566_v22  ;;  %v2177_v22 = vld [vmem:[%s5563_s25 + $0xc8] sm:$0xff] }
 0x132   : > { %v1345_v39 = vpop.f32.mrb[2].mxu0 }
 0x133   : > { %v5025_v41 = vpop.f32.mrb[3].mxu0  ;;  %v1346_v42 = vadd.f32 %v4553_v40, %v1345_v39  ;;  %v4571_v39 = vld [vmem:[%s5540_s5 + $0x1] ss:$0 sm:$0xff] }
 0x135   : > { %5032 = vmatpush3.msra.mxu1 %v1346_v42 }
 0x136   : > { %5136 = vmatprep.subr.bf16.mxu1 %v5335_v4 }
 0x202   : > { %v1426_v30 = vpop.f32.mrb[2].mxu1 }
 0x203   : > { %v1430_v31 = vmul.f32 0.17677669, %v1426_v30  ;;  %v5030_v32 = vpop.f32.mrb[3].mxu1  ;;  %v5152_v30 = vpack.c.bf16 %v4569_v29, %v4568_v28  ;;  %v2155_v28 = vld [vmem:[%s5563_s25 + $0x18] sm:$0xff] }
 0x205   : > { %v1432_v33 = vsel %vm1431_vm3, %v1430_v31, -inf }
 0x206   : > { %1433 = vmax.xlane.f32.xlu0 %v1432_v33 }
 0x293   : > { %v1434_v34 = vpop.xlane.xlu0 %1433 }
 0x294   : > { %v1435_v35 = vsub.f32 %v1430_v31, %v1434_v34  ;;  %v4564_v31 = vld [vmem:[%s5540_s5] ss:$0 sm:$0xff] }
 0x296   : > { %v1436_v36 = vmul.f32 1.442695, %v1435_v35  ;;  %v4562_v35 = vld [vmem:[%s6144_s16] ss:$0 sm:$0xff] }
 0x298   : > { %5311 = vpow2.f32 %v1436_v36 }
 0x2a2   : > { %v5312_v37 = vpop.eup %5311 }
 0x2a3   : > { %v1438_v38 = vsel %vm1431_vm3, %v5312_v37, 0.0 }
 0x2a4   : > { %1439 = vadd.xlane.f32.xlu0 %v1438_v38 }
 0x331   : > { %v1440_v49 = vpop.xlane.xlu0 %1439 }
 0x332   : > { %5313 = vrcp.f32 %v1440_v49 }
 0x33c   : > { %v5314_v50 = vpop.eup %5313 }
 0x33d   : > { %v1442_v51 = vmul.f32 %v5314_v50, %v5312_v37 }
 0x33f   : > { %5034 = vmatmul.mubr.msk.f32.vlgmr.msra.gmra.mrb[4].mxu1 %vm1431_vm3, %v1442_v51  ;;  %v1877_v51 = vld [vmem:[%s5545_s26] sm:$0xff] }
 0x340   : > { %5055 = vmatprep.mubr.msk.f32.mxu1 %vm5336_vm1, %v5337_v10  ;;  %5138 = vmatpush3.bf16.msra.mxu1 %v5137_v8 }
 0x341   : > { %5139 = vmatprep.subr.bf16.mxu1 %v5335_v4 }
 0x412   : > { %v1512_v52 = vpop.f32.mrb[4].mxu1 }
 0x413   : > { %v5035_v53 = vpop.f32.mrb[5].mxu1  ;;  %5045 = vmatmul.mubr.msk.f32.vlgmr.msra.gmra.mrb[4].mxu0 %vm1109_vm2, %v1512_v52  ;;  %v1878_v52 = vld [vmem:[%s5545_s26 + $0x8] sm:$0xff] }
 0x414   : > { %5066 = vmatprep.mubr.msk.f32.mxu0 %vm5336_vm1, %v5337_v10  ;;  %5144 = vmatpush3.bf16.msra.mxu0 %v5143_v3  ;;  %v1879_v53 = vld [vmem:[%s5545_s26 + $0x10] sm:$0xff] }
 0x415   : > { %5145 = vmatprep.subr.bf16.mxu0 %v5335_v4 }
 0x418   : > { %5147 = vmatpush3.bf16.msra.mxu0 %v5146_v11  ;;  %v2160_v11 = vld [vmem:[%s5563_s25 + $0x40] sm:$0xff] }
 0x419   : > { %5154 = vmatprep.subr.bf16.mxu0 %v5335_v4 }
 0x41b   : > { %5067 = vmatmul.mubr.msk.f32.vlgmr.msra.gmra.mrb[6].mxu0 %vm1109_vm2, %v1097_v12 }
 0x41c   : > { %5098 = vmatprep.mubr.msk.f32.mxu0 %vm5336_vm1, %v5337_v10 }
 0x4e6   : > { %v1591_v55 = vpop.f32.mrb[4].mxu0 }
 0x4e7   : > { %v1592_v56 = vadd.f32 %v4558_v54, %v1591_v55  ;;  %v5046_v57 = vpop.f32.mrb[5].mxu0  ;;  %v5155_v54 = vpack.c.bf16 %v1878_v52, %v1877_v51  ;;  %v1880_v55 = vld [vmem:[%s5545_s26 + $0x18] sm:$0xff]  ;;  %s6145_s26 = scalar_lea.vmem %s6072_s13, %s5489_s7  ;;  %v2164_v51 = vld [vmem:[%s5563_s25 + $0x60] sm:$0xff]  ;;  %v2157_v52 = vld [vmem:[%s5563_s25 + $0x28] sm:$0xff] }
 0x4e9   : > { %v1597_v58 = vadd.f32 %v1592_v56, %v5609_v15  ;;  %v5140_v15 = vpack.c.bf16 %v1629_v14, %v1628_v13  ;;  %5156 = vmatpush3.bf16.msra.mxu0 %v5155_v54  ;;  %v5158_v56 = vpack.c.bf16 %v1880_v55, %v1879_v53  ;;  %v4581_v13 = vcombine.high %v2152_v9, %v2160_v11  ;;  %v2161_v14 = vld [vmem:[%s5563_s25 + $0x48] sm:$0xff] }
 0x4ea   : > { %5157 = vmatprep.subr.bf16.mxu0 %v5335_v4  ;;  %v2165_v53 = vld [vmem:[%s5563_s25 + $0x68] sm:$0xff] }
 0x4eb   : > { %v1598_v59 = vsel %vm1109_vm2, %v1597_v58, 0.0  ;;  %5141 = vmatpush3.bf16.msra.mxu1 %v5140_v15  ;;  %v4580_v15 = vcombine.low %v2152_v9, %v2160_v11  ;;  %v2174_v11 = vld [vmem:[%s5563_s25 + $0xb0] sm:$0xff] }
 0x4ec   : > { %1599 = vadd.xlane.f32.xlu1 %v1598_v59  ;;  %5148 = vmatprep.subr.bf16.mxu1 %v5335_v4 }
 0x4ed   : > { %5159 = vmatpush3.bf16.msra.mxu0 %v5158_v56 }
 0x4ee   : > { %v1790_v32 = vpop.f32.mrb[6].mxu0 }
 0x4ef   : > { %v1791_v33 = vadd.f32 %v4564_v31, %v1790_v32  ;;  %v5068_v34 = vpop.f32.mrb[7].mxu0  ;;  %v5338_v31 = vmov 0  }
 0x579   : > { %v1600_v60 = vpop.xlane.xlu1 %1599 }
 0x57a   : > { %v1602_v61 = vmul.f32 0.03125, %v1600_v60 }
 0x57c   : > { %v1603_v62 = vsub.f32 %v1597_v58, %v1602_v61 }
 0x57e   : > { %v1604_v63 = vmul.f32 %v1603_v62, %v1603_v62 }
 0x580   : > { %v1605_v0 = vsel %vm1109_vm2, %v1604_v63, 0.0 }
 0x581   : > { %1606 = vadd.xlane.f32.xlu1 %v1605_v0 }
 0x60e   : > { %v1607_v16 = vpop.xlane.xlu1 %1606 }
 0x60f   : > { %v1608_v17 = vmul.f32 0.03125, %v1607_v16 }
 0x611   : > { %v1609_v18 = vadd.f32 1e-05, %v1608_v17 }
 0x613   : > { %5315 = vrsqrt.f32 %v1609_v18  ;;  %v2168_v18 = vld [vmem:[%s5563_s25 + $0x80] sm:$0xff] }
 0x61d   : > { %v5316_v19 = vpop.eup %5315 }
 0x61e   : > { %v1611_v21 = vmul.f32 %v5316_v19, %v1603_v62  ;;  %v4576_v62 = vld [vmem:[%s6145_s26] ss:$0 sm:$0xff] }
 0x61f   : > { %v2176_v19 = vld [vmem:[%s5563_s25 + $0xc0] sm:$0xff] }
 0x620   : > { %v1618_v25 = vmul.f32 %v4560_v20, %v1611_v21  ;;  %v2169_v20 = vld [vmem:[%s5563_s25 + $0x88] sm:$0xff]  ;;  %v4597_v21 = vcombine.high %v2168_v18, %v2176_v19  ;;  %v4596_v23 = vcombine.low %v2168_v18, %v2176_v19 }
 0x622   : > { %v1625_v27 = vadd.f32 %v4561_v24, %v1618_v25  ;;  %v4598_v24 = vcombine.low %v2169_v20, %v2177_v22  ;;  %v4599_v25 = vcombine.high %v2169_v20, %v2177_v22  ;;  %v5184_v22 = vld [vmem:[%s5575_s4 + $0xc0] sm:$0xff]  }
 0x624   : > { %5056 = vmatmul.mubr.msk.f32.vlgmr.msra.gmra.mrb[6].mxu1 %vm1109_vm2, %v1625_v27 }
 0x625   : > { %5150 = vmatpush3.bf16.msra.mxu1 %v5149_v26  ;;  %5077 = vmatprep.mubr.msk.f32.mxu1 %vm5336_vm1, %v5337_v10  ;;  %v2154_v26 = vld [vmem:[%s5563_s25 + $0x10] sm:$0xff] }
 0x626   : > { %5151 = vmatprep.subr.bf16.mxu1 %v5335_v4 }
 0x629   : > { %5153 = vmatpush3.bf16.msra.mxu1 %v5152_v30  ;;  %v2163_v30 = vld [vmem:[%s5563_s25 + $0x58] sm:$0xff] }
 0x62a   : > { %5080 = vmatprep.subr.mxu1 %v5337_v10  ;;  %v4587_v34 = vcombine.high %v2155_v28, %v2163_v30 }
 0x62c   : > { %5078 = vmatmul.mubr.msk.f32.vlgmr.msra.gmra.mrb[8].mxu1 %vm1109_vm2, %v1097_v12  ;;  %v2153_v12 = vld [vmem:[%s5563_s25 + $0x8] sm:$0xff] }
 0x62d   : > { %5082 = vmatprep.mubr.msk.f32.mxu1 %vm5336_vm1, %v5337_v10  ;;  %v4582_v16 = vcombine.low %v2153_v12, %v2161_v14  ;;  %v4583_v17 = vcombine.high %v2153_v12, %v2161_v14  ;;  %v2182_v12 = vld [vmem:[%s5563_s25 + $0xf0] sm:$0xff]  ;;  %v2183_v14 = vld [vmem:[%s5563_s25 + $0xf8] sm:$0xff] }
 0x62e   : > { %v4608_v19 = vcombine.low %v2174_v11, %v2182_v12 }
 0x62f   : > { %2730 = vmatprep.subr.bf16.mxu0 %v4583_v17  ;;  %v4609_v17 = vcombine.high %v2174_v11, %v2182_v12 }
 0x632   : > { %5081 = vmatpush3.xpose.msk.msra.mxu1 %vm1109_vm2, %v1791_v33  ;;  %v4586_v33 = vcombine.low %v2155_v28, %v2163_v30  ;;  %v5190_v28 = vld [vmem:[%s5575_s4 + $0x88] sm:$0xff]   ;;  %v5192_v30 = vld [vmem:[%s5575_s4 + $0xd0] sm:$0xff]  }
 0x633   : > { %5085 = vmatprep.subr.mxu1 %v5337_v10 }
 0x6f7   : > { %v1706_v36 = vpop.f32.mrb[6].mxu1 }
 0x6f8   : > { %v1707_v37 = vadd.f32 %v4562_v35, %v1706_v36  ;;  %v5057_v38 = vpop.f32.mrb[7].mxu1 }
 0x6fa   : > { %5083 = vmatmul.mubr.msk.f32.vlgmr.msra.gmra.mrb[10].mxu1 %vm1109_vm2, %v1707_v37 }
 0x6fb   : > { %5087 = vmatprep.mubr.msk.f32.mxu1 %vm5336_vm1, %v5337_v10 }
 0x6ff   : > { %v1873_v40 = vpop.f32.mrb[8].mxu1 }
 0x700   : > { %v1874_v41 = vadd.f32 %v4571_v39, %v1873_v40  ;;  %v5079_v42 = vpop.f32.mrb[9].mxu1  ;;  %v4578_v39 = vld [vmem:[%s6146_s28] ss:$0 sm:$0xff] }
 0x702   : > { %5086 = vmatpush3.msra.mxu1 %v1874_v41  ;;  %v4579_v41 = vld [vmem:[%s6147_s0] ss:$0 sm:$0xff] }
 0x703   : > { %2689 = vmatprep.subr.bf16.mxu1 %v4581_v13  ;;  %v2175_v13 = vld [vmem:[%s5563_s25 + $0xb8] sm:$0xff] }
 0x704   : > { %v4611_v18 = vcombine.high %v2175_v13, %v2183_v14  ;;  %v4610_v20 = vcombine.low %v2175_v13, %v2183_v14 }
 0x7cd   : > { %v1954_v43 = vpop.f32.mrb[10].mxu1 }
 0x7ce   : > { %v1958_v44 = vmul.f32 0.17677669, %v1954_v43  ;;  %v5084_v45 = vpop.f32.mrb[11].mxu1  ;;  %v2170_v43 = vld [vmem:[%s5563_s25 + $0x90] sm:$0xff] }
 0x7cf   : > { %v2171_v45 = vld [vmem:[%s5563_s25 + $0x98] sm:$0xff] }
 0x7d0   : > { %v1959_v46 = vsel %vm1431_vm3, %v1958_v44, -inf }
 0x7d1   : > { %1960 = vmax.xlane.f32.xlu0 %v1959_v46  ;;  %v2179_v46 = vld [vmem:[%s5563_s25 + $0xd8] sm:$0xff] }
 0x7d2   : > { %v4602_v55 = vcombine.low %v2171_v45, %v2179_v46 }
 0x85e   : > { %v1961_v47 = vpop.xlane.xlu0 %1960 }
 0x85f   : > { %v1962_v48 = vsub.f32 %v1958_v44, %v1961_v47  ;;  %v2178_v44 = vld [vmem:[%s5563_s25 + $0xd0] sm:$0xff] }
 0x860   : > { %v4600_v54 = vcombine.low %v2170_v43, %v2178_v44 }
 0x861   : > { %v1963_v49 = vmul.f32 1.442695, %v1962_v48 }
 0x863   : > { %5317 = vpow2.f32 %v1963_v49  ;;  %v4601_v49 = vcombine.high %v2170_v43, %v2178_v44  ;;  %v5205_v43 = vld [vmem:[%s5575_s4 + $0x28] sm:$0xff]  }
 0x864   : > { %v5206_v44 = vld [vmem:[%s5575_s4 + $0xa8] sm:$0xff]  }
 0x86d   : > { %v5318_v10 = vpop.eup %5317 }
 0x86e   : > { %v1965_v50 = vsel %vm1431_vm3, %v5318_v10, 0.0 }
 0x86f   : > { %1966 = vadd.xlane.f32.xlu1 %v1965_v50  ;;  %v2156_v50 = vld [vmem:[%s5563_s25 + $0x20] sm:$0xff] }
 0x870   : > { %v4589_v56 = vcombine.high %v2156_v50, %v2164_v51 }
 0x8fc   : > { %v1967_v57 = vpop.xlane.xlu1 %1966 }
 0x8fd   : > { %5319 = vrcp.f32 %v1967_v57  ;;  %v4591_v57 = vcombine.high %v2157_v52, %v2165_v53 }
 0x907   : > { %v5320_v58 = vpop.eup %5319 }
 0x908   : > { %v1969_v59 = vmul.f32 %v5320_v58, %v5318_v10  ;;  %v4603_v10 = vcombine.high %v2171_v45, %v2179_v46  ;;  %v2172_v58 = vld [vmem:[%s5563_s25 + $0xa0] sm:$0xff]  ;;  %v5207_v45 = vld [vmem:[%s5575_s4 + $0x70] sm:$0xff]  }
 0x909   : > { %v5208_v46 = vld [vmem:[%s5575_s4 + $0xf0] sm:$0xff]  }
 0x90a   : > { %5088 = vmatmul.mubr.msk.f32.vlgmr.msra.gmra.mrb[12].mxu1 %vm1431_vm3, %v1969_v59  ;;  %v2180_v59 = vld [vmem:[%s5563_s25 + $0xe0] sm:$0xff] }
 0x90b   : > { %2690 = vmatpush1.bf16.msra.mxu1 %v4580_v15  ;;  %2721 = vmatprep.mubr.bf16.mxu1 %v5338_v31 }
 0x90c   : > { %2691 = vmatprep.subr.bf16.mxu1 %v4597_v21  ;;  %v5183_v21 = vld [vmem:[%s5575_s4 + $0x40] sm:$0xff]  }
 0x90f   : > { %2692 = vmatpush1.bf16.msra.mxu1 %v4596_v23  ;;  %v5185_v23 = vld [vmem:[%s5575_s4] sm:$0xff]  }
 0x9dd   : > { %v2039_v60 = vpop.f32.mrb[12].mxu1 }
 0x9de   : > { %v5089_v61 = vpop.f32.mrb[13].mxu1  ;;  %5099 = vmatmul.mubr.msk.f32.vlgmr.msra.gmra.mrb[8].mxu0 %vm1109_vm2, %v2039_v60  ;;  %v2173_v60 = vld [vmem:[%s5563_s25 + $0xa8] sm:$0xff] }
 0x9df   : > { %2731 = vmatpush1.bf16.msra.mxu0 %v4582_v16  ;;  %2762 = vmatprep.mubr.bf16.mxu0 %v5338_v31  ;;  %v2181_v61 = vld [vmem:[%s5563_s25 + $0xe8] sm:$0xff] }
 0x9e0   : > { %2732 = vmatprep.subr.bf16.mxu0 %v4599_v25  ;;  %v5187_v25 = vld [vmem:[%s5575_s4 + $0x48] sm:$0xff]  }
 0x9e3   : > { %2733 = vmatpush1.bf16.msra.mxu0 %v4598_v24  ;;  %v5186_v24 = vld [vmem:[%s5575_s4 + $0x80] sm:$0xff]  }
 0x9e4   : > { %2812 = vmatprep.subr.bf16.mxu0 %v4587_v34  ;;  %v5196_v34 = vld [vmem:[%s5575_s4 + $0xd8] sm:$0xff]  }
 0xab1   : > { %v2118_v4 = vpop.f32.mrb[8].mxu0 }
 0xab2   : > { %v2119_v63 = vadd.f32 %v4576_v62, %v2118_v4  ;;  %v5100_v0 = vpop.f32.mrb[9].mxu0  ;;  %v4588_v62 = vcombine.low %v2156_v50, %v2164_v51  ;;  %v4590_v4 = vcombine.low %v2157_v52, %v2165_v53  ;;  %v5212_v50 = vld [vmem:[%s5575_s4 + $0xf8] sm:$0xff]   ;;  %v5215_v53 = vld [vmem:[%s5575_s4 + $0x140] sm:$0xff]  }
 0xab3   : > { %v4607_v0 = vcombine.high %v2173_v60, %v2181_v61  ;;  %v5213_v51 = vld [vmem:[%s5575_s4 + $0x38] sm:$0xff]  }
 0xab4   : > { %v2124_v1 = vadd.f32 %v2119_v63, %v1625_v27  ;;  %v2162_v27 = vld [vmem:[%s5563_s25 + $0x50] sm:$0xff]  ;;  %v4605_v63 = vcombine.high %v2172_v58, %v2180_v59  ;;  %v5214_v52 = vld [vmem:[%s5575_s4 + $0xb8] sm:$0xff]  }
 0xab5   : > { %v4585_v29 = vcombine.high %v2154_v26, %v2162_v27  ;;  %v4584_v32 = vcombine.low %v2154_v26, %v2162_v27  ;;  %v5188_v26 = vld [vmem:[%s5575_s4 + $0xc8] sm:$0xff]  }
 0xab6   : > { %v2125_v2 = vsel %vm1109_vm2, %v2124_v1, 0.0  ;;  %v5189_v27 = vld [vmem:[%s5575_s4 + $0x8] sm:$0xff]  }
 0xab7   : > { %2126 = vadd.xlane.f32.xlu0 %v2125_v2  ;;  %2771 = vmatprep.subr.bf16.mxu1 %v4585_v29  ;;  %v2166_v2 = vld [vmem:[%s5563_s25 + $0x70] sm:$0xff] }
 0xab8   : > { %v5191_v29 = vld [vmem:[%s5575_s4 + $0x50] sm:$0xff]  }
 0xb44   : > { %v2127_v3 = vpop.xlane.xlu0 %2126 }
 0xb45   : > { %v2128_v5 = vmul.f32 0.03125, %v2127_v3  ;;  %v2159_v3 = vld [vmem:[%s5563_s25 + $0x38] sm:$0xff] }
 0xb47   : > { %v2129_v6 = vsub.f32 %v2124_v1, %v2128_v5  ;;  %v2158_v1 = vld [vmem:[%s5563_s25 + $0x30] sm:$0xff]  ;;  %v2167_v5 = vld [vmem:[%s5563_s25 + $0x78] sm:$0xff]  ;;  %s6154_s25 = sld [smem:[#allocation27_spill]] (!%p4751_p5) }
 0xb48   : > { %v4595_v9 = vcombine.high %v2159_v3, %v2167_v5  ;;  %v4592_v15 = vcombine.low %v2158_v1, %v2166_v2  ;;  %v4594_v16 = vcombine.low %v2159_v3, %v2167_v5 }
 0xb49   : > { %v2130_v7 = vmul.f32 %v2129_v6, %v2129_v6 }
 0xb4b   : > { %v2131_v8 = vsel %vm1109_vm2, %v2130_v7, 0.0  ;;  %v4606_v7 = vcombine.low %v2173_v60, %v2181_v61 }
 0xb4c   : > { %2132 = vadd.xlane.f32.xlu1 %v2131_v8  ;;  %v4593_v8 = vcombine.high %v2158_v1, %v2166_v2 }
 0xbd9   : > { %v2133_v35 = vpop.xlane.xlu1 %2132 }
 0xbda   : > { %v2134_v36 = vmul.f32 0.03125, %v2133_v35  ;;  %v5197_v35 = vld [vmem:[%s5575_s4 + $0x18] sm:$0xff]  }
 0xbdc   : > { %v2135_v37 = vadd.f32 1e-05, %v2134_v36  ;;  %v5198_v36 = vld [vmem:[%s5575_s4 + $0x98] sm:$0xff]  }
 0xbde   : > { %5321 = vrsqrt.f32 %v2135_v37  ;;  %v5199_v37 = vld [vmem:[%s5575_s4 + $0x60] sm:$0xff]  }
 0xbe8   : > { %v5322_v38 = vpop.eup %5321 }
 0xbe9   : > { %v2137_v40 = vmul.f32 %v5322_v38, %v2129_v6  ;;  %v4604_v6 = vcombine.low %v2172_v58, %v2180_v59  ;;  %v5200_v38 = vld [vmem:[%s5575_s4 + $0xe0] sm:$0xff]   ;;  %v5840_v58 = vld [vmem:[%s5569_s1 + $0x8] sm:$0xff] }
 0xbeb   : > { %v2144_v42 = vmul.f32 %v4578_v39, %v2137_v40  ;;  %v5201_v39 = vld [vmem:[%s5575_s4 + $0x20] sm:$0xff]  }
 0xbec   : > { %v5202_v40 = vld [vmem:[%s5575_s4 + $0xa0] sm:$0xff]  }
 0xbed   : > { %v5758_v47 = vadd.f32 %v4579_v41, %v2144_v42  ;;  %v5203_v41 = vld [vmem:[%s5575_s4 + $0x68] sm:$0xff]  }
 0xbee   : > { %v5204_v42 = vld [vmem:[%s5575_s4 + $0xe8] sm:$0xff]  }
 0xbef   : > { %v5762_v48 = vpack.c.bf16 %v5758_v47, %v5758_v47 }
 0xbf1   : > { %4612 = vmatmul.mubr.msk.bf16.vlgmr.msra.gmra.mrb[16].mxu1 %vm1109_vm2, %v5762_v48  ;;  %4613 = vmatmul.mubr.msk.bf16.vlgmr.msra.gmra.mrb[12].mxu0 %vm1109_vm2, %v5762_v48 }
 0xbf2   : > { %2772 = vmatpush1.bf16.msra.mxu1 %v4584_v32  ;;  %2813 = vmatpush1.bf16.msra.mxu0 %v4586_v33  ;;  %v5194_v32 = vld [vmem:[%s5575_s4 + $0x90] sm:$0xff]   ;;  %v5195_v33 = vld [vmem:[%s5575_s4 + $0x58] sm:$0xff]  }
 0xbf3   : > { %2773 = vmatprep.subr.bf16.mxu1 %v4601_v49  ;;  %2814 = vmatprep.subr.bf16.mxu0 %v4603_v10  ;;  %v5210_v49 = vld [vmem:[%s5575_s4 + $0xb0] sm:$0xff]   ;;  %v5211_v10 = vld [vmem:[%s5575_s4 + $0x78] sm:$0xff]  }
 0xbf4   : > { %2803 = vmatprep.mubr.bf16.mxu1 %v5338_v31  ;;  %2844 = vmatprep.mubr.bf16.mxu0 %v5338_v31 }
 0xbf6   : > { %2774 = vmatpush1.bf16.msra.mxu1 %v4600_v54  ;;  %2815 = vmatpush1.bf16.msra.mxu0 %v4602_v55  ;;  %v5216_v54 = vld [vmem:[%s5575_s4 + $0x1c0] sm:$0xff]   ;;  %v2446_v55 = vlaneseq }
 0xbf7   : > { %2853 = vmatprep.subr.bf16.mxu1 %v4589_v56  ;;  %2894 = vmatprep.subr.bf16.mxu0 %v4591_v57 }
 0xbf8   : > { %v5836_v56 = vshrl.u32 %v2446_v55, 7  ;;  %v5226_v55 = vld [vmem:[%s5575_s4 + $0x190] sm:$0xff]  }
 0xbf9   : > { %4614 = vmatmul.mubr.msk.bf16.vlgmr.msra.gmra.mrb[20].mxu1 %vm1109_vm2, %v5762_v48  ;;  %4615 = vmatmul.mubr.msk.bf16.vlgmr.msra.gmra.mrb[16].mxu0 %vm1109_vm2, %v5762_v48 }
 0xbfa   : > { %2854 = vmatpush1.bf16.msra.mxu1 %v4588_v62  ;;  %2895 = vmatpush1.bf16.msra.mxu0 %v4590_v4  ;;  %v2472_v57 = vsub.s32 6, %v5836_v56  ;;  %v2448_v60 = vsub.s32 0, %v5836_v56  ;;  %v2456_v61 = vsub.s32 2, %v5836_v56  ;;  %v5850_v62 = vld [vmem:[%s5569_s1] sm:$0xff]  ;;  %v2452_v4 = vsub.s32 1, %v5836_v56 }
 0xbfb   : > { %2855 = vmatprep.subr.bf16.mxu1 %v4605_v63  ;;  %2896 = vmatprep.subr.bf16.mxu0 %v4607_v0  ;;  %v2460_v63 = vsub.s32 3, %v5836_v56 }
 0xbfc   : > { %2885 = vmatprep.mubr.bf16.mxu1 %v5338_v31  ;;  %2926 = vmatprep.mubr.bf16.mxu0 %v5338_v31  ;;  %v5845_v59 = vrot.slane %v5840_v58, %v2472_v57  ;;  %v2449_v0 = vrot.slane %v5850_v62, %v2448_v60  ;;  %v2457_v1 = vrot.slane %v5850_v62, %v2456_v61 }
 0xbfd   : > { %v2453_v2 = vrot.slane %v5850_v62, %v2452_v4  ;;  %v2461_v3 = vrot.slane %v5850_v62, %v2460_v63 }
 0xbfe   : > { %2856 = vmatpush1.bf16.msra.mxu1 %v4604_v6  ;;  %2897 = vmatpush1.bf16.msra.mxu0 %v4606_v7 }
 0xbff   : > { %2935 = vmatprep.subr.bf16.mxu1 %v4593_v8  ;;  %2976 = vmatprep.subr.bf16.mxu0 %v4595_v9 }
 0xc01   : > { %4616 = vmatmul.mubr.msk.bf16.vlgmr.msra.gmra.mrb[24].mxu1 %vm1109_vm2, %v5762_v48  ;;  %4617 = vmatmul.mubr.msk.bf16.vlgmr.msra.gmra.mrb[20].mxu0 %vm1109_vm2, %v5762_v48 }
 0xc02   : > { %2936 = vmatpush1.bf16.msra.mxu1 %v4592_v15  ;;  %2977 = vmatpush1.bf16.msra.mxu0 %v4594_v16  ;;  %v2468_v16 = vsub.s32 5, %v5836_v56 }
 0xc03   : > { %2937 = vmatprep.subr.bf16.mxu1 %v4609_v17  ;;  %2978 = vmatprep.subr.bf16.mxu0 %v4611_v18  ;;  %v2476_v17 = vsub.s32 7, %v5836_v56 }
 0xc04   : > { %2967 = vmatprep.mubr.bf16.mxu1 %v5338_v31  ;;  %3008 = vmatprep.mubr.bf16.mxu0 %v5338_v31  ;;  %v5193_v31 = vld [vmem:[%s5575_s4 + $0x10] sm:$0xff]  }
 0xc06   : > { %2938 = vmatpush1.bf16.msra.mxu1 %v4608_v19  ;;  %2979 = vmatpush1.bf16.msra.mxu0 %v4610_v20 }
 0xc07   : > { %4812 = vmatprep.subr.bf16.mxu1 %v5183_v21  ;;  %4834 = vmatprep.subr.bf16.mxu0 %v5184_v22 }
 0xc09   : > { %4618 = vmatmul.mubr.msk.bf16.vlgmr.msra.gmra.mrb[28].mxu1 %vm1109_vm2, %v5762_v48  ;;  %4619 = vmatmul.mubr.msk.bf16.vlgmr.msra.gmra.mrb[24].mxu0 %vm1109_vm2, %v5762_v48  ;;  %v5209_v48 = vld [vmem:[%s5575_s4 + $0x30] sm:$0xff]  }
 0xc0a   : > { %4813 = vmatpush3.bf16.msra.mxu1 %v5185_v23  ;;  %4835 = vmatpush3.bf16.msra.mxu0 %v5186_v24 }
 0xc0b   : > { %4814 = vmatprep.subr.bf16.mxu1 %v5187_v25  ;;  %4836 = vmatprep.subr.bf16.mxu0 %v5188_v26  ;;  %v2469_v26 = vrot.slane %v5850_v62, %v2468_v16 }
 0xc0e   : > { %4815 = vmatpush3.bf16.msra.mxu1 %v5189_v27  ;;  %4837 = vmatpush3.bf16.msra.mxu0 %v5190_v28  ;;  %v2477_v27 = vrot.slane %v5850_v62, %v2476_v17  ;;  %v5217_v28 = vld [vmem:[%s5575_s4 + $0x100] sm:$0xff]  }
 0xc0f   : > { %4816 = vmatprep.subr.bf16.mxu1 %v5191_v29  ;;  %4838 = vmatprep.subr.bf16.mxu0 %v5192_v30  ;;  %v5218_v29 = vld [vmem:[%s5575_s4 + $0x180] sm:$0xff]  }
 0xc12   : > { %4817 = vmatpush3.bf16.msra.mxu1 %v5193_v31  ;;  %4839 = vmatpush3.bf16.msra.mxu0 %v5194_v32  ;;  %v5219_v32 = vld [vmem:[%s5575_s4 + $0x148] sm:$0xff]  }
 0xc13   : > { %4818 = vmatprep.subr.bf16.mxu1 %v5195_v33  ;;  %4840 = vmatprep.subr.bf16.mxu0 %v5196_v34  ;;  %v5220_v33 = vld [vmem:[%s5575_s4 + $0x1c8] sm:$0xff]  }
 0xc16   : > { %4819 = vmatpush3.bf16.msra.mxu1 %v5197_v35  ;;  %4841 = vmatpush3.bf16.msra.mxu0 %v5198_v36 }
 0xc17   : > { %4820 = vmatprep.subr.bf16.mxu1 %v5199_v37  ;;  %4842 = vmatprep.subr.bf16.mxu0 %v5200_v38 }
 0xc1a   : > { %4821 = vmatpush3.bf16.msra.mxu1 %v5201_v39  ;;  %4843 = vmatpush3.bf16.msra.mxu0 %v5202_v40 }
 0xc1b   : > { %4822 = vmatprep.subr.bf16.mxu1 %v5203_v41  ;;  %4844 = vmatprep.subr.bf16.mxu0 %v5204_v42  ;;  %v5221_v42 = vld [vmem:[%s5575_s4 + $0x108] sm:$0xff]  }
 0xc1e   : > { %4823 = vmatpush3.bf16.msra.mxu1 %v5205_v43  ;;  %4845 = vmatpush3.bf16.msra.mxu0 %v5206_v44  ;;  %v5222_v43 = vld [vmem:[%s5575_s4 + $0x188] sm:$0xff]  }
 0xc1f   : > { %4824 = vmatprep.subr.bf16.mxu1 %v5207_v45  ;;  %4846 = vmatprep.subr.bf16.mxu0 %v5208_v46  ;;  %v5223_v46 = vld [vmem:[%s5575_s4 + $0x150] sm:$0xff]  }
 0xc22   : > { %4825 = vmatpush3.bf16.msra.mxu1 %v5209_v48  ;;  %4847 = vmatpush3.bf16.msra.mxu0 %v5210_v49  ;;  %v5224_v48 = vld [vmem:[%s5575_s4 + $0x1d0] sm:$0xff]  }
 0xc23   : > { %4826 = vmatprep.subr.bf16.mxu1 %v5211_v10  ;;  %4848 = vmatprep.subr.bf16.mxu0 %v5212_v50  ;;  %v2481_v50 = vrot.slane %v5840_v58, %v2448_v60 }
 0xc26   : > { %4827 = vmatpush3.bf16.msra.mxu1 %v5213_v51  ;;  %4849 = vmatpush3.bf16.msra.mxu0 %v5214_v52  ;;  %v2489_v51 = vrot.slane %v5840_v58, %v2456_v61 }
 0xc27   : > { %4856 = vmatprep.subr.bf16.mxu1 %v5215_v53  ;;  %4878 = vmatprep.subr.bf16.mxu0 %v5216_v54  ;;  %v5225_v54 = vld [vmem:[%s5575_s4 + $0x110] sm:$0xff]  }
 0xcc4   : > { %v2723_v5 = vpop.f32.mrb[16].mxu1  ;;  %v2764_v6 = vpop.f32.mrb[12].mxu0 }
 0xcc5   : > { %v2724_v7 = vadd.f32 %v2723_v5, %v2449_v0  ;;  %v2765_v8 = vadd.f32 %v2764_v6, %v2457_v1  ;;  %v2725_v9 = vpop.f32.mrb[17].mxu1  ;;  %v2766_v11 = vpop.f32.mrb[13].mxu0  ;;  %v5227_v0 = vld [vmem:[%s5575_s4 + $0x158] sm:$0xff]  }
 0xcc6   : > { %v2726_v12 = vadd.f32 %v2725_v9, %v2453_v2  ;;  %v2767_v13 = vadd.f32 %v2766_v11, %v2461_v3  ;;  %v2727_v14 = vpop.f32.mrb[18].mxu1  ;;  %v2768_v15 = vpop.f32.mrb[14].mxu0  ;;  %v5228_v1 = vld [vmem:[%s5575_s4 + $0x1d8] sm:$0xff]  }
 0xcc7   : > { %v3017_v18 = vmax.f32 %v2724_v7, 0.0  ;;  %v3019_v19 = vmax.f32 %v2765_v8, 0.0  ;;  %v2728_v20 = vpop.f32.mrb[19].mxu1  ;;  %v2769_v21 = vpop.f32.mrb[15].mxu0  ;;  %v5229_v9 = vld [vmem:[%s5575_s4 + $0x118] sm:$0xff]   ;;  %v5231_v15 = vld [vmem:[%s5575_s4 + $0x160] sm:$0xff]  }
 0xcc8   : > { %v3018_v22 = vmax.f32 %v2726_v12, 0.0  ;;  %v3020_v23 = vmax.f32 %v2767_v13, 0.0  ;;  %v5230_v11 = vld [vmem:[%s5575_s4 + $0x198] sm:$0xff]   ;;  %v2464_v12 = vsub.s32 4, %v5836_v56  ;;  %v5233_v20 = vld [vmem:[%s5575_s4 + $0x120] sm:$0xff]  }
 0xcc9   : > { %v3033_v30 = vpack.c.bf16 %v3017_v18, %v3017_v18  ;;  %v3035_v31 = vpack.c.bf16 %v3019_v19, %v3019_v19  ;;  %v5232_v18 = vld [vmem:[%s5575_s4 + $0x1e0] sm:$0xff]   ;;  %v5277_v56 = vld [vmem:[%s5575_s4 + $0x238] sm:$0xff]  }
 0xcca   : > { %v3034_v24 = vpack.c.bf16 %v3018_v22, %v3018_v22  ;;  %v3036_v25 = vpack.c.bf16 %v3020_v23, %v3020_v23  ;;  %v2497_v19 = vrot.slane %v5840_v58, %v2464_v12  ;;  %v5234_v21 = vld [vmem:[%s5575_s4 + $0x1a0] sm:$0xff]   ;;  %v5235_v22 = vld [vmem:[%s5575_s4 + $0x168] sm:$0xff]  }
 0xccb   : > { %v5236_v23 = vld [vmem:[%s5575_s4 + $0x1e8] sm:$0xff]  }
 0xccc   : > { %v5874_v34 = vpop.f32.mrb[20].mxu1  ;;  %v5876_v35 = vpop.f32.mrb[16].mxu0  ;;  %3855 = vmatprep.mubr.bf16.mxu1 %v3034_v24  ;;  %3895 = vmatprep.mubr.bf16.mxu0 %v3036_v25 }
 0xccd   : > { %v2807_v36 = vpop.f32.mrb[21].mxu1  ;;  %v2848_v37 = vpop.f32.mrb[17].mxu0  ;;  %3856 = vmatmul.mubr.bf16.vlgmr.msra.gmra.mrb[32].mxu1 %v3033_v30  ;;  %3896 = vmatmul.mubr.bf16.vlgmr.msra.gmra.mrb[28].mxu0 %v3035_v31 }
 0xcce   : > { %v2808_v38 = vadd.f32 %v2807_v36, %v2469_v26  ;;  %v2849_v39 = vadd.f32 %v2848_v37, %v2477_v27  ;;  %4857 = vmatpush3.bf16.msra.mxu1 %v5217_v28  ;;  %4879 = vmatpush3.bf16.msra.mxu0 %v5218_v29  ;;  %v2809_v40 = vpop.f32.mrb[22].mxu1  ;;  %v2850_v41 = vpop.f32.mrb[18].mxu0  ;;  %v2465_v36 = vrot.slane %v5850_v62, %v2464_v12  ;;  %v5258_v12 = vld [vmem:[%s5575_s4 + $0x290] sm:$0xff]  }
 0xccf   : > { %v2810_v44 = vpop.f32.mrb[23].mxu1  ;;  %v2851_v45 = vpop.f32.mrb[19].mxu0  ;;  %4858 = vmatprep.subr.bf16.mxu1 %v5219_v32  ;;  %4880 = vmatprep.subr.bf16.mxu0 %v5220_v33  ;;  %v5237_v32 = vld [vmem:[%s5575_s4 + $0x128] sm:$0xff]   ;;  %v5240_v40 = vld [vmem:[%s5575_s4 + $0x1f0] sm:$0xff]   ;;  %v2485_v41 = vrot.slane %v5840_v58, %v2452_v4  ;;  %v5244_v4 = vld [vmem:[%s5575_s4 + $0x1f8] sm:$0xff]  }
 0xcd0   : > { %v3022_v49 = vmax.f32 %v2808_v38, 0.0  ;;  %v3024_v10 = vmax.f32 %v2849_v39, 0.0  ;;  %v5238_v33 = vld [vmem:[%s5575_s4 + $0x1a8] sm:$0xff]   ;;  %v5239_v39 = vld [vmem:[%s5575_s4 + $0x170] sm:$0xff]   ;;  %v5243_v45 = vld [vmem:[%s5575_s4 + $0x178] sm:$0xff]  }
 0xcd2   : > { %v3038_v52 = vpack.c.bf16 %v3022_v49, %v3022_v49  ;;  %v3040_v53 = vpack.c.bf16 %v3024_v10, %v3024_v10  ;;  %4859 = vmatpush3.bf16.msra.mxu1 %v5221_v42  ;;  %4881 = vmatpush3.bf16.msra.mxu0 %v5222_v43  ;;  %v2493_v42 = vrot.slane %v5840_v58, %v2460_v63  ;;  %v5245_v63 = vld [vmem:[%s5575_s4 + $0x138] sm:$0xff]  }
 0xcd3   : > { %4860 = vmatprep.subr.bf16.mxu1 %v5223_v46  ;;  %4882 = vmatprep.subr.bf16.mxu0 %v5224_v48  ;;  %v2806_v43 = vadd.f32 %v5874_v34, %v2465_v36  ;;  %v5246_v49 = vld [vmem:[%s5575_s4 + $0x1b8] sm:$0xff]   ;;  %v5247_v34 = vld [vmem:[%s5575_s4 + $0x240] sm:$0xff]   ;;  %v2509_v36 = vrot.slane %v5840_v58, %v2476_v17 }
 0xcd4   : > { %v2887_v2 = vpop.f32.mrb[24].mxu1  ;;  %v2928_v3 = vpop.f32.mrb[20].mxu0  ;;  %3935 = vmatprep.mubr.bf16.mxu1 %v3038_v52  ;;  %3975 = vmatprep.mubr.bf16.mxu0 %v3040_v53  ;;  %v5249_v53 = vld [vmem:[%s5575_s4 + $0x200] sm:$0xff]   ;;  %v5278_v17 = vld [vmem:[%s5575_s4 + $0x2b8] sm:$0xff]  }
 0xcd5   : > { %v5888_v60 = vadd.f32 %v2887_v2, %v2481_v50  ;;  %v5890_v61 = vadd.f32 %v2928_v3, %v2489_v51  ;;  %v2889_v5 = vpop.f32.mrb[25].mxu1  ;;  %v2930_v6 = vpop.f32.mrb[21].mxu0  ;;  %v3021_v10 = vmax.f32 %v2806_v43, 0.0  ;;  %v5251_v2 = vld [vmem:[%s5575_s4 + $0x248] sm:$0xff]  }
 0xcd6   : > { %4861 = vmatpush3.bf16.msra.mxu1 %v5225_v54  ;;  %4883 = vmatpush3.bf16.msra.mxu0 %v5226_v55  ;;  %v2891_v7 = vpop.f32.mrb[26].mxu1  ;;  %v2932_v8 = vpop.f32.mrb[22].mxu0  ;;  %v2890_v46 = vadd.f32 %v2889_v5, %v2485_v41  ;;  %v2931_v48 = vadd.f32 %v2930_v6, %v2493_v42  ;;  %v5252_v3 = vld [vmem:[%s5575_s4 + $0x2c8] sm:$0xff]   ;;  %v5279_v41 = vld [vmem:[%s5575_s4 + $0x340] sm:$0xff]  }
 0xcd7   : > { %v2892_v13 = vpop.f32.mrb[27].mxu1  ;;  %v2933_v14 = vpop.f32.mrb[23].mxu0  ;;  %4862 = vmatprep.subr.bf16.mxu1 %v5227_v0  ;;  %4884 = vmatprep.subr.bf16.mxu0 %v5228_v1  ;;  %v3037_v54 = vpack.c.bf16 %v3021_v10, %v3021_v10  ;;  %v5250_v0 = vld [vmem:[%s5575_s4 + $0x280] sm:$0xff]   ;;  %v5253_v6 = vld [vmem:[%s5575_s4 + $0x208] sm:$0xff]   ;;  %v5255_v8 = vld [vmem:[%s5575_s4 + $0x250] sm:$0xff]   ;;  %v3027_v42 = vmax.f32 %v5890_v61, 0.0 }
 0xcd8   : > { %v3026_v51 = vmax.f32 %v2890_v46, 0.0  ;;  %v3028_v52 = vmax.f32 %v2931_v48, 0.0  ;;  %v5254_v7 = vld [vmem:[%s5575_s4 + $0x288] sm:$0xff]   ;;  %v5259_v13 = vld [vmem:[%s5575_s4 + $0x258] sm:$0xff]   ;;  %v5288_v10 = vld [vmem:[%s5575_s4 + $0x3d0] sm:$0xff]  }
 0xcd9   : > { %v5260_v14 = vld [vmem:[%s5575_s4 + $0x2d8] sm:$0xff]   ;;  %v5284_v61 = vld [vmem:[%s5575_s4 + $0x3c8] sm:$0xff]  }
 0xcda   : > { %4863 = vmatpush3.bf16.msra.mxu1 %v5229_v9  ;;  %4885 = vmatpush3.bf16.msra.mxu0 %v5230_v11  ;;  %v3042_v1 = vpack.c.bf16 %v3026_v51, %v3026_v51  ;;  %v3044_v5 = vpack.c.bf16 %v3028_v52, %v3028_v52  ;;  %v5256_v9 = vld [vmem:[%s5575_s4 + $0x2d0] sm:$0xff]   ;;  %v5285_v48 = vld [vmem:[%s5575_s4 + $0x308] sm:$0xff]   ;;  %v5292_v51 = vld [vmem:[%s5575_s4 + $0x3d8] sm:$0xff]  }
 0xcdb   : > { %4864 = vmatprep.subr.bf16.mxu1 %v5231_v15  ;;  %4886 = vmatprep.subr.bf16.mxu0 %v5232_v18  ;;  %v5257_v11 = vld [vmem:[%s5575_s4 + $0x210] sm:$0xff]   ;;  %v5261_v15 = vld [vmem:[%s5575_s4 + $0x218] sm:$0xff]  }
 0xcdc   : > { %v2969_v24 = vpop.f32.mrb[28].mxu1  ;;  %v3010_v25 = vpop.f32.mrb[24].mxu0  ;;  %v5262_v18 = vld [vmem:[%s5575_s4 + $0x298] sm:$0xff]  }
 0xcdd   : > { %v5902_v26 = vadd.f32 %v2969_v24, %v2497_v19  ;;  %v5905_v27 = vadd.f32 %v3010_v25, %v5845_v59  ;;  %v5907_v28 = vpop.f32.mrb[29].mxu1  ;;  %v5909_v29 = vpop.f32.mrb[25].mxu0  ;;  %v2473_v59 = vrot.slane %v5850_v62, %v2472_v57  ;;  %v5241_v57 = vld [vmem:[%s5575_s4 + $0x130] sm:$0xff]   ;;  %v5263_v19 = vld [vmem:[%s5575_s4 + $0x260] sm:$0xff]   ;;  %v5268_v24 = vld [vmem:[%s5575_s4 + $0x2e8] sm:$0xff]  }
 0xcde   : > { %4865 = vmatpush3.bf16.msra.mxu1 %v5233_v20  ;;  %4887 = vmatpush3.bf16.msra.mxu0 %v5234_v21  ;;  %v2973_v30 = vpop.f32.mrb[30].mxu1  ;;  %v3014_v31 = vpop.f32.mrb[26].mxu0  ;;  %v5242_v62 = vld [vmem:[%s5575_s4 + $0x1b0] sm:$0xff]   ;;  %v5264_v20 = vld [vmem:[%s5575_s4 + $0x2e0] sm:$0xff]   ;;  %v5269_v25 = vld [vmem:[%s5575_s4 + $0x228] sm:$0xff]  }
 0xcdf   : > { %v2974_v37 = vpop.f32.mrb[31].mxu1  ;;  %v3015_v38 = vpop.f32.mrb[27].mxu0  ;;  %4866 = vmatprep.subr.bf16.mxu1 %v5235_v22  ;;  %4888 = vmatprep.subr.bf16.mxu0 %v5236_v23  ;;  %v2847_v44 = vadd.f32 %v5876_v35, %v2473_v59  ;;  %v5248_v35 = vld [vmem:[%s5575_s4 + $0x2c0] sm:$0xff]   ;;  %v5267_v23 = vld [vmem:[%s5575_s4 + $0x268] sm:$0xff]   ;;  %v5271_v31 = vld [vmem:[%s5575_s4 + $0x270] sm:$0xff]  }
 0xce0   : > { %v5265_v21 = vld [vmem:[%s5575_s4 + $0x220] sm:$0xff]   ;;  %v5270_v30 = vld [vmem:[%s5575_s4 + $0x2a8] sm:$0xff]   ;;  %v5273_v59 = vld [vmem:[%s5575_s4 + $0x230] sm:$0xff]  }
 0xce1   : > { %v3023_v50 = vmax.f32 %v2847_v44, 0.0  ;;  %v5266_v22 = vld [vmem:[%s5575_s4 + $0x2a0] sm:$0xff]   ;;  %v5274_v37 = vld [vmem:[%s5575_s4 + $0x2b0] sm:$0xff]   ;;  %v5275_v38 = vld [vmem:[%s5575_s4 + $0x278] sm:$0xff]   ;;  %v3043_v44 = vpack.c.bf16 %v3027_v42, %v3027_v42 }
 0xce2   : > { %4867 = vmatpush3.bf16.msra.mxu1 %v5237_v32  ;;  %4889 = vmatpush3.bf16.msra.mxu0 %v5238_v33  ;;  %v5272_v32 = vld [vmem:[%s5575_s4 + $0x2f0] sm:$0xff]   ;;  %v2501_v33 = vrot.slane %v5840_v58, %v2468_v16  ;;  %v3013_v16 = vadd.f32 %v5909_v29, %v2509_v36  ;;  %v3025_v58 = vmax.f32 %v5888_v60, 0.0  ;;  %v5282_v60 = vld [vmem:[%s5575_s4 + $0x380] sm:$0xff]   ;;  %v5293_v52 = vld [vmem:[%s5575_s4 + $0x318] sm:$0xff]  }
 0xce3   : > { %4868 = vmatprep.subr.bf16.mxu1 %v5239_v39  ;;  %4890 = vmatprep.subr.bf16.mxu0 %v5240_v40  ;;  %v3039_v55 = vpack.c.bf16 %v3023_v50, %v3023_v50  ;;  %v5276_v39 = vld [vmem:[%s5575_s4 + $0x2f8] sm:$0xff]   ;;  %v5289_v50 = vld [vmem:[%s5575_s4 + $0x310] sm:$0xff]  }
 0xce4   : > { %v2972_v40 = vadd.f32 %v5907_v28, %v2501_v33  ;;  %v3032_v43 = vmax.f32 %v3013_v16, 0.0  ;;  %v5281_v28 = vld [vmem:[%s5575_s4 + $0x300] sm:$0xff]   ;;  %v3041_v29 = vpack.c.bf16 %v3025_v58, %v3025_v58 }
 0xce6   : > { %4869 = vmatpush3.bf16.msra.mxu1 %v5241_v57  ;;  %4891 = vmatpush3.bf16.msra.mxu0 %v5242_v62  ;;  %v5280_v57 = vld [vmem:[%s5575_s4 + $0x3c0] sm:$0xff]   ;;  %v3030_v62 = vmax.f32 %v2972_v40, 0.0  ;;  %v3048_v46 = vpack.c.bf16 %v3032_v43, %v3032_v43 }
 0xce7   : > { %4870 = vmatprep.subr.bf16.mxu1 %v5243_v45  ;;  %4892 = vmatprep.subr.bf16.mxu0 %v5244_v4  ;;  %v5283_v45 = vld [vmem:[%s5575_s4 + $0x348] sm:$0xff]  }
 0xce8   : > { %v3046_v4 = vpack.c.bf16 %v3030_v62, %v3030_v62 }
 0xcea   : > { %4871 = vmatpush3.bf16.msra.mxu1 %v5245_v63  ;;  %4893 = vmatpush3.bf16.msra.mxu0 %v5246_v49  ;;  %v5286_v63 = vld [vmem:[%s5575_s4 + $0x388] sm:$0xff]   ;;  %v5287_v49 = vld [vmem:[%s5575_s4 + $0x350] sm:$0xff]  }
 0xceb   : > { %4900 = vmatprep.subr.bf16.mxu1 %v5247_v34  ;;  %4922 = vmatprep.subr.bf16.mxu0 %v5248_v35  ;;  %v5290_v34 = vld [vmem:[%s5575_s4 + $0x390] sm:$0xff]   ;;  %v5291_v35 = vld [vmem:[%s5575_s4 + $0x358] sm:$0xff]  }
 0xced   : > { %3936 = vmatmul.mubr.bf16.vlgmr.msra.gmra.mrb[36].mxu1 %v3037_v54  ;;  %3976 = vmatmul.mubr.bf16.vlgmr.msra.gmra.mrb[32].mxu0 %v3039_v55  ;;  %v5295_v54 = vld [vmem:[%s5575_s4 + $0x360] sm:$0xff]  }
 0xcee   : > { %4901 = vmatpush3.bf16.msra.mxu1 %v5249_v53  ;;  %4015 = vmatprep.mubr.bf16.mxu1 %v3042_v1  ;;  %v5294_v53 = vld [vmem:[%s5575_s4 + $0x398] sm:$0xff]   ;;  %v5296_v55 = vld [vmem:[%s5575_s4 + $0x3e0] sm:$0xff]  }
 0xcef   : > { %4923 = vmatpush3.bf16.msra.mxu0 %v5250_v0  ;;  %4055 = vmatprep.mubr.bf16.mxu0 %v3044_v5  ;;  %v5297_v0 = vld [vmem:[%s5575_s4 + $0x320] sm:$0xff]   ;;  %v5301_v5 = vld [vmem:[%s5575_s4 + $0x328] sm:$0xff]  }
 0xcf0   : > { %4902 = vmatprep.subr.bf16.mxu1 %v5251_v2  ;;  %4924 = vmatprep.subr.bf16.mxu0 %v5252_v3  ;;  %v5298_v1 = vld [vmem:[%s5575_s4 + $0x3a0] sm:$0xff]   ;;  %v5299_v2 = vld [vmem:[%s5575_s4 + $0x368] sm:$0xff]  }
 0xcf1   : > { %v5300_v3 = vld [vmem:[%s5575_s4 + $0x3e8] sm:$0xff]  }
 0xcf2   : > { %4903 = vmatpush3.bf16.msra.mxu1 %v5253_v6  ;;  %v5302_v6 = vld [vmem:[%s5575_s4 + $0x3a8] sm:$0xff]  }
 0xcf3   : > { %4925 = vmatpush3.bf16.msra.mxu0 %v5254_v7  ;;  %4904 = vmatprep.subr.bf16.mxu1 %v5255_v8  ;;  %v5303_v7 = vld [vmem:[%s5575_s4 + $0x370] sm:$0xff]  }
 0xcf4   : > { %4926 = vmatprep.subr.bf16.mxu0 %v5256_v9  ;;  %v5304_v8 = vld [vmem:[%s5575_s4 + $0x3f0] sm:$0xff]  }
 0xcf5   : > { %v5305_v9 = vld [vmem:[%s5575_s4 + $0x330] sm:$0xff]  }
 0xcf6   : > { %4905 = vmatpush3.bf16.msra.mxu1 %v5257_v11  ;;  %v5306_v11 = vld [vmem:[%s5575_s4 + $0x3b0] sm:$0xff]  }
 0xcf7   : > { %4927 = vmatpush3.bf16.msra.mxu0 %v5258_v12  ;;  %4906 = vmatprep.subr.bf16.mxu1 %v5259_v13  ;;  %v5307_v12 = vld [vmem:[%s5575_s4 + $0x378] sm:$0xff]  }
 0xcf8   : > { %4928 = vmatprep.subr.bf16.mxu0 %v5260_v14  ;;  %v5308_v13 = vld [vmem:[%s5575_s4 + $0x3f8] sm:$0xff]  }
 0xcf9   : > { %v5309_v14 = vld [vmem:[%s5575_s4 + $0x338] sm:$0xff]  }
 0xcfa   : > { %4907 = vmatpush3.bf16.msra.mxu1 %v5261_v15  ;;  %v3029_v15 = vmax.f32 %v5902_v26, 0.0 }
 0xcfb   : > { %4929 = vmatpush3.bf16.msra.mxu0 %v5262_v18  ;;  %4908 = vmatprep.subr.bf16.mxu1 %v5263_v19  ;;  %v5310_v18 = vld [vmem:[%s5575_s4 + $0x3b8] sm:$0xff]   ;;  %v3031_v19 = vmax.f32 %v5905_v27, 0.0  ;;  %s6155_s4 = sld [smem:[#allocation28_spill]] (!%p4751_p5) }
 0xcfc   : > { %4930 = vmatprep.subr.bf16.mxu0 %v5264_v20  ;;  %v3045_v20 = vpack.c.bf16 %v3029_v15, %v3029_v15 }
 0xcfe   : > { %4909 = vmatpush3.bf16.msra.mxu1 %v5265_v21  ;;  %v3047_v21 = vpack.c.bf16 %v3031_v19, %v3031_v19 }
 0xcff   : > { %4931 = vmatpush3.bf16.msra.mxu0 %v5266_v22  ;;  %4910 = vmatprep.subr.bf16.mxu1 %v5267_v23 }
 0xd00   : > { %4932 = vmatprep.subr.bf16.mxu0 %v5268_v24  ;;  %v4620_v24 = vld [vmem:[%s1081_s30] ss:$0 sm:$0xff] }
 0xd02   : > { %4911 = vmatpush3.bf16.msra.mxu1 %v5269_v25 }
 0xd03   : > { %4933 = vmatpush3.bf16.msra.mxu0 %v5270_v30  ;;  %4912 = vmatprep.subr.bf16.mxu1 %v5271_v31 }
 0xd04   : > { %4934 = vmatprep.subr.bf16.mxu0 %v5272_v32 }
 0xd06   : > { %4913 = vmatpush3.bf16.msra.mxu1 %v5273_v59 }
 0xd07   : > { %4935 = vmatpush3.bf16.msra.mxu0 %v5274_v37  ;;  %4914 = vmatprep.subr.bf16.mxu1 %v5275_v38 }
 0xd08   : > { %4936 = vmatprep.subr.bf16.mxu0 %v5276_v39 }
 0xd0a   : > { %4915 = vmatpush3.bf16.msra.mxu1 %v5277_v56 }
 0xd0b   : > { %4937 = vmatpush3.bf16.msra.mxu0 %v5278_v17  ;;  %4944 = vmatprep.subr.bf16.mxu1 %v5279_v41 }
 0xd0c   : > { %4966 = vmatprep.subr.bf16.mxu0 %v5280_v57 }
 0xd0d   : > { %4016 = vmatmul.mubr.bf16.vlgmr.msra.gmra.mrb[40].mxu1 %v3041_v29 }
 0xd0e   : > { %4056 = vmatmul.mubr.bf16.vlgmr.msra.gmra.mrb[36].mxu0 %v3043_v44  ;;  %4945 = vmatpush3.bf16.msra.mxu1 %v5281_v28 }
 0xd0f   : > { %4095 = vmatprep.mubr.bf16.mxu1 %v3046_v4  ;;  %4967 = vmatpush3.bf16.msra.mxu0 %v5282_v60 }
 0xd10   : > { %4135 = vmatprep.mubr.bf16.mxu0 %v3048_v46  ;;  %4946 = vmatprep.subr.bf16.mxu1 %v5283_v45 }
 0xd11   : > { %4968 = vmatprep.subr.bf16.mxu0 %v5284_v61 }
 0xd12   : > { %4947 = vmatpush3.bf16.msra.mxu1 %v5285_v48 }
 0xd13   : > { %4969 = vmatpush3.bf16.msra.mxu0 %v5286_v63  ;;  %4948 = vmatprep.subr.bf16.mxu1 %v5287_v49 }
 0xd14   : > { %4970 = vmatprep.subr.bf16.mxu0 %v5288_v10 }
 0xd16   : > { %4949 = vmatpush3.bf16.msra.mxu1 %v5289_v50 }
 0xd17   : > { %4971 = vmatpush3.bf16.msra.mxu0 %v5290_v34  ;;  %4950 = vmatprep.subr.bf16.mxu1 %v5291_v35 }
 0xd18   : > { %4972 = vmatprep.subr.bf16.mxu0 %v5292_v51 }
 0xd1a   : > { %4951 = vmatpush3.bf16.msra.mxu1 %v5293_v52 }
 0xd1b   : > { %4973 = vmatpush3.bf16.msra.mxu0 %v5294_v53  ;;  %4952 = vmatprep.subr.bf16.mxu1 %v5295_v54 }
 0xd1c   : > { %4974 = vmatprep.subr.bf16.mxu0 %v5296_v55 }
 0xd1e   : > { %4953 = vmatpush3.bf16.msra.mxu1 %v5297_v0 }
 0xd1f   : > { %4975 = vmatpush3.bf16.msra.mxu0 %v5298_v1  ;;  %4954 = vmatprep.subr.bf16.mxu1 %v5299_v2 }
 0xd20   : > { %4976 = vmatprep.subr.bf16.mxu0 %v5300_v3 }
 0xd22   : > { %4955 = vmatpush3.bf16.msra.mxu1 %v5301_v5 }
 0xd23   : > { %4977 = vmatpush3.bf16.msra.mxu0 %v5302_v6  ;;  %4956 = vmatprep.subr.bf16.mxu1 %v5303_v7 }
 0xd24   : > { %4978 = vmatprep.subr.bf16.mxu0 %v5304_v8 }
 0xd26   : > { %4957 = vmatpush3.bf16.msra.mxu1 %v5305_v9 }
 0xd27   : > { %4979 = vmatpush3.bf16.msra.mxu0 %v5306_v11  ;;  %4958 = vmatprep.subr.bf16.mxu1 %v5307_v12 }
 0xd28   : > { %4980 = vmatprep.subr.bf16.mxu0 %v5308_v13 }
 0xd2a   : > { %4959 = vmatpush3.bf16.msra.mxu1 %v5309_v14 }
 0xd2b   : > { %4981 = vmatpush3.bf16.msra.mxu0 %v5310_v18 }
 0xd2d   : > { %4096 = vmatmul.mubr.bf16.vlgmr.msra.gmra.mrb[44].mxu1 %v3045_v20  ;;  %v4750_v20 = vld [vmem:[%s1087_s6] ss:$0 sm:$0xff]  ;;  %s6151_s6 = sld [smem:[#allocation26_spill]] (!%p4751_p5) }
 0xd2e   : > { %4136 = vmatmul.mubr.bf16.vlgmr.msra.gmra.mrb[40].mxu0 %v3047_v21 }
 0xda0   : > { %v4828_v22 = vpop.f32.mrb[32].mxu1  ;;  %v4850_v23 = vpop.f32.mrb[28].mxu0 }
 0xda1   : > { %v4829_v26 = vpop.f32.mrb[33].mxu1  ;;  %v4851_v25 = vpop.f32.mrb[29].mxu0 }
 0xda2   : > { %v4830_v30 = vadd.f32 %v4829_v26, %v4828_v22  ;;  %v4852_v31 = vadd.f32 %v4851_v25, %v4850_v23  ;;  %v4831_v32 = vpop.f32.mrb[34].mxu1  ;;  %v4853_v27 = vpop.f32.mrb[30].mxu0 }
 0xda3   : > { %v4832_v33 = vpop.f32.mrb[35].mxu1  ;;  %v4854_v36 = vpop.f32.mrb[31].mxu0  ;;  %v4207_v32 = vld [vmem:[%s6151_s6] sm:$0xff] (!%p4751_p5)  ;;  %v4208_v27 = vld [vmem:[%s6151_s6 + $0x8] sm:$0xff] (!%p4751_p5) }
 0xda4   : > { %v3858_v59 = vadd.f32 %v4830_v30, %v4620_v24  ;;  %v4209_v33 = vld [vmem:[%s6151_s6 + $0x10] sm:$0xff] (!%p4751_p5)  ;;  %v5339_v36 = vmov (!%p4751_p5), 0.0|0.0  }
 0xda5   : > { %5160 = vmatprep.subr.bf16.mxu0 (!%p4751_p5), %v5339_v36 }
 0xda6   : > { %v3898_v37 = vadd.f32 %v4852_v31, %v3858_v59  ;;  %v5161_v59 = vpack.c.bf16 (!%p4751_p5), %v4208_v27, %v4207_v32 }
 0xda8   : > { %5162 = vmatpush3.bf16.msra.mxu0 (!%p4751_p5), %v5161_v59 }
 0xda9   : > { %5163 = vmatprep.subr.bf16.mxu0 (!%p4751_p5), %v5339_v36 }
 0xdc0   : > { %v4872_v38 = vpop.f32.mrb[36].mxu1  ;;  %v4894_v39 = vpop.f32.mrb[32].mxu0 }
 0xdc1   : > { %v4873_v40 = vpop.f32.mrb[37].mxu1  ;;  %v4895_v16 = vpop.f32.mrb[33].mxu0 }
 0xdc2   : > { %v4874_v56 = vadd.f32 %v4873_v40, %v4872_v38  ;;  %v4896_v58 = vadd.f32 %v4895_v16, %v4894_v39  ;;  %v4875_v17 = vpop.f32.mrb[38].mxu1  ;;  %v4897_v41 = vpop.f32.mrb[34].mxu0  ;;  %v5341_v38 = vmov (!%p4751_p5), 0.0  }
 0xdc3   : > { %v4876_v42 = vpop.f32.mrb[39].mxu1  ;;  %v4898_v57 = vpop.f32.mrb[35].mxu0  ;;  %5109 = vmatprep.mubr.msk.f32.mxu0 (!%p4751_p5), %vm5340_vm4, %v5341_v38  ;;  %v4752_v17 = vld [vmem:[%s6152_s3] ss:$0 sm:$0xff] (!%p4751_p5) }
 0xdc4   : > { %v3938_v62 = vadd.f32 %v4874_v56, %v3898_v37  ;;  %v4210_v37 = vld [vmem:[%s6151_s6 + $0x18] sm:$0xff] (!%p4751_p5)  ;;  %v4753_v42 = vld [vmem:[%s6153_s29] ss:$0 sm:$0xff] (!%p4751_p5) }
 0xdc5   : > { %v5164_v39 = vpack.c.bf16 (!%p4751_p5), %v4210_v37, %v4209_v33 }
 0xdc6   : > { %v3978_v43 = vadd.f32 %v4896_v58, %v3938_v62 }
 0xdc7   : > { %5165 = vmatpush3.bf16.msra.mxu0 (!%p4751_p5), %v5164_v39 }
 0xde0   : > { %v4916_v28 = vpop.f32.mrb[40].mxu1 }
 0xde1   : > { %v4938_v29 = vpop.f32.mrb[36].mxu0  ;;  %v4917_v60 = vpop.f32.mrb[41].mxu1 }
 0xde2   : > { %v4918_v44 = vadd.f32 %v4917_v60, %v4916_v28  ;;  %v4939_v45 = vpop.f32.mrb[37].mxu0  ;;  %v4919_v4 = vpop.f32.mrb[42].mxu1 }
 0xde3   : > { %v4940_v61 = vadd.f32 %v4939_v45, %v4938_v29  ;;  %v4941_v46 = vpop.f32.mrb[38].mxu0  ;;  %v4920_v48 = vpop.f32.mrb[43].mxu1 }
 0xde4   : > { %v4018_v63 = vadd.f32 %v4918_v44, %v3978_v43  ;;  %v4942_v49 = vpop.f32.mrb[39].mxu0  ;;  %v4754_v43 = vld [vmem:[%s6154_s25] ss:$0 sm:$0xff] (!%p4751_p5) }
 0xde6   : > { %v4058_v10 = vadd.f32 %v4940_v61, %v4018_v63 }
 0xe00   : > { %v4960_v50 = vpop.f32.mrb[44].mxu1 }
 0xe01   : > { %v4982_v34 = vpop.f32.mrb[40].mxu0  ;;  %v4961_v35 = vpop.f32.mrb[45].mxu1 }
 0xe02   : > { %v4962_v51 = vadd.f32 %v4961_v35, %v4960_v50  ;;  %v4983_v52 = vpop.f32.mrb[41].mxu0  ;;  %v4963_v53 = vpop.f32.mrb[46].mxu1 }
 0xe03   : > { %v4984_v54 = vadd.f32 %v4983_v52, %v4982_v34  ;;  %v4985_v55 = vpop.f32.mrb[42].mxu0  ;;  %v4964_v0 = vpop.f32.mrb[47].mxu1 }
 0xe04   : > { %v4098_v1 = vadd.f32 %v4962_v51, %v4058_v10  ;;  %v4986_v2 = vpop.f32.mrb[43].mxu0 }
 0xe06   : > { %v4138_v3 = vadd.f32 %v4984_v54, %v4098_v1 }
 0xe08   : > { %v4145_v5 = vadd.f32 %v4138_v3, %v5758_v47  ;;  %v4749_v47 = vld [vmem:[%s1084_s2] ss:$0 sm:$0xff] }
 0xe0a   : > { %v4146_v6 = vsel %vm1109_vm2, %v4145_v5, 0.0 }
 0xe0b   : > { %4147 = vadd.xlane.f32.xlu0 %v4146_v6 }
 0xe98   : > { %v4148_v7 = vpop.xlane.xlu0 %4147 }
 0xe99   : > { %v4149_v8 = vmul.f32 0.03125, %v4148_v7 }
 0xe9b   : > { %v4150_v9 = vsub.f32 %v4145_v5, %v4149_v8 }
 0xe9d   : > { %v4151_v11 = vmul.f32 %v4150_v9, %v4150_v9 }
 0xe9f   : > { %v4152_v12 = vsel %vm1109_vm2, %v4151_v11, 0.0 }
 0xea0   : > { %4153 = vadd.xlane.f32.xlu1 %v4152_v12 }
 0xf2d   : > { %v4154_v13 = vpop.xlane.xlu1 %4153 }
 0xf2e   : > { %v4155_v14 = vmul.f32 0.03125, %v4154_v13 }
 0xf30   : > { %v4156_v15 = vadd.f32 1e-05, %v4155_v14 }
 0xf32   : > { %5323 = vrsqrt.f32 %v4156_v15 }
 0xf3c   : > { %v5324_v18 = vpop.eup %5323 }
 0xf3d   : > { %v4158_v19 = vmul.f32 %v5324_v18, %v4150_v9  ;;  %4177 = sbr.rel (%p4751_p5) target bundleno = 4435 (0x1153), region = 132 }
 0xf3f   : > { %v4165_v21 = vmul.f32 %v4749_v47, %v4158_v19 }
 0xf41   : > { %v4172_v22 = vadd.f32 %v4750_v20, %v4165_v21 }
 0xf43   : > { %4173 = vst.msk [vmem:[#allocation2] sm:$0xff] %vm1109_vm2, %v4172_v22  ;;  %v4180_v23 = vsel (!%p4751_p5), %vm1109_vm2, %v4172_v22, 0.0 }
 0xf44   : > { %4181 = vadd.xlane.f32.xlu0 %v4180_v23 }
 0xfd1   : > { %v4182_v24 = vpop.xlane.xlu0 %4181 }
 0xfd2   : > { %v4183_v26 = vmul.f32 0.03125, %v4182_v24 }
 0xfd4   : > { %v4184_v25 = vsub.f32 %v4172_v22, %v4183_v26 }
 0xfd6   : > { %v4185_v30 = vmul.f32 %v4184_v25, %v4184_v25 }
 0xfd8   : > { %v4186_v31 = vsel %vm1109_vm2, %v4185_v30, 0.0 }
 0xfd9   : > { %4187 = vadd.xlane.f32.xlu0 %v4186_v31 }
0x1066   : > { %v4188_v40 = vpop.xlane.xlu0 %4187 }
0x1067   : > { %v4189_v16 = vmul.f32 0.03125, %v4188_v40 }
0x1069   : > { %v4190_v56 = vadd.f32 1e-05, %v4189_v16 }
0x106b   : > { %5325 = vrsqrt.f32 %v4190_v56 }
0x1075   : > { %v5326_v58 = vpop.eup %5325 }
0x1076   : > { %v4192_v41 = vmul.f32 %v5326_v58, %v4184_v25 }
0x1078   : > { %v4199_v57 = vmul.f32 %v4752_v17, %v4192_v41 }
0x107a   : > { %v4206_v62 = vadd.f32 %v4753_v42, %v4199_v57 }
0x107c   : > { %5110 = vmatmul.mubr.msk.f32.vlgmr.msra.gmra.mrb[0].mxu0 %vm1109_vm2, %v4206_v62 }
0x114f   : > { %v4287_v28 = vpop.f32.mrb[0].mxu0 }
0x1150   : > { %v4288_v29 = vadd.f32 %v4754_v43, %v4287_v28  ;;  %v5111_v60 = vpop.f32.mrb[1].mxu0 }
0x1152   : > { %4292 = vst.msk [vmem:[%s6155_s4] sm:$0xff] %vm4291_vm5, %v4288_v29 }
0x1153 PF: > { %s6156_s20 = sld [smem:[#allocation3_spill]] }
0x1159   : > { %s36_s27 = sadd.s32 1, %s6156_s20  }
0x115a   : > { %p33_p6 = scmp.ge.s32.totalorder %s36_s27, 8  }
0x115c   :  { %35 = sbr.rel (!%p33_p6) target bundleno = 23 (0x17), region = 221 }

// kernel: transformer_crf_forward.5
= control target key start
LH: loop header
LB: loop body
LE: loop exit
PB: predicated region body
PF: predicated region fallthrough
CT: control target
= control target key end

     0   :  { %9 = vsyncpa [#allocation6], 0  ;;  %s549_s0 = inlined_call_operand.vmem [shape: f32[8,5], index: 0, kind: input, shape index: {}]   ;;  %s550_s1 = inlined_call_operand.vmem [shape: f32[5,5], index: 1, kind: input, shape index: {}]   ;;  %s551_s2 = inlined_call_operand.hbm [shape: f32[1], index: 2, kind: output, shape index: {0}]   ;;  %s552_s3 = inlined_call_operand.hbm [shape: s32[8], index: 3, kind: output, shape index: {1}]  }
   0x1   :  { %10 = vsyncpa [#allocation8], 0 }
   0x2   :  { %11 = vsyncpa [#allocation5], 0 }
   0x3   :  { %12 = vsyncpa [#allocation11], 0  ;;  %s19_s14 = sshll.u32 %s549_s0, 4  ;;  %s29_s17 = sshll.u32 %s550_s1, 4  ;;  %s20_s14 = int_to_ptr.vmem [resolvable:$true] %s19_s14  ;;  %s30_s17 = int_to_ptr.vmem [resolvable:$true] %s29_s17 }
   0x4   :  { %s332_s18 = scalar_lea.vmem %s20_s14, 128  ;;  %p337_p1 = scmp.lt.s32.totalorder %s20_s14, %s20_s14 }
   0x5   :  { %p333_p0 = scmp.ne.s32.totalorder %s20_s14, %s332_s18  ;;  %p338_p2 = scmp.lt.s32.totalorder %s332_s18, %s332_s18 }
   0x7   :  { %p339_p3 = por %p338_p2, %p337_p1 }
   0x9   :  { %p340_p4 = pnand %p339_p3, %p333_p0 }
   0xb   :  { %343 = shalt.err (!%p340_p4)
}
   0xc   :  { %s464_s19 = smov [#allocation4]   ;;  %s344_s20 = scalar_lea.vmem %s30_s17, 128 }
   0xd   :  { %22 = dma.vmem_to_smem %s20_s14, 128, %s464_s19, [#allocation6]  }
   0xe   :  { %p345_p5 = scmp.ne.s32.totalorder %s30_s17, %s344_s20  ;;  %p349_p6 = scmp.lt.s32.totalorder %s30_s17, %s30_s17 }
   0xf   :  { %p350_p7 = scmp.lt.s32.totalorder %s344_s20, %s344_s20 }
  0x11   :  { %p351_p8 = por %p350_p7, %p349_p6 }
  0x13   :  { %p352_p9 = pnand %p351_p8, %p345_p5 }
  0x15   :  { %355 = shalt.err (!%p352_p9)
}
  0x16   :  { %s465_s0 = smov [#allocation7]  }
  0x17   :  { %32 = dma.vmem_to_smem %s30_s17, 128, %s465_s0, [#allocation8]  }
  0x18   :  { %416 = dma.done.wait [#allocation6], 128  }
  0x19   :  { %417 = vsyncadd [#allocation6], 4294967168 }
  0x1a   :  { %418 = dma.done.wait [#allocation8], 128  }
  0x1b   :  { %419 = vsyncadd [#allocation8], 4294967168 }
  0x1c   :  { %39 = sfence }
  0x1d   :  { %s466_s1 = smov -10000.0   ;;  %s467_s21 = smov 0.0  }
  0x1e   :  { %41 = sst [smem:[#allocation2]] %s466_s1  ;;  %s496_s22 = smov 0  }
  0x1f   :  { %43 = sst [smem:[#allocation2 + $0x1]] %s466_s1 }
  0x20   :  { %45 = sst [smem:[#allocation2 + $0x2]] %s466_s1 }
  0x21   :  { %47 = sst [smem:[#allocation2 + $0x3]] %s467_s21 }
  0x22   :  { %49 = sst [smem:[#allocation2 + $0x4]] %s466_s1 }
  0x23 LB: > { %p56_p10 = scmp.lt.s32.totalorder %s426_s22, 0  ;;  %s57_s23 = ssub.s32 0, %s426_s22  ;;  %s426_s22 = sphi %s496_s22, %s55_s22  }
  0x24   : > { %s235_s24 = smin.u32 %s426_s22, %s57_s23  ;;  %s507_s29 = smov 0  }
  0x25   : > { %s59_s25 = sand.u32 1, %s235_s24  }
  0x26   : > { %s60_s26 = ssub.s32 0, %s59_s25 }
  0x27   : > { %s554_s26 = smov (!%p56_p10, %s60_s26), %s59_s25 }
  0x28   : > { %p237_p11 = scmp.lt.s32.totalorder %s554_s26, 0  ;;  %s66_s27 = sadd.s32 2, %s554_s26 }
  0x2a   : > { %s556_s27 = smov (!%p237_p11, %s66_s27), %s554_s26 }
  0x2b   : > { %s68_s28 = ssub.s32 1, %s556_s27 }
  0x2c LB: >> { %s432_s30 = smov 0   ;;  %s436_s4 = smov -1e+30   ;;  %s430_s29 = sphi %s507_s29, %s74_s29  }
  0x2d   : >> { %s440_s5 = smov 0  }
  0x2e LB: >>> { %s83_s6 = sshra.s32 %s442_s5, 7  ;;  %s88_s7 = sand.u32 127, %s442_s5  ;;  %s442_s5 = sphi %s440_s5, %s80_s5   ;;  %s438_s4 = sphi %s436_s4, %s437_s4   ;;  %s434_s30 = sphi %s432_s30, %s433_s30  }
  0x2f   : >>> { %s85_s8 = sadd.s32 %s83_s6, %s556_s27  ;;  %s91_s9 = sadd.s32 %s430_s29, %s83_s6 }
  0x30   : >>> { %s238_s10 = sshll.u32 %s85_s8, 7  ;;  %s239_s11 = sshll.u32 %s91_s9, 7 }
  0x31   : >>> { %s89_s12 = sadd.s32 %s238_s10, %s88_s7  ;;  %s93_s13 = sadd.s32 %s239_s11, %s88_s7 }
  0x32   : >>> { %s90_s14 = sld [smem:[#allocation2 + %s89_s12]] }
  0x33   : >>> { %s94_s15 = sld [smem:[#allocation7 + %s93_s13]] }
  0x39   : >>> { %s95_s16 = sadd.f32 %s94_s15, %s90_s14 }
  0x3b   : >>> { %p96_p12 = scmp.gt.f32.partialorder %s95_s16, %s438_s4 }
  0x3d   : >>> { %s558_s16 = smov (!%p96_p12, %s95_s16), %s438_s4 }
  0x3e   : >>> { %s98_s17 = scalar_select %p96_p12, %s442_s5, %s434_s30  }
  0x3f   : >>> { %s80_s5 = sadd.s32 1, %s442_s5   ;;  %s437_s4 = smov %s558_s16  }
  0x40   : >>> { %p77_p13 = scmp.ge.s32.totalorder %s80_s5, 5   ;;  %s433_s30 = smov %s98_s17  }
  0x41   : >> { %s99_s18 = sshra.s32 (%p77_p13), %s430_s29, 7  ;;  %s104_s19 = sand.u32 (%p77_p13), 127, %s430_s29 }
  0x42   : >> { %79 = sbr.rel (!%p77_p13) target bundleno = 46 (0x2e), region = 89  ;;  %s101_s20 = sadd.s32 (%p77_p13), %s426_s22, %s99_s18 }
  0x43   : >> { %s110_s0 = sadd.s32 (%p77_p13), %s99_s18, %s68_s28  ;;  %s240_s1 = sshll.u32 (%p77_p13), %s101_s20, 7 }
  0x44   : >> { %s105_s21 = sadd.s32 (%p77_p13), %s240_s1, %s104_s19  ;;  %s241_s23 = sshll.u32 (%p77_p13), %s110_s0, 7 }
  0x45   : >> { %s108_s24 = sld [smem:[#allocation4 + %s105_s21]] (%p77_p13)  ;;  %s106_s25 = scalar_lea.smem (%p77_p13), [#allocation3], %s105_s21 }
  0x46   : >> { %107 = sst [smem:[%s106_s25]] (%p77_p13), %s98_s17  ;;  %s112_s26 = sadd.s32 (%p77_p13), %s241_s23, %s104_s19 }
  0x47   : >> { %s113_s4 = scalar_lea.smem (%p77_p13), [#allocation2], %s112_s26  ;;  %s74_s29 = sadd.s32 (%p77_p13), 1, %s430_s29  }
  0x48   : >> { %p71_p0 = scmp.ge.s32.totalorder (%p77_p13), %s74_s29, 5  }
  0x49   : > { %s55_s22 = sadd.s32 (%p71_p0), 1, %s426_s22  }
  0x4a   : > { %73 = sbr.rel (!%p71_p0) target bundleno = 44 (0x2c), region = 100  ;;  %p52_p1 = scmp.ge.s32.totalorder (%p71_p0), %s55_s22, 8  }
  0x4b   : >> { %s109_s30 = sadd.f32 %s108_s24, %s558_s16 }
  0x4d   : >> { %114 = sst [smem:[%s113_s4]] %s109_s30 }
  0x51   :  { %54 = sbr.rel (!%p52_p1) target bundleno = 35 (0x23), region = 111  ;;  %s444_s5 = smov (%p52_p1), 0  }
  0x52   :  { %s448_s6 = smov (%p52_p1), -1e+30   ;;  %s452_s7 = smov (%p52_p1), 0  }
  0x58 LB: > { %s124_s8 = sshra.s32 %s454_s7, 7  ;;  %s129_s10 = sand.u32 127, %s454_s7  ;;  %s454_s7 = sphi %s452_s7, %s120_s7   ;;  %s450_s6 = sphi %s448_s6, %s449_s6   ;;  %s446_s5 = sphi %s444_s5, %s445_s5  }
  0x59   : > { %s244_s9 = sshll.u32 %s124_s8, 7  ;;  %s123_s11 = sld [smem:[#allocation2 + %s454_s7]] }
  0x5a   : > { %s245_s29 = sadd.s32 512, %s244_s9 }
  0x5b   : > { %s130_s12 = sadd.s32 %s245_s29, %s129_s10 }
  0x5c   : > { %s131_s27 = sld [smem:[#allocation7 + %s130_s12]] }
  0x62   : > { %s132_s28 = sadd.f32 %s131_s27, %s123_s11 }
  0x64   : > { %p133_p2 = scmp.gt.f32.partialorder %s132_s28, %s450_s6 }
  0x66   : > { %s560_s28 = smov (!%p133_p2, %s132_s28), %s450_s6 }
  0x67   : > { %s135_s22 = scalar_select %p133_p2, %s454_s7, %s446_s5  }
  0x68   : > { %s120_s7 = sadd.s32 1, %s454_s7   ;;  %s449_s6 = smov %s560_s28  }
  0x69   : > { %p117_p3 = scmp.ge.s32.totalorder %s120_s7, 5   ;;  %s445_s5 = smov %s135_s22  }
  0x6a   :  { %137 = sst [smem:[#allocation9]] (%p117_p3), %s560_s28  ;;  %s456_s13 = smov (%p117_p3), %s135_s22  }
  0x6b   :  { %119 = sbr.rel (!%p117_p3) target bundleno = 88 (0x58), region = 122  ;;  %139 = sst [smem:[#allocation10 + $0x7]] (%p117_p3), %s135_s22 }
  0x6c   :  { %s460_s14 = smov (%p117_p3), 0  }
  0x72 LB: > { %s147_s15 = ssub.s32 7, %s462_s14  ;;  %s148_s16 = sshra.s32 %s458_s13, 7  ;;  %s462_s14 = sphi %s460_s14, %s145_s14   ;;  %s458_s13 = sphi %s456_s13, %s155_s13  }
  0x73   : > { %s150_s17 = sadd.s32 %s148_s16, %s147_s15  ;;  %s153_s18 = sand.u32 127, %s458_s13 }
  0x74   : > { %s243_s19 = sshll.u32 %s150_s17, 7  ;;  %s156_s0 = ssub.s32 6, %s462_s14 }
  0x75   : > { %s154_s20 = sadd.s32 %s243_s19, %s153_s18  ;;  %s157_s1 = scalar_lea.smem [#allocation10], %s156_s0 }
  0x76   : > { %s155_s13 = sld [smem:[#allocation3 + %s154_s20]]   ;;  %s145_s14 = sadd.s32 1, %s462_s14  }
  0x77   : > { %p142_p4 = scmp.ge.s32.totalorder %s145_s14, 7  }
  0x78   :  { %s356_s24 = scalar_lea.hbm (%p142_p4), %s551_s2, 16 }
  0x79   :  { %144 = sbr.rel (!%p142_p4) target bundleno = 114 (0x72), region = 133  ;;  %p357_p5 = scmp.ne.s32.totalorder (%p142_p4), %s551_s2, %s356_s24 }
  0x7a   :  { %p360_p6 = scmp.lt.u32.totalorder (%p142_p4), %s356_s24, %s551_s2 }
  0x7c   : > { %158 = sst [smem:[%s157_s1]] %s155_s13  ;;  %p362_p7 = pnand (%p142_p4), %p360_p6, %p357_p5 }
  0x80   :  { %365 = shalt.err (!%p362_p7)
}
  0x81   :  { %s468_s5 = smov [#allocation9]   ;;  %s366_s10 = scalar_lea.hbm %s552_s3, 16 }
  0x82   :  { %166 = dma.smem_to_hbm %s468_s5, 16, %s551_s2, [#allocation5]  }
  0x83   :  { %p367_p8 = scmp.ne.s32.totalorder %s552_s3, %s366_s10  ;;  %p370_p9 = scmp.lt.u32.totalorder %s366_s10, %s552_s3 }
  0x85   :  { %p372_p10 = pnand %p370_p9, %p367_p8 }
  0x87   :  { %375 = shalt.err (!%p372_p10)
}
  0x88   :  { %s469_s28 = smov [#allocation10]  }
  0x89   :  { %174 = dma.smem_to_hbm %s469_s28, 16, %s552_s3, [#allocation11]  }
  0x8a   :  { %420 = dma.done.wait [#allocation5], 16  }
  0x8b   :  { %421 = vsyncadd [#allocation5], 4294967280 }
  0x8c   :  { %422 = dma.done.wait [#allocation11], 16  }
  0x8d   :  { %423 = vsyncadd [#allocation11], 4294967280 }
  0x8e   :  { %181 = sfence }
  0x8f   :  { %182 = vsyncpa [#allocation5], 1 }
  0x90   :  { %183 = vsyncpa [#allocation11], 1 }
  0x91   :  { %184 = vsyncpa [#allocation6], 1 }
  0x92   :  { %185 = vsyncpa [#allocation8], 1 }

</bundles_post_ra>
